<compile_context>
chip_gen: v7x
topology: tpu7x:2x2x1
jax: 0.10.0
libtpu: 0.0.40
codegen_flags: <defaults>
</compile_context>

<pallas_src>
import functools

import jax
import jax.numpy as jnp
from jax.experimental import pallas as pl
from jax.experimental.pallas import tpu as pltpu


def _round_up(x, m):
    return ((x + m - 1) // m) * m


def _vmem_budget_bytes():
    """Per-TensorCore physical VMEM budget for the local device generation."""
    try:
        kind = jax.devices()[0].device_kind.lower()
    except Exception:  # pragma: no cover - defensive
        kind = ""
    if "v7" in kind:
        return 64 * 1024 * 1024
    return 128 * 1024 * 1024


def _estimate_vmem_bytes(TM, D_p, H_p, E_p, V, weight_dtype, out_dtype,
                         weight_buffers):
    wd = jnp.dtype(weight_dtype).itemsize
    od = jnp.dtype(out_dtype).itemsize
    H4 = 4 * H_p
    weights = (D_p * H4 + (E_p + H_p) * H4 + H_p * V + V * E_p) * wd
    weights += (H4 + V) * 4                       # f32 biases
    weights *= weight_buffers
    out_buf = 2 * TM * V * od                     # double-buffered output tile
    x_buf = 2 * TM * D_p * 4                      # double-buffered x tile
    scratch = TM * (H4 + 2 * H_p + E_p) * 4       # xg, h, c, emb_last
    return weights + out_buf + x_buf + scratch


# ----------------------------- Pallas kernel ------------------------------ #
def _lstm_translation_kernel(x_ref, wihx_ref, wrec_ref, bias_ref, wout_ref,
                             bout_ref, emb_ref, out_ref,
                             xg_ref, h_ref, c_ref, el_ref,
                             *, hidden_dim, num_steps, oov_id, matmul_dtype):
    H = hidden_dim                 # padded hidden dim (multiple of 128)
    k = pl.program_id(1)           # fertility step (trailing "arbitrary" axis)

    @pl.when(k == 0)
    def _init():
        # Loop-invariant part of the gate pre-activation, bias folded in.
        x = x_ref[...]
        xg_ref[...] = (
            jnp.dot(x.astype(matmul_dtype), wihx_ref[...],
                    preferred_element_type=jnp.float32)
            + bias_ref[...])
        h_ref[...] = jnp.zeros_like(h_ref)
        c_ref[...] = jnp.zeros_like(c_ref)
        # Soft embedding of the one-hot OOV init is just the OOV embedding row.
        oov_row = emb_ref[pl.ds(oov_id, 1), :].astype(jnp.float32)   # (1, E_p)
        el_ref[...] = jnp.broadcast_to(oov_row, el_ref.shape)

    h = h_ref[...]
    c = c_ref[...]

    # Fused recurrent matmul: [emb_last | h] @ [W_ih_e ; W_hh] -> (TM, 4*H).
    # Both operands are 128-lane aligned (E_p, H_p multiples of 128), so the
    # concat is a free vreg placement and the gate slices below are views.
    rec_in = jnp.concatenate([el_ref[...], h], axis=1)
    gates = xg_ref[...] + jnp.dot(rec_in.astype(matmul_dtype), wrec_ref[...],
                                  preferred_element_type=jnp.float32)

    # PyTorch LSTMCell gate order: i, f, g, o.  Elementwise stays f32.
    i_g = jax.nn.sigmoid(gates[:, 0 * H:1 * H])
    f_g = jax.nn.sigmoid(gates[:, 1 * H:2 * H])
    g_g = jnp.tanh(gates[:, 2 * H:3 * H])
    o_g = jax.nn.sigmoid(gates[:, 3 * H:4 * H])
    c = f_g * c + i_g * g_g
    h = o_g * jnp.tanh(c)
    h_ref[...] = h
    c_ref[...] = c

    # Output projection + log_softmax (single exp pass, reused below).
    logits = (jnp.dot(h.astype(matmul_dtype), wout_ref[...],
                      preferred_element_type=jnp.float32) + bout_ref[...])
    m = jnp.max(logits, axis=-1, keepdims=True)
    shifted = logits - m
    p = jnp.exp(shifted)
    s = jnp.sum(p, axis=-1, keepdims=True)

    # Dense, lane-aligned (TM, V) slab store straight into the final layout.
    out_ref[...] = (shifted - jnp.log(s)).astype(out_ref.dtype)

    # Soft-embed this step's distribution for step k+1 (skip on the last step).
    @pl.when(k + 1 < num_steps)
    def _next_emb():
        probs = p * pl.reciprocal(s, approx=True)   # cheap (TM,1) reciprocal
        el_ref[...] = jnp.dot(probs.astype(matmul_dtype), emb_ref[...],
                              preferred_element_type=jnp.float32)


# --------------------------- Weight preparation ---------------------------- #
def _prep_params(params, input_dim, *, weight_dtype):
    """Transpose / fuse / 128-pad the module parameters for the kernel."""
    w_ih = jnp.asarray(params["w_ih"], jnp.float32)    # (4H, D_in + E)
    w_hh = jnp.asarray(params["w_hh"], jnp.float32)    # (4H, H)
    b_ih = jnp.asarray(params["b_ih"], jnp.float32)    # (4H,)
    b_hh = jnp.asarray(params["b_hh"], jnp.float32)    # (4H,)
    w_out = jnp.asarray(params["w_out"], jnp.float32)  # (V, H)
    b_out = jnp.asarray(params["b_out"], jnp.float32)  # (V,)
    emb = jnp.asarray(params["emb"], jnp.float32)      # (V, E)

    H4 = w_ih.shape[0]
    H = H4 // 4
    V, E = emb.shape
    D_in = input_dim
    assert w_ih.shape[1] == D_in + E
    assert w_hh.shape == (H4, H)
    assert w_out.shape == (V, H)
    assert V % 128 == 0, "vocab size must be padded to a multiple of 128 lanes"

    H_p = _round_up(H, 128)
    E_p = _round_up(E, 128)
    D_p = _round_up(D_in, 128)

    def pad_gates(w, in_dim, in_pad):
        # (4H, in_dim) -> (in_pad, 4*H_p), zero-padded per gate block so the
        # kernel's gates[:, g*H_p:(g+1)*H_p] slices stay lane-aligned views.
        w = w.reshape(4, H, in_dim)
        w = jnp.pad(w, ((0, 0), (0, H_p - H), (0, in_pad - in_dim)))
        return jnp.transpose(w.reshape(4 * H_p, in_pad))

    wihx = pad_gates(w_ih[:, :D_in], D_in, D_p).astype(weight_dtype)   # (D_p, 4H_p)
    wihe = pad_gates(w_ih[:, D_in:], E, E_p)                            # (E_p, 4H_p)
    whh = pad_gates(w_hh, H, H_p)                                       # (H_p, 4H_p)
    wrec = jnp.concatenate([wihe, whh], axis=0).astype(weight_dtype)    # (E_p+H_p, 4H_p)
    bias = jnp.pad((b_ih + b_hh).reshape(4, H),
                   ((0, 0), (0, H_p - H))).reshape(1, 4 * H_p)          # (1, 4H_p) f32
    wout = jnp.pad(jnp.transpose(w_out),
                   ((0, H_p - H), (0, 0))).astype(weight_dtype)         # (H_p, V)
    bout = b_out.reshape(1, V)                                          # (1, V) f32
    emb_w = jnp.pad(emb, ((0, 0), (0, E_p - E))).astype(weight_dtype)   # (V, E_p)

    return dict(wihx=wihx, wrec=wrec, bias=bias, wout=wout, bout=bout,
                emb=emb_w, dims=(H, H_p, E, E_p, D_p, V))


# ------------------------------- Wrapper ----------------------------------- #
def lstm_translation_forward(embedded_input, input_mask, params, *,
                             maximum_fertility, oov_id, tile_rows=None,
                             weight_dtype=jnp.bfloat16,
                             out_dtype=jnp.bfloat16,
                             vmem_limit_bytes=None,
                             single_buffer_weights=True):
    """embedded_input: (B, S, D_in); input_mask unused (as in the PyTorch ref)."""
    del input_mask  # not used by the reference forward
    B, S, D_in = embedded_input.shape
    N = B * S
    K1 = maximum_fertility + 1

    prep = _prep_params(params, D_in, weight_dtype=weight_dtype)
    _, H_p, _, E_p, D_p, V = prep["dims"]

    x = embedded_input.reshape(N, D_in).astype(jnp.float32)
    if D_p != D_in:
        x = jnp.pad(x, ((0, 0), (0, D_p - D_in)))

    # Row tile: multiple of 16 for bf16 output (min bf16 tile (16,128)), else 8.
    # Generation-aware cap: 128 on v7x (64 MiB/TC), 256 elsewhere, bounded so
    # the double-buffered (TM, V) output tile fits comfortably.
    sub = 16 if jnp.dtype(out_dtype).itemsize == 2 else 8
    budget = _vmem_budget_bytes()
    if tile_rows is None:
        tm = 128 if budget <= (64 << 20) else 256
        out_elem = jnp.dtype(out_dtype).itemsize
        while tm > sub and 2 * tm * V * out_elem > budget // 4:
            tm //= 2
        tile_rows = min(max(tm, sub), _round_up(N, sub))
    TM = _round_up(max(int(tile_rows), sub), sub)

    N_pad = _round_up(N, TM)
    if N_pad != N:
        x = jnp.pad(x, ((0, N_pad - N), (0, 0)))

    kernel = functools.partial(
        _lstm_translation_kernel, hidden_dim=H_p, num_steps=K1,
        oov_id=int(oov_id), matmul_dtype=weight_dtype)

    def _call(buffered):
        wbufs = 1 if buffered else 2
        limit = vmem_limit_bytes
        if limit is None:
            est = _estimate_vmem_bytes(TM, D_p, H_p, E_p, V, weight_dtype,
                                       out_dtype, wbufs)
            limit = min(budget, max(32 << 20, int(1.3 * est) + (4 << 20)))

        def const_spec(shape):
            # Loop-invariant operand: constant index map; single-buffer if
            # supported so its VMEM footprint is 1x instead of 2x.
            idx = lambda i, k, _s=shape: (0,) * len(_s)
            if buffered:
                return pl.BlockSpec(shape, idx, pipeline_mode=pl.Buffered(1))
            return pl.BlockSpec(shape, idx)

        grid_spec = pltpu.PrefetchScalarGridSpec(
            num_scalar_prefetch=0,
            grid=(N_pad // TM, K1),
            in_specs=[
                pl.BlockSpec((TM, D_p), lambda i, k: (i, 0)),   # x rows tile
                const_spec((D_p, 4 * H_p)),                     # W_ih (x part)
                const_spec((E_p + H_p, 4 * H_p)),               # [W_ih_e; W_hh]
                const_spec((1, 4 * H_p)),                       # b_ih + b_hh
                const_spec((H_p, V)),                           # W_out
                const_spec((1, V)),                             # b_out
                const_spec((V, E_p)),                           # embedding table
            ],
            # Final layout (N_pad, K1*V): each grid point writes one dense,
            # lane-aligned (TM, V) slab; no wrapper transpose needed.
            out_specs=pl.BlockSpec((TM, V), lambda i, k: (i, k)),
            scratch_shapes=[
                pltpu.VMEM((TM, 4 * H_p), jnp.float32),   # x @ W_ih_x + bias
                pltpu.VMEM((TM, H_p), jnp.float32),       # h carry
                pltpu.VMEM((TM, H_p), jnp.float32),       # c carry
                pltpu.VMEM((TM, E_p), jnp.float32),       # soft-embedded last out
            ])

        return pl.pallas_call(
            kernel,
            out_shape=jax.ShapeDtypeStruct((N_pad, K1 * V), out_dtype),
            grid_spec=grid_spec,
            compiler_params=pltpu.CompilerParams(
                dimension_semantics=("parallel", "arbitrary"),
                vmem_limit_bytes=int(limit)),
        )(x, prep["wihx"], prep["wrec"], prep["bias"], prep["wout"],
          prep["bout"], prep["emb"])

    if single_buffer_weights and hasattr(pl, "Buffered"):
        try:
            out = _call(True)
        except Exception:
            # Fallback: installed JAX rejects single-buffered pipeline mode.
            out = _call(False)
    else:
        out = _call(False)

    if N_pad != N:
        out = out[:N]
    # (N, K1*V) -> (B, S, K1, V): metadata-only reshape (row-major layout).
    return out.reshape(B, S, K1, V)


# --------------------------- Pure-JAX reference ---------------------------- #
def reference_forward(embedded_input, params, *, maximum_fertility, oov_id):
    B, S, D_in = embedded_input.shape
    N = B * S
    w_ih, w_hh = params["w_ih"], params["w_hh"]
    b_ih, b_hh = params["b_ih"], params["b_hh"]
    w_out, b_out, emb = params["w_out"], params["b_out"], params["emb"]
    H = w_hh.shape[1]
    V, E = emb.shape
    x = embedded_input.reshape(N, D_in)

    h = jnp.zeros((N, H), jnp.float32)
    c = jnp.zeros((N, H), jnp.float32)
    last = jnp.zeros((N, V), jnp.float32).at[:, oov_id].set(1.0)
    outs = []
    for _ in range(maximum_fertility + 1):
        emb_last = last @ emb
        inp = jnp.concatenate([x, emb_last], axis=1)
        gates = inp @ w_ih.T + b_ih + h @ w_hh.T + b_hh
        i_g = jax.nn.sigmoid(gates[:, 0 * H:1 * H])
        f_g = jax.nn.sigmoid(gates[:, 1 * H:2 * H])
        g_g = jnp.tanh(gates[:, 2 * H:3 * H])
        o_g = jax.nn.sigmoid(gates[:, 3 * H:4 * H])
        c = f_g * c + i_g * g_g
        h = o_g * jnp.tanh(c)
        logits = h @ w_out.T + b_out
        log_probs = jax.nn.log_softmax(logits, axis=-1)
        last = jnp.exp(log_probs)
        outs.append(log_probs)
    return jnp.stack(outs, axis=1).reshape(B, S, maximum_fertility + 1, V)


# --------------------------------- Main ------------------------------------ #
if __name__ == "__main__":
    # Small config consistent with the module's __init__.
    B, S = 2, 8
    INPUT_DIM = 16        # dim of embedded_input
    EMB_DIM = 16          # target-side embedding dim
    HIDDEN_DIM = 32
    VOCAB_SIZE = 128
    MAX_FERTILITY = 3     # -> K+1 = 4 output steps
    OOV_ID = 1            # AllenNLP convention: 0=pad, 1=@@UNKNOWN@@

    key = jax.random.PRNGKey(0)
    ks = jax.random.split(key, 8)
    scale = 0.1
    params = {
        "w_ih": scale * jax.random.normal(
            ks[0], (4 * HIDDEN_DIM, INPUT_DIM + EMB_DIM), jnp.float32),
        "w_hh": scale * jax.random.normal(
            ks[1], (4 * HIDDEN_DIM, HIDDEN_DIM), jnp.float32),
        "b_ih": scale * jax.random.normal(ks[2], (4 * HIDDEN_DIM,), jnp.float32),
        "b_hh": scale * jax.random.normal(ks[3], (4 * HIDDEN_DIM,), jnp.float32),
        "w_out": scale * jax.random.normal(
            ks[4], (VOCAB_SIZE, HIDDEN_DIM), jnp.float32),
        "b_out": scale * jax.random.normal(ks[5], (VOCAB_SIZE,), jnp.float32),
        "emb": scale * jax.random.normal(ks[6], (VOCAB_SIZE, EMB_DIM), jnp.float32),
    }

    embedded_input = jax.random.normal(ks[7], (B, S, INPUT_DIM), jnp.float32)
    input_mask = jnp.ones((B, S), jnp.int32)

    ref = reference_forward(
        embedded_input, params, maximum_fertility=MAX_FERTILITY, oov_id=OOV_ID)
    ref = jax.block_until_ready(ref)

    # f32 weights / f32 output path (near-exact parity with the reference).
    out_f32 = lstm_translation_forward(
        embedded_input, input_mask, params,
        maximum_fertility=MAX_FERTILITY, oov_id=OOV_ID,
        weight_dtype=jnp.float32, out_dtype=jnp.float32)
    out_f32 = jax.block_until_ready(out_f32)
    assert out_f32.shape == (B, S, MAX_FERTILITY + 1, VOCAB_SIZE), out_f32.shape
    err = float(jnp.max(jnp.abs(out_f32 - ref)))
    assert err < 5e-4, err

    # Default path: bf16 weights / bf16 output (MXU-native on all generations,
    # halves weight VMEM and output HBM traffic); checked with loose tolerance.
    out_bf16 = lstm_translation_forward(
        embedded_input, input_mask, params,
        maximum_fertility=MAX_FERTILITY, oov_id=OOV_ID)
    out_bf16 = jax.block_until_ready(out_bf16)
    assert out_bf16.shape == (B, S, MAX_FERTILITY + 1, VOCAB_SIZE), out_bf16.shape
    err_bf16 = float(jnp.max(jnp.abs(out_bf16.astype(jnp.float32) - ref)))
    assert err_bf16 < 1e-1, err_bf16

    print("KERNEL_OK")
</pallas_src>

<mosaic_0001>
module attributes {stable_mosaic.version = 11 : i64} {
  func.func @_lstm_translation_kernel(%arg0: i32, %arg1: i32, %arg2: memref<16x128xf32, #tpu.memory_space<vmem>>, %arg3: memref<128x512xf32, #tpu.memory_space<vmem>>, %arg4: memref<256x512xf32, #tpu.memory_space<vmem>>, %arg5: memref<1x512xf32, #tpu.memory_space<vmem>>, %arg6: memref<128x128xf32, #tpu.memory_space<vmem>>, %arg7: memref<1x128xf32, #tpu.memory_space<vmem>>, %arg8: memref<128x128xf32, #tpu.memory_space<vmem>>, %arg9: memref<16x128xf32, #tpu.memory_space<vmem>>, %arg10: memref<16x512xf32, #tpu.memory_space<vmem>>, %arg11: memref<16x128xf32, #tpu.memory_space<vmem>>, %arg12: memref<16x128xf32, #tpu.memory_space<vmem>>, %arg13: memref<16x128xf32, #tpu.memory_space<vmem>>) attributes {dimension_semantics = [#tpu.dimension_semantics<parallel>, #tpu.dimension_semantics<arbitrary>], iteration_bounds = array<i64: 1, 4>, scalar_prefetch = 0 : i64, scratch_operands = 4 : i64, tpu.core_type = #tpu.core_type<tc>, window_params = [{transform_indices = @transform_0, window_bounds = array<i64: 16, 128>}, {pipeline_mode = #tpu.pipeline_mode<synchronous>, transform_indices = @transform_1, window_bounds = array<i64: 128, 512>}, {pipeline_mode = #tpu.pipeline_mode<synchronous>, transform_indices = @transform_2, window_bounds = array<i64: 256, 512>}, {pipeline_mode = #tpu.pipeline_mode<synchronous>, transform_indices = @transform_3, window_bounds = array<i64: 1, 512>}, {pipeline_mode = #tpu.pipeline_mode<synchronous>, transform_indices = @transform_4, window_bounds = array<i64: 128, 128>}, {pipeline_mode = #tpu.pipeline_mode<synchronous>, transform_indices = @transform_5, window_bounds = array<i64: 1, 128>}, {pipeline_mode = #tpu.pipeline_mode<synchronous>, transform_indices = @transform_6, window_bounds = array<i64: 128, 128>}, {transform_indices = @transform_7, window_bounds = array<i64: 16, 128>}]} {
    %c0_i32 = arith.constant 0 : i32
    %0 = arith.cmpi eq, %arg1, %c0_i32 : i32
    %1 = arith.extui %0 : i1 to i32
    %c0_i32_0 = arith.constant 0 : i32
    %2 = arith.cmpi ne, %1, %c0_i32_0 : i32
    scf.if %2 {
      %c0_27 = arith.constant 0 : index
      %c0_28 = arith.constant 0 : index
      %58 = vector.load %arg2[%c0_27, %c0_28] : memref<16x128xf32, #tpu.memory_space<vmem>>, vector<16x128xf32>
      %c0_29 = arith.constant 0 : index
      %c0_30 = arith.constant 0 : index
      %59 = vector.load %arg3[%c0_29, %c0_30] : memref<128x512xf32, #tpu.memory_space<vmem>>, vector<128x512xf32>
      %cst_31 = arith.constant dense<0.000000e+00> : vector<16x512xf32>
      %60 = tpu.matmul %58, %59, %cst_31 {dimension_numbers = #tpu.dot_dimension_numbers<[1], [0], [0], [1], [0, 0, 1, 1], [], []>} : vector<16x128xf32>, vector<128x512xf32>, vector<16x512xf32> -> vector<16x512xf32>
      %c0_32 = arith.constant 0 : index
      %c0_33 = arith.constant 0 : index
      %61 = vector.load %arg5[%c0_32, %c0_33] : memref<1x512xf32, #tpu.memory_space<vmem>>, vector<1x512xf32>
      %62 = vector.broadcast %61 : vector<1x512xf32> to vector<16x512xf32>
      %63 = arith.addf %60, %62 : vector<16x512xf32>
      %c0_34 = arith.constant 0 : index
      %c0_35 = arith.constant 0 : index
      %64 = vector.load %arg10[%c0_34, %c0_35] : memref<16x512xf32, #tpu.memory_space<vmem>>, vector<16x512xf32>
      tpu.vector_store %arg10[%c0_34, %c0_35], %63 {strides = array<i32>} : memref<16x512xf32, #tpu.memory_space<vmem>>, vector<16x512xf32>,
      %cst_36 = arith.constant 0.000000e+00 : f32
      %65 = vector.broadcast %cst_36 : f32 to vector<16x128xf32>
      %c0_37 = arith.constant 0 : index
      %c0_38 = arith.constant 0 : index
      %66 = vector.load %arg11[%c0_37, %c0_38] : memref<16x128xf32, #tpu.memory_space<vmem>>, vector<16x128xf32>
      tpu.vector_store %arg11[%c0_37, %c0_38], %65 {strides = array<i32>} : memref<16x128xf32, #tpu.memory_space<vmem>>, vector<16x128xf32>,
      %cst_39 = arith.constant 0.000000e+00 : f32
      %67 = vector.broadcast %cst_39 : f32 to vector<16x128xf32>
      %c0_40 = arith.constant 0 : index
      %c0_41 = arith.constant 0 : index
      %68 = vector.load %arg12[%c0_40, %c0_41] : memref<16x128xf32, #tpu.memory_space<vmem>>, vector<16x128xf32>
      tpu.vector_store %arg12[%c0_40, %c0_41], %67 {strides = array<i32>} : memref<16x128xf32, #tpu.memory_space<vmem>>, vector<16x128xf32>,
      %c1 = arith.constant 1 : index
      %c0_42 = arith.constant 0 : index
      %69 = vector.load %arg8[%c1, %c0_42] : memref<128x128xf32, #tpu.memory_space<vmem>>, vector<1x128xf32>
      %70 = vector.shape_cast %69 : vector<1x128xf32> to vector<1x128xf32>
      %71 = vector.broadcast %70 : vector<1x128xf32> to vector<16x128xf32>
      %c0_43 = arith.constant 0 : index
      %c0_44 = arith.constant 0 : index
      %72 = vector.load %arg13[%c0_43, %c0_44] : memref<16x128xf32, #tpu.memory_space<vmem>>, vector<16x128xf32>
      tpu.vector_store %arg13[%c0_43, %c0_44], %71 {strides = array<i32>} : memref<16x128xf32, #tpu.memory_space<vmem>>, vector<16x128xf32>,
    } else {
    }
    %c0 = arith.constant 0 : index
    %c0_1 = arith.constant 0 : index
    %3 = vector.load %arg11[%c0, %c0_1] : memref<16x128xf32, #tpu.memory_space<vmem>>, vector<16x128xf32>
    %c0_2 = arith.constant 0 : index
    %c0_3 = arith.constant 0 : index
    %4 = vector.load %arg12[%c0_2, %c0_3] : memref<16x128xf32, #tpu.memory_space<vmem>>, vector<16x128xf32>
    %c0_4 = arith.constant 0 : index
    %c0_5 = arith.constant 0 : index
    %5 = vector.load %arg13[%c0_4, %c0_5] : memref<16x128xf32, #tpu.memory_space<vmem>>, vector<16x128xf32>
    %6 = tpu.concatenate %5, %3 in 1 : vector<16x128xf32>, vector<16x128xf32> -> vector<16x256xf32>
    %c0_6 = arith.constant 0 : index
    %c0_7 = arith.constant 0 : index
    %7 = vector.load %arg10[%c0_6, %c0_7] : memref<16x512xf32, #tpu.memory_space<vmem>>, vector<16x512xf32>
    %c0_8 = arith.constant 0 : index
    %c0_9 = arith.constant 0 : index
    %8 = vector.load %arg4[%c0_8, %c0_9] : memref<256x512xf32, #tpu.memory_space<vmem>>, vector<256x512xf32>
    %cst = arith.constant dense<0.000000e+00> : vector<16x512xf32>
    %9 = tpu.matmul %6, %8, %cst {dimension_numbers = #tpu.dot_dimension_numbers<[1], [0], [0], [1], [0, 0, 1, 1], [], []>} : vector<16x256xf32>, vector<256x512xf32>, vector<16x512xf32> -> vector<16x512xf32>
    %10 = arith.addf %7, %9 : vector<16x512xf32>
    %11 = vector.extract_strided_slice %10 {offsets = [0, 0], sizes = [16, 128], strides = [1, 1]} : vector<16x512xf32> to vector<16x128xf32>
    %12 = arith.negf %11 : vector<16x128xf32>
    %13 = math.exp %12 : vector<16x128xf32>
    %cst_10 = arith.constant 1.000000e+00 : f32
    %14 = vector.broadcast %cst_10 : f32 to vector<16x128xf32>
    %15 = arith.addf %14, %13 : vector<16x128xf32>
    %16 = arith.divf %14, %15 : vector<16x128xf32>
    %17 = vector.extract_strided_slice %10 {offsets = [0, 128], sizes = [16, 128], strides = [1, 1]} : vector<16x512xf32> to vector<16x128xf32>
    %18 = arith.negf %17 : vector<16x128xf32>
    %19 = math.exp %18 : vector<16x128xf32>
    %cst_11 = arith.constant 1.000000e+00 : f32
    %20 = vector.broadcast %cst_11 : f32 to vector<16x128xf32>
    %21 = arith.addf %20, %19 : vector<16x128xf32>
    %22 = arith.divf %20, %21 : vector<16x128xf32>
    %23 = vector.extract_strided_slice %10 {offsets = [0, 256], sizes = [16, 128], strides = [1, 1]} : vector<16x512xf32> to vector<16x128xf32>
    %24 = math.tanh %23 : vector<16x128xf32>
    %25 = vector.extract_strided_slice %10 {offsets = [0, 384], sizes = [16, 128], strides = [1, 1]} : vector<16x512xf32> to vector<16x128xf32>
    %26 = arith.negf %25 : vector<16x128xf32>
    %27 = math.exp %26 : vector<16x128xf32>
    %cst_12 = arith.constant 1.000000e+00 : f32
    %28 = vector.broadcast %cst_12 : f32 to vector<16x128xf32>
    %29 = arith.addf %28, %27 : vector<16x128xf32>
    %30 = arith.divf %28, %29 : vector<16x128xf32>
    %31 = arith.mulf %22, %4 : vector<16x128xf32>
    %32 = arith.mulf %16, %24 : vector<16x128xf32>
    %33 = arith.addf %31, %32 : vector<16x128xf32>
    %34 = math.tanh %33 : vector<16x128xf32>
    %35 = arith.mulf %30, %34 : vector<16x128xf32>
    %c0_13 = arith.constant 0 : index
    %c0_14 = arith.constant 0 : index
    %36 = vector.load %arg11[%c0_13, %c0_14] : memref<16x128xf32, #tpu.memory_space<vmem>>, vector<16x128xf32>
    tpu.vector_store %arg11[%c0_13, %c0_14], %35 {strides = array<i32>} : memref<16x128xf32, #tpu.memory_space<vmem>>, vector<16x128xf32>,
    %c0_15 = arith.constant 0 : index
    %c0_16 = arith.constant 0 : index
    %37 = vector.load %arg12[%c0_15, %c0_16] : memref<16x128xf32, #tpu.memory_space<vmem>>, vector<16x128xf32>
    tpu.vector_store %arg12[%c0_15, %c0_16], %33 {strides = array<i32>} : memref<16x128xf32, #tpu.memory_space<vmem>>, vector<16x128xf32>,
    %c0_17 = arith.constant 0 : index
    %c0_18 = arith.constant 0 : index
    %38 = vector.load %arg6[%c0_17, %c0_18] : memref<128x128xf32, #tpu.memory_space<vmem>>, vector<128x128xf32>
    %cst_19 = arith.constant dense<0.000000e+00> : vector<16x128xf32>
    %39 = tpu.matmul %35, %38, %cst_19 {dimension_numbers = #tpu.dot_dimension_numbers<[1], [0], [0], [1], [0, 0, 1, 1], [], []>} : vector<16x128xf32>, vector<128x128xf32>, vector<16x128xf32> -> vector<16x128xf32>
    %c0_20 = arith.constant 0 : index
    %c0_21 = arith.constant 0 : index
    %40 = vector.load %arg7[%c0_20, %c0_21] : memref<1x128xf32, #tpu.memory_space<vmem>>, vector<1x128xf32>
    %41 = vector.broadcast %40 : vector<1x128xf32> to vector<16x128xf32>
    %42 = arith.addf %39, %41 : vector<16x128xf32>
    %cst_22 = arith.constant dense<0xFF800000> : vector<16xf32>
    %43 = vector.multi_reduction <maximumf>, %42, %cst_22 [1] : vector<16x128xf32> to vector<16xf32>
    %44 = vector.shape_cast %43 : vector<16xf32> to vector<16x1xf32>
    %45 = vector.broadcast %44 : vector<16x1xf32> to vector<16x128xf32>
    %46 = arith.subf %42, %45 : vector<16x128xf32>
    %47 = math.exp %46 : vector<16x128xf32>
    %cst_23 = arith.constant dense<0.000000e+00> : vector<16xf32>
    %48 = vector.multi_reduction <add>, %47, %cst_23 [1] : vector<16x128xf32> to vector<16xf32>
    %49 = vector.shape_cast %48 : vector<16xf32> to vector<16x1xf32>
    %50 = math.log %49 : vector<16x1xf32>
    %51 = vector.broadcast %50 : vector<16x1xf32> to vector<16x128xf32>
    %52 = arith.subf %46, %51 : vector<16x128xf32>
    %c0_24 = arith.constant 0 : index
    %c0_25 = arith.constant 0 : index
    %53 = vector.load %arg9[%c0_24, %c0_25] : memref<16x128xf32, #tpu.memory_space<vmem>>, vector<16x128xf32>
    tpu.vector_store %arg9[%c0_24, %c0_25], %52 {strides = array<i32>} : memref<16x128xf32, #tpu.memory_space<vmem>>, vector<16x128xf32>,
    %c1_i32 = arith.constant 1 : i32
    %54 = arith.addi %arg1, %c1_i32 : i32
    %c4_i32 = arith.constant 4 : i32
    %55 = arith.cmpi slt, %54, %c4_i32 : i32
    %56 = arith.extui %55 : i1 to i32
    %c0_i32_26 = arith.constant 0 : i32
    %57 = arith.cmpi ne, %56, %c0_i32_26 : i32
    scf.if %57 {
      %58 = tpu.reciprocal %49 {approx = true} : vector<16x1xf32> -> vector<16x1xf32>
      %59 = vector.broadcast %58 : vector<16x1xf32> to vector<16x128xf32>
      %60 = arith.mulf %47, %59 : vector<16x128xf32>
      %c0_27 = arith.constant 0 : index
      %c0_28 = arith.constant 0 : index
      %61 = vector.load %arg8[%c0_27, %c0_28] : memref<128x128xf32, #tpu.memory_space<vmem>>, vector<128x128xf32>
      %cst_29 = arith.constant dense<0.000000e+00> : vector<16x128xf32>
      %62 = tpu.matmul %60, %61, %cst_29 {dimension_numbers = #tpu.dot_dimension_numbers<[1], [0], [0], [1], [0, 0, 1, 1], [], []>} : vector<16x128xf32>, vector<128x128xf32>, vector<16x128xf32> -> vector<16x128xf32>
      %c0_30 = arith.constant 0 : index
      %c0_31 = arith.constant 0 : index
      %63 = vector.load %arg13[%c0_30, %c0_31] : memref<16x128xf32, #tpu.memory_space<vmem>>, vector<16x128xf32>
      tpu.vector_store %arg13[%c0_30, %c0_31], %62 {strides = array<i32>} : memref<16x128xf32, #tpu.memory_space<vmem>>, vector<16x128xf32>,
    } else {
    }
    return
  }
  func.func @transform_0(%arg0: i32, %arg1: i32) -> (i32, i32) {
    %c0_i32 = arith.constant 0 : i32
    %c0_i32_0 = arith.constant 0 : i32
    return %arg0, %c0_i32 : i32, i32
  }
  func.func @transform_1(%arg0: i32, %arg1: i32) -> (i32, i32) {
    %c0_i32 = arith.constant 0 : i32
    %c0_i32_0 = arith.constant 0 : i32
    %c0_i32_1 = arith.constant 0 : i32
    return %c0_i32, %c0_i32_0 : i32, i32
  }
  func.func @transform_2(%arg0: i32, %arg1: i32) -> (i32, i32) {
    %c0_i32 = arith.constant 0 : i32
    %c0_i32_0 = arith.constant 0 : i32
    %c0_i32_1 = arith.constant 0 : i32
    return %c0_i32, %c0_i32_0 : i32, i32
  }
  func.func @transform_3(%arg0: i32, %arg1: i32) -> (i32, i32) {
    %c0_i32 = arith.constant 0 : i32
    %c0_i32_0 = arith.constant 0 : i32
    %c0_i32_1 = arith.constant 0 : i32
    return %c0_i32, %c0_i32_0 : i32, i32
  }
  func.func @transform_4(%arg0: i32, %arg1: i32) -> (i32, i32) {
    %c0_i32 = arith.constant 0 : i32
    %c0_i32_0 = arith.constant 0 : i32
    %c0_i32_1 = arith.constant 0 : i32
    return %c0_i32, %c0_i32_0 : i32, i32
  }
  func.func @transform_5(%arg0: i32, %arg1: i32) -> (i32, i32) {
    %c0_i32 = arith.constant 0 : i32
    %c0_i32_0 = arith.constant 0 : i32
    %c0_i32_1 = arith.constant 0 : i32
    return %c0_i32, %c0_i32_0 : i32, i32
  }
  func.func @transform_6(%arg0: i32, %arg1: i32) -> (i32, i32) {
    %c0_i32 = arith.constant 0 : i32
    %c0_i32_0 = arith.constant 0 : i32
    %c0_i32_1 = arith.constant 0 : i32
    return %c0_i32, %c0_i32_0 : i32, i32
  }
  func.func @transform_7(%arg0: i32, %arg1: i32) -> (i32, i32) {
    %c0_i32 = arith.constant 0 : i32
    return %arg0, %arg1 : i32, i32
  }
}

module attributes {stable_mosaic.version = 11 : i64} {
  func.func @_lstm_translation_kernel(%arg0: i32, %arg1: i32, %arg2: memref<16x128xf32, #tpu.memory_space<vmem>>, %arg3: memref<128x512xf32, #tpu.memory_space<vmem>>, %arg4: memref<256x512xf32, #tpu.memory_space<vmem>>, %arg5: memref<1x512xf32, #tpu.memory_space<vmem>>, %arg6: memref<128x128xf32, #tpu.memory_space<vmem>>, %arg7: memref<1x128xf32, #tpu.memory_space<vmem>>, %arg8: memref<128x128xf32, #tpu.memory_space<vmem>>, %arg9: memref<16x128xf32, #tpu.memory_space<vmem>>, %arg10: memref<16x512xf32, #tpu.memory_space<vmem>>, %arg11: memref<16x128xf32, #tpu.memory_space<vmem>>, %arg12: memref<16x128xf32, #tpu.memory_space<vmem>>, %arg13: memref<16x128xf32, #tpu.memory_space<vmem>>) attributes {dimension_semantics = [#tpu.dimension_semantics<parallel>, #tpu.dimension_semantics<arbitrary>], iteration_bounds = array<i64: 1, 4>, scalar_prefetch = 0 : i64, scratch_operands = 4 : i64, tpu.core_type = #tpu.core_type<tc>, window_params = [{transform_indices = @transform_0, window_bounds = array<i64: 16, 128>}, {pipeline_mode = #tpu.pipeline_mode<synchronous>, transform_indices = @transform_1, window_bounds = array<i64: 128, 512>}, {pipeline_mode = #tpu.pipeline_mode<synchronous>, transform_indices = @transform_2, window_bounds = array<i64: 256, 512>}, {pipeline_mode = #tpu.pipeline_mode<synchronous>, transform_indices = @transform_3, window_bounds = array<i64: 1, 512>}, {pipeline_mode = #tpu.pipeline_mode<synchronous>, transform_indices = @transform_4, window_bounds = array<i64: 128, 128>}, {pipeline_mode = #tpu.pipeline_mode<synchronous>, transform_indices = @transform_5, window_bounds = array<i64: 1, 128>}, {pipeline_mode = #tpu.pipeline_mode<synchronous>, transform_indices = @transform_6, window_bounds = array<i64: 128, 128>}, {transform_indices = @transform_7, window_bounds = array<i64: 16, 128>}]} {
    %c0_i32 = arith.constant 0 : i32
    %0 = arith.cmpi eq, %arg1, %c0_i32 : i32
    %1 = arith.extui %0 : i1 to i32
    %c0_i32_0 = arith.constant 0 : i32
    %2 = arith.cmpi ne, %1, %c0_i32_0 : i32
    scf.if %2 {
      %c0_27 = arith.constant 0 : index
      %c0_28 = arith.constant 0 : index
      %58 = vector.load %arg2[%c0_27, %c0_28] : memref<16x128xf32, #tpu.memory_space<vmem>>, vector<16x128xf32>
      %c0_29 = arith.constant 0 : index
      %c0_30 = arith.constant 0 : index
      %59 = vector.load %arg3[%c0_29, %c0_30] : memref<128x512xf32, #tpu.memory_space<vmem>>, vector<128x512xf32>
      %cst_31 = arith.constant dense<0.000000e+00> : vector<16x512xf32>
      %60 = tpu.matmul %58, %59, %cst_31 {dimension_numbers = #tpu.dot_dimension_numbers<[1], [0], [0], [1], [0, 0, 1, 1], [], []>} : vector<16x128xf32>, vector<128x512xf32>, vector<16x512xf32> -> vector<16x512xf32>
      %c0_32 = arith.constant 0 : index
      %c0_33 = arith.constant 0 : index
      %61 = vector.load %arg5[%c0_32, %c0_33] : memref<1x512xf32, #tpu.memory_space<vmem>>, vector<1x512xf32>
      %62 = vector.broadcast %61 : vector<1x512xf32> to vector<16x512xf32>
      %63 = arith.addf %60, %62 : vector<16x512xf32>
      %c0_34 = arith.constant 0 : index
      %c0_35 = arith.constant 0 : index
      %64 = vector.load %arg10[%c0_34, %c0_35] : memref<16x512xf32, #tpu.memory_space<vmem>>, vector<16x512xf32>
      tpu.vector_store %arg10[%c0_34, %c0_35], %63 {strides = array<i32>} : memref<16x512xf32, #tpu.memory_space<vmem>>, vector<16x512xf32>,
      %cst_36 = arith.constant 0.000000e+00 : f32
      %65 = vector.broadcast %cst_36 : f32 to vector<16x128xf32>
      %c0_37 = arith.constant 0 : index
      %c0_38 = arith.constant 0 : index
      %66 = vector.load %arg11[%c0_37, %c0_38] : memref<16x128xf32, #tpu.memory_space<vmem>>, vector<16x128xf32>
      tpu.vector_store %arg11[%c0_37, %c0_38], %65 {strides = array<i32>} : memref<16x128xf32, #tpu.memory_space<vmem>>, vector<16x128xf32>,
      %cst_39 = arith.constant 0.000000e+00 : f32
      %67 = vector.broadcast %cst_39 : f32 to vector<16x128xf32>
      %c0_40 = arith.constant 0 : index
      %c0_41 = arith.constant 0 : index
      %68 = vector.load %arg12[%c0_40, %c0_41] : memref<16x128xf32, #tpu.memory_space<vmem>>, vector<16x128xf32>
      tpu.vector_store %arg12[%c0_40, %c0_41], %67 {strides = array<i32>} : memref<16x128xf32, #tpu.memory_space<vmem>>, vector<16x128xf32>,
      %c1 = arith.constant 1 : index
      %c0_42 = arith.constant 0 : index
      %69 = vector.load %arg8[%c1, %c0_42] : memref<128x128xf32, #tpu.memory_space<vmem>>, vector<1x128xf32>
      %70 = vector.shape_cast %69 : vector<1x128xf32> to vector<1x128xf32>
      %71 = vector.broadcast %70 : vector<1x128xf32> to vector<16x128xf32>
      %c0_43 = arith.constant 0 : index
      %c0_44 = arith.constant 0 : index
      %72 = vector.load %arg13[%c0_43, %c0_44] : memref<16x128xf32, #tpu.memory_space<vmem>>, vector<16x128xf32>
      tpu.vector_store %arg13[%c0_43, %c0_44], %71 {strides = array<i32>} : memref<16x128xf32, #tpu.memory_space<vmem>>, vector<16x128xf32>,
    } else {
    }
    %c0 = arith.constant 0 : index
    %c0_1 = arith.constant 0 : index
    %3 = vector.load %arg11[%c0, %c0_1] : memref<16x128xf32, #tpu.memory_space<vmem>>, vector<16x128xf32>
    %c0_2 = arith.constant 0 : index
    %c0_3 = arith.constant 0 : index
    %4 = vector.load %arg12[%c0_2, %c0_3] : memref<16x128xf32, #tpu.memory_space<vmem>>, vector<16x128xf32>
    %c0_4 = arith.constant 0 : index
    %c0_5 = arith.constant 0 : index
    %5 = vector.load %arg13[%c0_4, %c0_5] : memref<16x128xf32, #tpu.memory_space<vmem>>, vector<16x128xf32>
    %6 = tpu.concatenate %5, %3 in 1 : vector<16x128xf32>, vector<16x128xf32> -> vector<16x256xf32>
    %c0_6 = arith.constant 0 : index
    %c0_7 = arith.constant 0 : index
    %7 = vector.load %arg10[%c0_6, %c0_7] : memref<16x512xf32, #tpu.memory_space<vmem>>, vector<16x512xf32>
    %c0_8 = arith.constant 0 : index
    %c0_9 = arith.constant 0 : index
    %8 = vector.load %arg4[%c0_8, %c0_9] : memref<256x512xf32, #tpu.memory_space<vmem>>, vector<256x512xf32>
    %cst = arith.constant dense<0.000000e+00> : vector<16x512xf32>
    %9 = tpu.matmul %6, %8, %cst {dimension_numbers = #tpu.dot_dimension_numbers<[1], [0], [0], [1], [0, 0, 1, 1], [], []>} : vector<16x256xf32>, vector<256x512xf32>, vector<16x512xf32> -> vector<16x512xf32>
    %10 = arith.addf %7, %9 : vector<16x512xf32>
    %11 = vector.extract_strided_slice %10 {offsets = [0, 0], sizes = [16, 128], strides = [1, 1]} : vector<16x512xf32> to vector<16x128xf32>
    %12 = arith.negf %11 : vector<16x128xf32>
    %13 = math.exp %12 : vector<16x128xf32>
    %cst_10 = arith.constant 1.000000e+00 : f32
    %14 = vector.broadcast %cst_10 : f32 to vector<16x128xf32>
    %15 = arith.addf %14, %13 : vector<16x128xf32>
    %16 = arith.divf %14, %15 : vector<16x128xf32>
    %17 = vector.extract_strided_slice %10 {offsets = [0, 128], sizes = [16, 128], strides = [1, 1]} : vector<16x512xf32> to vector<16x128xf32>
    %18 = arith.negf %17 : vector<16x128xf32>
    %19 = math.exp %18 : vector<16x128xf32>
    %cst_11 = arith.constant 1.000000e+00 : f32
    %20 = vector.broadcast %cst_11 : f32 to vector<16x128xf32>
    %21 = arith.addf %20, %19 : vector<16x128xf32>
    %22 = arith.divf %20, %21 : vector<16x128xf32>
    %23 = vector.extract_strided_slice %10 {offsets = [0, 256], sizes = [16, 128], strides = [1, 1]} : vector<16x512xf32> to vector<16x128xf32>
    %24 = math.tanh %23 : vector<16x128xf32>
    %25 = vector.extract_strided_slice %10 {offsets = [0, 384], sizes = [16, 128], strides = [1, 1]} : vector<16x512xf32> to vector<16x128xf32>
    %26 = arith.negf %25 : vector<16x128xf32>
    %27 = math.exp %26 : vector<16x128xf32>
    %cst_12 = arith.constant 1.000000e+00 : f32
    %28 = vector.broadcast %cst_12 : f32 to vector<16x128xf32>
    %29 = arith.addf %28, %27 : vector<16x128xf32>
    %30 = arith.divf %28, %29 : vector<16x128xf32>
    %31 = arith.mulf %22, %4 : vector<16x128xf32>
    %32 = arith.mulf %16, %24 : vector<16x128xf32>
    %33 = arith.addf %31, %32 : vector<16x128xf32>
    %34 = math.tanh %33 : vector<16x128xf32>
    %35 = arith.mulf %30, %34 : vector<16x128xf32>
    %c0_13 = arith.constant 0 : index
    %c0_14 = arith.constant 0 : index
    %36 = vector.load %arg11[%c0_13, %c0_14] : memref<16x128xf32, #tpu.memory_space<vmem>>, vector<16x128xf32>
    tpu.vector_store %arg11[%c0_13, %c0_14], %35 {strides = array<i32>} : memref<16x128xf32, #tpu.memory_space<vmem>>, vector<16x128xf32>,
    %c0_15 = arith.constant 0 : index
    %c0_16 = arith.constant 0 : index
    %37 = vector.load %arg12[%c0_15, %c0_16] : memref<16x128xf32, #tpu.memory_space<vmem>>, vector<16x128xf32>
    tpu.vector_store %arg12[%c0_15, %c0_16], %33 {strides = array<i32>} : memref<16x128xf32, #tpu.memory_space<vmem>>, vector<16x128xf32>,
    %c0_17 = arith.constant 0 : index
    %c0_18 = arith.constant 0 : index
    %38 = vector.load %arg6[%c0_17, %c0_18] : memref<128x128xf32, #tpu.memory_space<vmem>>, vector<128x128xf32>
    %cst_19 = arith.constant dense<0.000000e+00> : vector<16x128xf32>
    %39 = tpu.matmul %35, %38, %cst_19 {dimension_numbers = #tpu.dot_dimension_numbers<[1], [0], [0], [1], [0, 0, 1, 1], [], []>} : vector<16x128xf32>, vector<128x128xf32>, vector<16x128xf32> -> vector<16x128xf32>
    %c0_20 = arith.constant 0 : index
    %c0_21 = arith.constant 0 : index
    %40 = vector.load %arg7[%c0_20, %c0_21] : memref<1x128xf32, #tpu.memory_space<vmem>>, vector<1x128xf32>
    %41 = vector.broadcast %40 : vector<1x128xf32> to vector<16x128xf32>
    %42 = arith.addf %39, %41 : vector<16x128xf32>
    %cst_22 = arith.constant dense<0xFF800000> : vector<16xf32>
    %43 = vector.multi_reduction <maximumf>, %42, %cst_22 [1] : vector<16x128xf32> to vector<16xf32>
    %44 = vector.shape_cast %43 : vector<16xf32> to vector<16x1xf32>
    %45 = vector.broadcast %44 : vector<16x1xf32> to vector<16x128xf32>
    %46 = arith.subf %42, %45 : vector<16x128xf32>
    %47 = math.exp %46 : vector<16x128xf32>
    %cst_23 = arith.constant dense<0.000000e+00> : vector<16xf32>
    %48 = vector.multi_reduction <add>, %47, %cst_23 [1] : vector<16x128xf32> to vector<16xf32>
    %49 = vector.shape_cast %48 : vector<16xf32> to vector<16x1xf32>
    %50 = math.log %49 : vector<16x1xf32>
    %51 = vector.broadcast %50 : vector<16x1xf32> to vector<16x128xf32>
    %52 = arith.subf %46, %51 : vector<16x128xf32>
    %c0_24 = arith.constant 0 : index
    %c0_25 = arith.constant 0 : index
    %53 = vector.load %arg9[%c0_24, %c0_25] : memref<16x128xf32, #tpu.memory_space<vmem>>, vector<16x128xf32>
    tpu.vector_store %arg9[%c0_24, %c0_25], %52 {strides = array<i32>} : memref<16x128xf32, #tpu.memory_space<vmem>>, vector<16x128xf32>,
    %c1_i32 = arith.constant 1 : i32
    %54 = arith.addi %arg1, %c1_i32 : i32
    %c4_i32 = arith.constant 4 : i32
    %55 = arith.cmpi slt, %54, %c4_i32 : i32
    %56 = arith.extui %55 : i1 to i32
    %c0_i32_26 = arith.constant 0 : i32
    %57 = arith.cmpi ne, %56, %c0_i32_26 : i32
    scf.if %57 {
      %58 = tpu.reciprocal %49 {approx = true} : vector<16x1xf32> -> vector<16x1xf32>
      %59 = vector.broadcast %58 : vector<16x1xf32> to vector<16x128xf32>
      %60 = arith.mulf %47, %59 : vector<16x128xf32>
      %c0_27 = arith.constant 0 : index
      %c0_28 = arith.constant 0 : index
      %61 = vector.load %arg8[%c0_27, %c0_28] : memref<128x128xf32, #tpu.memory_space<vmem>>, vector<128x128xf32>
      %cst_29 = arith.constant dense<0.000000e+00> : vector<16x128xf32>
      %62 = tpu.matmul %60, %61, %cst_29 {dimension_numbers = #tpu.dot_dimension_numbers<[1], [0], [0], [1], [0, 0, 1, 1], [], []>} : vector<16x128xf32>, vector<128x128xf32>, vector<16x128xf32> -> vector<16x128xf32>
      %c0_30 = arith.constant 0 : index
      %c0_31 = arith.constant 0 : index
      %63 = vector.load %arg13[%c0_30, %c0_31] : memref<16x128xf32, #tpu.memory_space<vmem>>, vector<16x128xf32>
      tpu.vector_store %arg13[%c0_30, %c0_31], %62 {strides = array<i32>} : memref<16x128xf32, #tpu.memory_space<vmem>>, vector<16x128xf32>,
    } else {
    }
    return
  }
  func.func @transform_0(%arg0: i32, %arg1: i32) -> (i32, i32) {
    %c0_i32 = arith.constant 0 : i32
    %c0_i32_0 = arith.constant 0 : i32
    return %arg0, %c0_i32 : i32, i32
  }
  func.func @transform_1(%arg0: i32, %arg1: i32) -> (i32, i32) {
    %c0_i32 = arith.constant 0 : i32
    %c0_i32_0 = arith.constant 0 : i32
    %c0_i32_1 = arith.constant 0 : i32
    return %c0_i32, %c0_i32_0 : i32, i32
  }
  func.func @transform_2(%arg0: i32, %arg1: i32) -> (i32, i32) {
    %c0_i32 = arith.constant 0 : i32
    %c0_i32_0 = arith.constant 0 : i32
    %c0_i32_1 = arith.constant 0 : i32
    return %c0_i32, %c0_i32_0 : i32, i32
  }
  func.func @transform_3(%arg0: i32, %arg1: i32) -> (i32, i32) {
    %c0_i32 = arith.constant 0 : i32
    %c0_i32_0 = arith.constant 0 : i32
    %c0_i32_1 = arith.constant 0 : i32
    return %c0_i32, %c0_i32_0 : i32, i32
  }
  func.func @transform_4(%arg0: i32, %arg1: i32) -> (i32, i32) {
    %c0_i32 = arith.constant 0 : i32
    %c0_i32_0 = arith.constant 0 : i32
    %c0_i32_1 = arith.constant 0 : i32
    return %c0_i32, %c0_i32_0 : i32, i32
  }
  func.func @transform_5(%arg0: i32, %arg1: i32) -> (i32, i32) {
    %c0_i32 = arith.constant 0 : i32
    %c0_i32_0 = arith.constant 0 : i32
    %c0_i32_1 = arith.constant 0 : i32
    return %c0_i32, %c0_i32_0 : i32, i32
  }
  func.func @transform_6(%arg0: i32, %arg1: i32) -> (i32, i32) {
    %c0_i32 = arith.constant 0 : i32
    %c0_i32_0 = arith.constant 0 : i32
    %c0_i32_1 = arith.constant 0 : i32
    return %c0_i32, %c0_i32_0 : i32, i32
  }
  func.func @transform_7(%arg0: i32, %arg1: i32) -> (i32, i32) {
    %c0_i32 = arith.constant 0 : i32
    return %arg0, %arg1 : i32, i32
  }
}

</mosaic_0001>

<bundles_post_ra>
// kernel: tpu_custom_call.1
= control target key start
LH: loop header
LB: loop body
LE: loop exit
PB: predicated region body
PF: predicated region fallthrough
CT: control target
= control target key end

     0   :  { %s2436_s0 = inlined_call_operand.hbm [shape: f32[16,128], index: 0, kind: input, shape index: {}]   ;;  %s2437_s1 = inlined_call_operand.hbm [shape: f32[128,512], index: 1, kind: input, shape index: {}]   ;;  %s2438_s2 = inlined_call_operand.hbm [shape: f32[256,512], index: 2, kind: input, shape index: {}]   ;;  %s2439_s3 = inlined_call_operand.vmem [shape: f32[1,512], index: 3, kind: input, shape index: {}]   ;;  %s2440_s4 = inlined_call_operand.hbm [shape: f32[128,128], index: 4, kind: input, shape index: {}]   ;;  %s2441_s5 = inlined_call_operand.vmem [shape: f32[1,128], index: 5, kind: input, shape index: {}]   ;;  %s2442_s6 = inlined_call_operand.hbm [shape: f32[128,128], index: 6, kind: input, shape index: {}]   ;;  %s2443_s7 = inlined_call_operand.hbm [shape: f32[16,512], index: 7, kind: output, shape index: {}]  }
   0x1   :  { %2455 = sst [smem:[#allocation26_spill]] %s2437_s1 }
   0x2   :  { %12 = vsyncpa [#allocation7], 0 }
   0x3   :  { %13 = vsyncpa [#allocation10], 0 }
   0x4   :  { %14 = vsyncpa [#allocation13], 0 }
   0x5   :  { %15 = vsyncpa [#allocation8], 0 }
   0x6   :  { %17 = vsyncpa [#allocation8 + $0x1], 0  ;;  %s2160_s24 = smov 0   ;;  %s2162_s25 = smov 0  }
   0x7   :  { %s2164_s26 = smov 0   ;;  %s2166_s27 = smov 0  }
   0x8   :  { %s2168_s28 = smov 0   ;;  %s2170_s29 = smov 0  }
   0x9 LB: > { %2456 = sst [smem:[#allocation20_spill]] %s2084_s24  ;;  %s1325_s30 = sadd.s32 4294967295, %s2104_s29   ;;  %s2104_s29 = sphi %s2170_s29, %s23_s29   ;;  %s2100_s28 = sphi %s2168_s28, %s2480_s28   ;;  %s2096_s27 = sphi %s2166_s27, %s2479_s27   ;;  %s2092_s26 = sphi %s2164_s26, %s2478_s26   ;;  %s2088_s25 = sphi %s2162_s25, %s2482_s25   ;;  %s2084_s24 = sphi %s2160_s24, %s2481_s24  }
   0xa   : > { %2457 = sst [smem:[#allocation21_spill]] %s2092_s26  ;;  %s1326_s8 = sadd.s32 4294967294, %s2104_s29  }
   0xb   : > { %2458 = sst [smem:[#allocation22_spill]] %s2100_s28  ;;  %s32_s9 = sadd.s32 1, %s2100_s28 }
   0xc   : > { %s196_s10 = sadd.s32 1, %s2092_s26  ;;  %p33_p0 = scmp.ge.s32.totalorder %s32_s9, 4 }
   0xd   : > { %p206_p1 = scmp.ne.s32.totalorder %s2092_s26, %s2088_s25  ;;  %p207_p2 = scmp.eq.s32.totalorder %s1325_s30, 3 }
   0xe   : > { %p212_p3 = scmp.ne.s32.totalorder %s2088_s25, %s2084_s24  ;;  %s2484_s9 = smov (%p33_p0, %s32_s9), 0 }
   0xf   : > { %2459 = sst [smem:[#allocation23_spill]] %s2484_s9  ;;  %p2200_p4 = por %p207_p2, %p206_p1 }
  0x10   : > { %p213_p5 = scmp.eq.s32.totalorder %s1326_s8, 3  ;;  %s192_s12 = ssub.s32 %s2100_s28, %s2484_s9 }
  0x11   : > { %s2460_s11 = scalar_select %p2200_p4, 1, 0 }
  0x12   : > { %p1327_p6 = scmp.ge.s32.totalorder %s2104_s29, 1  ;;  %p194_p7 = scmp.eq.s32.totalorder %s192_s12, 0 }
  0x13   : > { %p2207_p8 = por %p213_p5, %p212_p3  ;;  %p220_p9 = scmp.lt.s32.totalorder %s2104_s29, 5 }
  0x14   : > { %s2213_s14 = scalar_select %p194_p7, %s2092_s26, %s196_s10  }
  0x15   : > { %s2461_s13 = scalar_select %p2207_p8, 1, 0 }
  0x16   : > { %2463 = sst [smem:[#allocation25_spill]] %s2213_s14  ;;  %p2215_p10 = pnand %p1327_p6, %p220_p9 }
  0x17   : > { %2462 = sst [smem:[#allocation24_spill]] %s2461_s13  ;;  %p2219_p11 = scmp.eq.s32.totalorder %s1325_s30, 0 }
  0x18   : > { %s2464_s15 = scalar_select %p2215_p10, 1, 0 }
  0x19   : > { %s2465_s16 = scalar_select %p2219_p11, 1, 0 }
  0x1a   : > { %p1738_p12 = pneg %p2215_p10  ;;  %s2106_s17 = smov [#allocation9]  }
  0x1b   : > { %s248_s18 = sshll.u32 %s2106_s17, 4  ;;  %s2107_s20 = smov [#allocation12]   ;;  %s249_s18 = int_to_ptr.vmem [resolvable:$true] %s248_s18 }
  0x1c   : > { %p2227_p13 = pnand %p2219_p11, %p1738_p12  ;;  %s277_s21 = sshll.u32 %s2107_s20, 4  ;;  %s278_s21 = int_to_ptr.vmem [resolvable:$true] %s277_s21 }
  0x1d   : > { %s2467_s1 = sld [smem:[#allocation26_spill]] }
  0x1e   : > { %p2239_p1 = pneg %p2227_p13 }
  0x23   : > { %s1874_s30 = scalar_lea.hbm %s2467_s1, 8192 }
  0x24   : > { %p1875_p0 = scmp.ne.s32.totalorder %s2467_s1, %s1874_s30  ;;  %p1881_p5 = scmp.lt.u32.totalorder %s1874_s30, %s2467_s1 }
  0x26   : > { %p1877_p2 = pnand %p2239_p1, %p1875_p0 }
  0x28   : > { %p1878_p3 = pneg %p1877_p2 }
  0x2a   : > { %p1883_p6 = pnand %p1881_p5, %p1878_p3 }
  0x2c   : > { %1886 = shalt.err (!%p1883_p6)
}
  0x2d   : > { %s1887_s20 = scalar_lea.vmem %s249_s18, 8192  ;;  %p1895_p8 = scmp.lt.s32.totalorder %s249_s18, %s249_s18 }
  0x2e   : > { %p1888_p7 = scmp.ne.s32.totalorder %s249_s18, %s1887_s20  ;;  %p1896_p4 = scmp.lt.s32.totalorder %s1887_s20, %s1887_s20 }
  0x30   : > { %p1890_p9 = pnand %p1888_p7, %p2239_p1  ;;  %p1897_p11 = por %p1896_p4, %p1895_p8 }
  0x32   : > { %p1891_p12 = pneg %p1890_p9 }
  0x34   : > { %p1898_p10 = pnand %p1897_p11, %p1891_p12 }
  0x36   : > { %1901 = shalt.err (!%p1898_p10)
}
  0x37   : > { %s2451_s22 = smov 512   ;;  %s2452_s23 = smov 32  }
  0x38   : > { %1744 = dma.hbm_to_vmem [thread:$0]  (!%p2227_p13), %s2467_s1, 8192, %s249_s18, [#allocation10], %s2451_s22, %s2451_s22, %s2452_s23  }
  0x39   : > { %s1902_s17 = scalar_lea.hbm %s2440_s4, 2048 }
  0x3a   : > { %p1903_p4 = scmp.ne.s32.totalorder %s2440_s4, %s1902_s17  ;;  %p1909_p11 = scmp.lt.u32.totalorder %s1902_s17, %s2440_s4 }
  0x3c   : > { %p1905_p8 = pnand %p1903_p4, %p2239_p1 }
  0x3e   : > { %p1906_p10 = pneg %p1905_p8 }
  0x40   : > { %p1911_p0 = pnand %p1909_p11, %p1906_p10 }
  0x42   : > { %1914 = shalt.err (!%p1911_p0)
}
  0x43   : > { %s1915_s9 = scalar_lea.vmem %s278_s21, 2048  ;;  %p1923_p6 = scmp.lt.s32.totalorder %s278_s21, %s278_s21 }
  0x44   : > { %p1916_p2 = scmp.ne.s32.totalorder %s278_s21, %s1915_s9  ;;  %p1924_p7 = scmp.lt.s32.totalorder %s1915_s9, %s1915_s9 }
  0x46   : > { %p1918_p3 = pnand %p1916_p2, %p2239_p1  ;;  %p1925_p9 = por %p1924_p7, %p1923_p6 }
  0x48   : > { %p1919_p5 = pneg %p1918_p3 }
  0x4a   : > { %p1926_p12 = pnand %p1925_p9, %p1919_p5 }
  0x4c   : > { %1929 = shalt.err (!%p1926_p12)
}
  0x4d   : > { %s2110_s28 = smov 128   ;;  %s2111_s18 = smov 8  }
  0x4e   : > { %1750 = dma.hbm_to_vmem [thread:$0]  (!%p2227_p13), %s2440_s4, 2048, %s278_s21, [#allocation13], %s2110_s28, %s2110_s28, %s2111_s18  }
  0x4f   : > { %s2112_s30 = smov [#allocation6]   ;;  %s2113_s10 = smov [#allocation11]  }
  0x50   : > { %s235_s8 = sshll.u32 %s2112_s30, 4  ;;  %s261_s17 = sshll.u32 %s2113_s10, 4  ;;  %s236_s8 = int_to_ptr.vmem [resolvable:$true] %s235_s8  ;;  %s262_s17 = int_to_ptr.vmem [resolvable:$true] %s261_s17 }
  0x51   : > { %s1930_s22 = scalar_lea.hbm %s2436_s0, 256 }
  0x52   : > { %p1931_p4 = scmp.ne.s32.totalorder %s2436_s0, %s1930_s22  ;;  %p1937_p11 = scmp.lt.u32.totalorder %s1930_s22, %s2436_s0 }
  0x54   : > { %p1933_p8 = pnand %p1931_p4, %p2239_p1 }
  0x56   : > { %p1934_p10 = pneg %p1933_p8 }
  0x58   : > { %p1939_p0 = pnand %p1937_p11, %p1934_p10 }
  0x5a   : > { %1942 = shalt.err (!%p1939_p0)
}
  0x5b   : > { %s1943_s21 = scalar_lea.vmem %s236_s8, 256  ;;  %p1951_p6 = scmp.lt.s32.totalorder %s236_s8, %s236_s8 }
  0x5c   : > { %p1944_p2 = scmp.ne.s32.totalorder %s236_s8, %s1943_s21  ;;  %p1952_p7 = scmp.lt.s32.totalorder %s1943_s21, %s1943_s21 }
  0x5e   : > { %p1946_p3 = pnand %p1944_p2, %p2239_p1  ;;  %p1953_p9 = por %p1952_p7, %p1951_p6 }
  0x60   : > { %p1947_p5 = pneg %p1946_p3 }
  0x62   : > { %p1954_p12 = pnand %p1953_p9, %p1947_p5 }
  0x64   : > { %1957 = shalt.err (!%p1954_p12)
}
  0x65   : > { %1741 = dma.hbm_to_vmem [thread:$0]  (!%p2227_p13), %s2436_s0, 256, %s236_s8, [#allocation7], %s2110_s28, %s2110_s28, %s2111_s18  }
  0x66   : > { %s1958_s23 = scalar_lea.hbm %s2438_s2, 16384 }
  0x67   : > { %p1959_p4 = scmp.ne.s32.totalorder %s2438_s2, %s1958_s23  ;;  %p1965_p11 = scmp.lt.u32.totalorder %s1958_s23, %s2438_s2 }
  0x69   : > { %p1961_p8 = pnand %p1959_p4, %p2239_p1 }
  0x6b   : > { %p1962_p10 = pneg %p1961_p8 }
  0x6d   : > { %p1967_p0 = pnand %p1965_p11, %p1962_p10 }
  0x6f   : > { %1970 = shalt.err (!%p1967_p0)
}
  0x70   : > { %s1971_s20 = scalar_lea.vmem %s262_s17, 16384  ;;  %p1979_p6 = scmp.lt.s32.totalorder %s262_s17, %s262_s17 }
  0x71   : > { %p1972_p2 = scmp.ne.s32.totalorder %s262_s17, %s1971_s20  ;;  %p1980_p7 = scmp.lt.s32.totalorder %s1971_s20, %s1971_s20 }
  0x73   : > { %p1974_p3 = pnand %p1972_p2, %p2239_p1  ;;  %p1981_p9 = por %p1980_p7, %p1979_p6 }
  0x75   : > { %p1975_p5 = pneg %p1974_p3 }
  0x77   : > { %p1982_p12 = pnand %p1981_p9, %p1975_p5 }
  0x79   : > { %1985 = shalt.err (!%p1982_p12)
}
  0x7a   : > { %s2469_s8 = smov 32   ;;  %s2470_s9 = smov 512  }
  0x7b   : > { %1747 = dma.hbm_to_vmem [thread:$0]  (!%p2227_p13), %s2438_s2, 16384, %s262_s17, [#allocation10], %s2470_s9, %s2470_s9, %s2469_s8  }
  0x7c   : > { %s2114_s24 = smov [#allocation14]   ;;  %s1986_s26 = scalar_lea.hbm %s2442_s6, 2048 }
  0x7d   : > { %s293_s13 = sshll.u32 %s2114_s24, 4  ;;  %p1987_p4 = scmp.ne.s32.totalorder %s2442_s6, %s1986_s26  ;;  %s294_s13 = int_to_ptr.vmem [resolvable:$true] %s293_s13 }
  0x7e   : > { %p1993_p11 = scmp.lt.u32.totalorder %s1986_s26, %s2442_s6 }
  0x7f   : > { %p1989_p8 = pnand %p1987_p4, %p2239_p1 }
  0x81   : > { %p1990_p10 = pneg %p1989_p8 }
  0x83   : > { %p1995_p0 = pnand %p1993_p11, %p1990_p10 }
  0x85   : > { %1998 = shalt.err (!%p1995_p0)
}
  0x86   : > { %s1999_s17 = scalar_lea.vmem %s294_s13, 2048  ;;  %p2007_p6 = scmp.lt.s32.totalorder %s294_s13, %s294_s13 }
  0x87   : > { %p2000_p2 = scmp.ne.s32.totalorder %s294_s13, %s1999_s17  ;;  %p2008_p7 = scmp.lt.s32.totalorder %s1999_s17, %s1999_s17 }
  0x89   : > { %p2002_p3 = pnand %p2000_p2, %p2239_p1  ;;  %p2009_p9 = por %p2008_p7, %p2007_p6 }
  0x8b   : > { %p2003_p5 = pneg %p2002_p3 }
  0x8d   : > { %p2010_p12 = pnand %p2009_p9, %p2003_p5 }
  0x8f   : > { %2013 = shalt.err (!%p2010_p12)
}
  0x90   : > { %1753 = dma.hbm_to_vmem [thread:$0]  (!%p2227_p13), %s2442_s6, 2048, %s294_s13, [#allocation13], %s2110_s28, %s2110_s28, %s2111_s18  }
  0x91   : > { %p2471_p4 = scmp.ne.s32.totalorder %s2464_s15, 0 }
  0x92   : > { %p2472_p1 = scmp.ne.s32.totalorder (!%p2471_p4), %s2465_s16, 0 }
  0x93   : > { %309 = sbr.rel (%p2471_p4) target bundleno = 1521 (0x5f1), region = 48 }
  0x9a   : > { %2067 = dma.done.wait (%p2472_p1), [#allocation7], 256  }
  0x9b   : > { %2069 = vsyncadd (%p2472_p1), [#allocation7], 4294967040 }
  0x9c   : > { %2071 = dma.done.wait (%p2472_p1), [#allocation10], 24576  }
  0x9d   : > { %2073 = vsyncadd (%p2472_p1), [#allocation10], 4294942720 }
  0x9e   : > { %2075 = dma.done.wait (%p2472_p1), [#allocation13], 4096  }
  0x9f   : > { %2077 = vsyncadd (%p2472_p1), [#allocation13], 4294963200  ;;  %s349_s15 = sand.u32 1, %s2088_s25   ;;  %p1340_p13 = scmp.ne.s32.totalorder %s2096_s27, 0 }
  0xa0   : > { %s1339_s19 = sshll.u32 %s349_s15, 4  ;;  %v361_v0 = vld [vmem:[#allocation9 + $0x8] sm:$0xff] (!%p1340_p13)  ;;  %v363_v2 = vld [vmem:[#allocation9 + $0x18] sm:$0xff] (!%p1340_p13)  ;;  %v360_v5 = vld [vmem:[#allocation9] sm:$0xff] (!%p1340_p13)  ;;  %v2115_v7 = vmov (!%p1340_p13), 0.0  }
  0xa1   : > { %s2359_s12 = scalar_lea.vmem [#allocation15], %s1339_s19  ;;  %357 = sbr.rel (%p1340_p13) target bundleno = 417 (0x1a1), region = 72  ;;  %v365_v1 = vld [vmem:[#allocation9 + $0x28] sm:$0xff] (!%p1340_p13)  ;;  %v367_v4 = vld [vmem:[#allocation9 + $0x38] sm:$0xff] (!%p1340_p13)  ;;  %v364_v6 = vld [vmem:[#allocation9 + $0x20] sm:$0xff] (!%p1340_p13)  ;;  %510 = vmatprep.mubr.f32.mxu0 (!%p1340_p13), %v2115_v7  ;;  %608 = vst [vmem:[#allocation3] sm:$0xff] (!%p1340_p13), %v2115_v7  ;;  %587 = vmatprep.mubr.f32.mxu1 (!%p1340_p13), %v2115_v7 }
  0xa2   : > { %v1460_v3 = vpack.c.bf16 (!%p1340_p13), %v365_v1, %v361_v0  ;;  %609 = vst [vmem:[#allocation3 + $0x8] sm:$0xff] (!%p1340_p13), %v2115_v7  ;;  %610 = vst [vmem:[#allocation4] sm:$0xff] (!%p1340_p13), %v2115_v7  ;;  %v1492_v8 = vpack.c.bf16 (!%p1340_p13), %v367_v4, %v363_v2  ;;  %v1462_v9 = vpack.c.bf16 (!%p1340_p13), %v364_v6, %v360_v5  ;;  %v362_v10 = vld [vmem:[#allocation9 + $0x10] sm:$0xff] (!%p1340_p13)  ;;  %v369_v12 = vld [vmem:[#allocation9 + $0x48] sm:$0xff] (!%p1340_p13) }
  0xa3   : > { %611 = vst [vmem:[#allocation4 + $0x8] sm:$0xff] (!%p1340_p13), %v2115_v7  ;;  %v366_v11 = vld [vmem:[#allocation9 + $0x30] sm:$0xff] (!%p1340_p13)  ;;  %v373_v14 = vld [vmem:[#allocation9 + $0x68] sm:$0xff] (!%p1340_p13)  ;;  %v371_v15 = vld [vmem:[#allocation9 + $0x58] sm:$0xff] (!%p1340_p13) }
  0xa4   : > { %1461 = vmatprep.subr.bf16.mxu0 (!%p1340_p13), %v1460_v3  ;;  %v1494_v13 = vpack.c.bf16 (!%p1340_p13), %v366_v11, %v362_v10  ;;  %v375_v16 = vld [vmem:[#allocation9 + $0x78] sm:$0xff] (!%p1340_p13)  ;;  %1493 = vmatprep.subr.bf16.mxu1 (!%p1340_p13), %v1492_v8  ;;  %v1464_v17 = vpack.c.bf16 (!%p1340_p13), %v373_v14, %v369_v12  ;;  %v368_v19 = vld [vmem:[#allocation9 + $0x40] sm:$0xff] (!%p1340_p13)  ;;  %v370_v21 = vld [vmem:[#allocation9 + $0x50] sm:$0xff] (!%p1340_p13) }
  0xa5   : > { %1463 = vmatpush1.bf16.msra.mxu0 (!%p1340_p13), %v1462_v9  ;;  %v1496_v18 = vpack.c.bf16 (!%p1340_p13), %v375_v16, %v371_v15  ;;  %v372_v20 = vld [vmem:[#allocation9 + $0x60] sm:$0xff] (!%p1340_p13)  ;;  %v374_v23 = vld [vmem:[#allocation9 + $0x70] sm:$0xff] (!%p1340_p13)  ;;  %v377_v24 = vld [vmem:[#allocation9 + $0x88] sm:$0xff] (!%p1340_p13) }
  0xa6   : > { %1495 = vmatpush1.bf16.msra.mxu1 (!%p1340_p13), %v1494_v13  ;;  %v1466_v22 = vpack.c.bf16 (!%p1340_p13), %v372_v20, %v368_v19  ;;  %v381_v25 = vld [vmem:[#allocation9 + $0xa8] sm:$0xff] (!%p1340_p13)  ;;  %1465 = vmatprep.subr.bf16.mxu0 (!%p1340_p13), %v1464_v17  ;;  %v1498_v26 = vpack.c.bf16 (!%p1340_p13), %v374_v23, %v370_v21  ;;  %v379_v28 = vld [vmem:[#allocation9 + $0x98] sm:$0xff] (!%p1340_p13)  ;;  %v376_v30 = vld [vmem:[#allocation9 + $0x80] sm:$0xff] (!%p1340_p13) }
  0xa7   : > { %1497 = vmatprep.subr.bf16.mxu1 (!%p1340_p13), %v1496_v18  ;;  %v1468_v27 = vpack.c.bf16 (!%p1340_p13), %v381_v25, %v377_v24  ;;  %v383_v29 = vld [vmem:[#allocation9 + $0xb8] sm:$0xff] (!%p1340_p13)  ;;  %v380_v32 = vld [vmem:[#allocation9 + $0xa0] sm:$0xff] (!%p1340_p13)  ;;  %v378_v33 = vld [vmem:[#allocation9 + $0x90] sm:$0xff] (!%p1340_p13) }
  0xa8   : > { %v1500_v31 = vpack.c.bf16 %v383_v29, %v379_v28  ;;  %v382_v34 = vld [vmem:[#allocation9 + $0xb0] sm:$0xff]  ;;  %v1470_v35 = vpack.c.bf16 %v380_v32, %v376_v30  ;;  %v385_v36 = vld [vmem:[#allocation9 + $0xc8] sm:$0xff]  ;;  %v387_v38 = vld [vmem:[#allocation9 + $0xd8] sm:$0xff] }
  0xa9   : > { %1467 = vmatpush1.bf16.msra.mxu0 %v1466_v22  ;;  %v389_v37 = vld [vmem:[#allocation9 + $0xe8] sm:$0xff]  ;;  %v1502_v39 = vpack.c.bf16 %v382_v34, %v378_v33  ;;  %v391_v41 = vld [vmem:[#allocation9 + $0xf8] sm:$0xff]  ;;  %v384_v42 = vld [vmem:[#allocation9 + $0xc0] sm:$0xff] }
  0xaa   : > { %1499 = vmatpush1.bf16.msra.mxu1 %v1498_v26  ;;  %1469 = vmatprep.subr.bf16.mxu0 %v1468_v27  ;;  %v1472_v40 = vpack.c.bf16 %v389_v37, %v385_v36  ;;  %v388_v43 = vld [vmem:[#allocation9 + $0xe0] sm:$0xff]  ;;  %v1504_v44 = vpack.c.bf16 %v391_v41, %v387_v38  ;;  %v386_v45 = vld [vmem:[#allocation9 + $0xd0] sm:$0xff]  ;;  %v393_v47 = vld [vmem:[#allocation9 + $0x108] sm:$0xff]  ;;  %v426_v37 = vlaneseq }
  0xab   : > { %1501 = vmatprep.subr.bf16.mxu1 %v1500_v31  ;;  %v390_v46 = vld [vmem:[#allocation9 + $0xf0] sm:$0xff]  ;;  %v397_v48 = vld [vmem:[#allocation9 + $0x128] sm:$0xff]  ;;  %v395_v49 = vld [vmem:[#allocation9 + $0x118] sm:$0xff]  ;;  %v1474_v51 = vpack.c.bf16 %v388_v43, %v384_v42 }
  0xac   : > { %v399_v50 = vld [vmem:[#allocation9 + $0x138] sm:$0xff]  ;;  %v1506_v52 = vpack.c.bf16 %v390_v46, %v386_v45  ;;  %v1476_v53 = vpack.c.bf16 %v397_v48, %v393_v47  ;;  %v392_v54 = vld [vmem:[#allocation9 + $0x100] sm:$0xff]  ;;  %v394_v56 = vld [vmem:[#allocation9 + $0x110] sm:$0xff]  ;;  %v427_v38 = vshrl.u32 %v426_v37, 7 }
  0xad   : > { %1471 = vmatpush1.bf16.msra.mxu0 %v1470_v35  ;;  %v396_v55 = vld [vmem:[#allocation9 + $0x120] sm:$0xff]  ;;  %v1508_v57 = vpack.c.bf16 %v399_v50, %v395_v49  ;;  %v398_v58 = vld [vmem:[#allocation9 + $0x130] sm:$0xff]  ;;  %v401_v59 = vld [vmem:[#allocation9 + $0x148] sm:$0xff] }
  0xae   : > { %1503 = vmatpush1.bf16.msra.mxu1 %v1502_v39  ;;  %1473 = vmatprep.subr.bf16.mxu0 %v1472_v40  ;;  %v405_v60 = vld [vmem:[#allocation9 + $0x168] sm:$0xff]  ;;  %v403_v61 = vld [vmem:[#allocation9 + $0x158] sm:$0xff]  ;;  %v1478_v63 = vpack.c.bf16 %v396_v55, %v392_v54  ;;  %v1510_v0 = vpack.c.bf16 %v398_v58, %v394_v56  ;;  %v400_v2 = vld [vmem:[#allocation9 + $0x140] sm:$0xff]  ;;  %v428_v39 = vsub.s32 0, %v427_v38  ;;  %v436_v41 = vsub.s32 2, %v427_v38 }
  0xaf   : > { %1505 = vmatprep.subr.bf16.mxu1 %v1504_v44  ;;  %v407_v62 = vld [vmem:[#allocation9 + $0x178] sm:$0xff]  ;;  %v1480_v1 = vpack.c.bf16 %v405_v60, %v401_v59  ;;  %v404_v3 = vld [vmem:[#allocation9 + $0x160] sm:$0xff]  ;;  %v402_v4 = vld [vmem:[#allocation9 + $0x150] sm:$0xff]  ;;  %v432_v42 = vsub.s32 1, %v427_v38  ;;  %v440_v43 = vsub.s32 3, %v427_v38 }
  0xb0   : > { %v1512_v5 = vpack.c.bf16 %v407_v62, %v403_v61  ;;  %v406_v6 = vld [vmem:[#allocation9 + $0x170] sm:$0xff]  ;;  %v409_v8 = vld [vmem:[#allocation9 + $0x188] sm:$0xff]  ;;  %v411_v10 = vld [vmem:[#allocation9 + $0x198] sm:$0xff]  ;;  %v1482_v12 = vpack.c.bf16 %v404_v3, %v400_v2 }
  0xb1   : > { %1475 = vmatpush1.bf16.msra.mxu0 %v1474_v51  ;;  %v413_v9 = vld [vmem:[#allocation9 + $0x1a8] sm:$0xff]  ;;  %v415_v11 = vld [vmem:[#allocation9 + $0x1b8] sm:$0xff]  ;;  %v1514_v13 = vpack.c.bf16 %v406_v6, %v402_v4  ;;  %v408_v15 = vld [vmem:[#allocation9 + $0x180] sm:$0xff] }
  0xb2   : > { %1507 = vmatpush1.bf16.msra.mxu1 %v1506_v52  ;;  %1477 = vmatprep.subr.bf16.mxu0 %v1476_v53  ;;  %v1484_v14 = vpack.c.bf16 %v413_v9, %v409_v8  ;;  %v412_v16 = vld [vmem:[#allocation9 + $0x1a0] sm:$0xff]  ;;  %v410_v17 = vld [vmem:[#allocation9 + $0x190] sm:$0xff]  ;;  %v1516_v18 = vpack.c.bf16 %v415_v11, %v411_v10  ;;  %v417_v20 = vld [vmem:[#allocation9 + $0x1c8] sm:$0xff] }
  0xb3   : > { %1509 = vmatprep.subr.bf16.mxu1 %v1508_v57  ;;  %v414_v19 = vld [vmem:[#allocation9 + $0x1b0] sm:$0xff]  ;;  %v421_v21 = vld [vmem:[#allocation9 + $0x1e8] sm:$0xff]  ;;  %v419_v22 = vld [vmem:[#allocation9 + $0x1d8] sm:$0xff]  ;;  %v1486_v24 = vpack.c.bf16 %v412_v16, %v408_v15 }
  0xb4   : > { %v423_v23 = vld [vmem:[#allocation9 + $0x1f8] sm:$0xff]  ;;  %v1518_v25 = vpack.c.bf16 %v414_v19, %v410_v17  ;;  %v1488_v26 = vpack.c.bf16 %v421_v21, %v417_v20  ;;  %v416_v27 = vld [vmem:[#allocation9 + $0x1c0] sm:$0xff]  ;;  %v418_v30 = vld [vmem:[#allocation9 + $0x1d0] sm:$0xff] }
  0xb5   : > { %1479 = vmatpush1.bf16.msra.mxu0 %v1478_v63  ;;  %v420_v28 = vld [vmem:[#allocation9 + $0x1e0] sm:$0xff]  ;;  %v1520_v29 = vpack.c.bf16 %v423_v23, %v419_v22  ;;  %v422_v31 = vld [vmem:[#allocation9 + $0x1f0] sm:$0xff]  ;;  %v359_v35 = vld [vmem:[#allocation6 + $0x8] sm:$0xff] }
  0xb6   : > { %1511 = vmatpush1.bf16.msra.mxu1 %v1510_v0  ;;  %1481 = vmatprep.subr.bf16.mxu0 %v1480_v1  ;;  %v1490_v32 = vpack.c.bf16 %v420_v28, %v416_v27  ;;  %v1522_v33 = vpack.c.bf16 %v422_v31, %v418_v30  ;;  %v358_v34 = vld [vmem:[#allocation6] sm:$0xff]  ;;  %v1341_v36 = vld [vmem:[#allocation14 + $0x1] ss:$0 sm:$0xff] }
  0xb7   : > { %1513 = vmatprep.subr.bf16.mxu1 %v1512_v5  ;;  %617 = vst [vmem:[#allocation5] sm:$0xff] %v1341_v36  ;;  %618 = vst [vmem:[#allocation5 + $0x8] sm:$0xff] %v1341_v36  ;;  %v424_v40 = vld [vmem:[%s2439_s3] sm:$0xf] }
  0xb8   : > { %v429_v44 = vrot.slane %v424_v40, %v428_v39  ;;  %v437_v45 = vrot.slane %v424_v40, %v436_v41  ;;  %v433_v46 = vrot.slane %v424_v40, %v432_v42  ;;  %v441_v47 = vrot.slane %v424_v40, %v440_v43 }
  0xb9   : > { %1483 = vmatpush1.bf16.msra.mxu0 %v1482_v12 }
  0xba   : > { %1515 = vmatpush1.bf16.msra.mxu1 %v1514_v13  ;;  %1485 = vmatprep.subr.bf16.mxu0 %v1484_v14 }
  0xbb   : > { %1517 = vmatprep.subr.bf16.mxu1 %v1516_v18 }
  0xbd   : > { %1487 = vmatpush1.bf16.msra.mxu0 %v1486_v24 }
  0xbe   : > { %1519 = vmatpush1.bf16.msra.mxu1 %v1518_v25  ;;  %1489 = vmatprep.subr.bf16.mxu0 %v1488_v26 }
  0xbf   : > { %1521 = vmatprep.subr.bf16.mxu1 %v1520_v29 }
  0xc1   : > { %1491 = vmatpush1.bf16.msra.mxu0 %v1490_v32 }
  0xc2   : > { %1523 = vmatpush1.bf16.msra.mxu1 %v1522_v33 }
  0xc4   : > { %511 = vmatmul.mubr.f32.vlgmr.msra.gmra.mrb[0].mxu0 %v358_v34 }
  0xc5   : > { %588 = vmatmul.mubr.f32.vlgmr.msra.gmra.mrb[0].mxu1 %v358_v34  ;;  %516 = vmatprep.mubr.f32.mxu0 %v2115_v7 }
  0xc6   : > { %593 = vmatprep.mubr.f32.mxu1 %v2115_v7 }
  0xc8   : > { %517 = vmatmul.mubr.f32.gmra.mrb[2].mxu0 %v359_v35 }
  0xc9   : > { %594 = vmatmul.mubr.f32.gmra.mrb[2].mxu1 %v359_v35 }
 0x197   : > { %v512_v7 = vpop.f32.mrb[0].mxu0 }
 0x198   : > { %v513_v48 = vadd.f32 %v512_v7, %v429_v44  ;;  %v589_v49 = vpop.f32.mrb[0].mxu1  ;;  %v514_v50 = vpop.f32.mrb[1].mxu0 }
 0x199   : > { %v590_v51 = vadd.f32 %v589_v49, %v437_v45  ;;  %v515_v52 = vadd.f32 %v514_v50, %v433_v46  ;;  %v591_v53 = vpop.f32.mrb[1].mxu1 }
 0x19a   : > { %600 = vst [vmem:[#allocation2] sm:$0xff] %v513_v48  ;;  %v592_v54 = vadd.f32 %v591_v53, %v441_v47 }
 0x19b   : > { %602 = vst [vmem:[#allocation2 + $0x10] sm:$0xff] %v590_v51  ;;  %601 = vst [vmem:[#allocation2 + $0x8] sm:$0xff] %v515_v52  ;;  %v518_v55 = vpop.f32.mrb[2].mxu0 }
 0x19c   : > { %603 = vst [vmem:[#allocation2 + $0x18] sm:$0xff] %v592_v54  ;;  %v519_v56 = vadd.f32 %v518_v55, %v429_v44  ;;  %v595_v57 = vpop.f32.mrb[2].mxu1  ;;  %v520_v58 = vpop.f32.mrb[3].mxu0 }
 0x19d   : > { %v596_v59 = vadd.f32 %v595_v57, %v437_v45  ;;  %v521_v60 = vadd.f32 %v520_v58, %v433_v46  ;;  %v597_v61 = vpop.f32.mrb[3].mxu1 }
 0x19e   : > { %604 = vst [vmem:[#allocation2 + $0x20] sm:$0xff] %v519_v56  ;;  %v598_v62 = vadd.f32 %v597_v61, %v441_v47 }
 0x19f   : > { %606 = vst [vmem:[#allocation2 + $0x30] sm:$0xff] %v596_v59  ;;  %605 = vst [vmem:[#allocation2 + $0x28] sm:$0xff] %v521_v60 }
 0x1a0   : > { %607 = vst [vmem:[#allocation2 + $0x38] sm:$0xff] %v598_v62 }
 0x1a1 PF: > { %v634_v63 = vld [vmem:[#allocation11 + $0x8] sm:$0xff]  ;;  %v633_v1 = vld [vmem:[#allocation11] sm:$0xff]  ;;  %v636_v18 = vld [vmem:[#allocation11 + $0x18] sm:$0xff]  ;;  %s1095_s1 = sadd.s32 1, %s2096_s27 }
 0x1a2   : > { %v638_v0 = vld [vmem:[#allocation11 + $0x28] sm:$0xff]  ;;  %v637_v3 = vld [vmem:[#allocation11 + $0x20] sm:$0xff]  ;;  %v640_v19 = vld [vmem:[#allocation11 + $0x38] sm:$0xff]  ;;  %p1349_p8 = scmp.ge.s32.totalorder %s1095_s1, 4 }
 0x1a3   : > { %v1524_v2 = vpack.c.bf16 %v638_v0, %v634_v63  ;;  %v642_v4 = vld [vmem:[#allocation11 + $0x48] sm:$0xff]  ;;  %v1526_v6 = vpack.c.bf16 %v637_v3, %v633_v1  ;;  %v641_v9 = vld [vmem:[#allocation11 + $0x40] sm:$0xff]  ;;  %v1588_v21 = vpack.c.bf16 %v640_v19, %v636_v18  ;;  %v635_v22 = vld [vmem:[#allocation11 + $0x10] sm:$0xff] }
 0x1a4   : > { %v646_v5 = vld [vmem:[#allocation11 + $0x68] sm:$0xff]  ;;  %v645_v10 = vld [vmem:[#allocation11 + $0x60] sm:$0xff]  ;;  %v639_v23 = vld [vmem:[#allocation11 + $0x30] sm:$0xff] }
 0x1a5   : > { %v1528_v8 = vpack.c.bf16 %v646_v5, %v642_v4  ;;  %v650_v11 = vld [vmem:[#allocation11 + $0x88] sm:$0xff]  ;;  %1525 = vmatprep.subr.bf16.mxu0 %v1524_v2  ;;  %v1530_v13 = vpack.c.bf16 %v645_v10, %v641_v9  ;;  %v649_v14 = vld [vmem:[#allocation11 + $0x80] sm:$0xff]  ;;  %v1590_v24 = vpack.c.bf16 %v639_v23, %v635_v22  ;;  %1589 = vmatprep.subr.bf16.mxu1 %v1588_v21  ;;  %v644_v26 = vld [vmem:[#allocation11 + $0x58] sm:$0xff] }
 0x1a6   : > { %v654_v12 = vld [vmem:[#allocation11 + $0xa8] sm:$0xff]  ;;  %1527 = vmatpush1.bf16.msra.mxu0 %v1526_v6  ;;  %v653_v15 = vld [vmem:[#allocation11 + $0xa0] sm:$0xff]  ;;  %v648_v27 = vld [vmem:[#allocation11 + $0x78] sm:$0xff] }
 0x1a7   : > { %1529 = vmatprep.subr.bf16.mxu0 %v1528_v8  ;;  %v1532_v16 = vpack.c.bf16 %v654_v12, %v650_v11  ;;  %v658_v17 = vld [vmem:[#allocation11 + $0xc8] sm:$0xff]  ;;  %v1534_v25 = vpack.c.bf16 %v653_v15, %v649_v14  ;;  %v643_v28 = vld [vmem:[#allocation11 + $0x50] sm:$0xff]  ;;  %v657_v30 = vld [vmem:[#allocation11 + $0xc0] sm:$0xff]  ;;  %1591 = vmatpush1.bf16.msra.mxu1 %v1590_v24  ;;  %v1592_v32 = vpack.c.bf16 %v648_v27, %v644_v26 }
 0x1a8   : > { %v662_v20 = vld [vmem:[#allocation11 + $0xe8] sm:$0xff]  ;;  %v661_v31 = vld [vmem:[#allocation11 + $0xe0] sm:$0xff]  ;;  %v647_v33 = vld [vmem:[#allocation11 + $0x70] sm:$0xff] }
 0x1a9   : > { %v1536_v29 = vpack.c.bf16 %v662_v20, %v658_v17  ;;  %v666_v34 = vld [vmem:[#allocation11 + $0x108] sm:$0xff]  ;;  %v1594_v36 = vpack.c.bf16 %v647_v33, %v643_v28  ;;  %v652_v37 = vld [vmem:[#allocation11 + $0x98] sm:$0xff]  ;;  %1593 = vmatprep.subr.bf16.mxu1 %v1592_v32  ;;  %v651_v39 = vld [vmem:[#allocation11 + $0x90] sm:$0xff]  ;;  %v1538_v41 = vpack.c.bf16 %v661_v31, %v657_v30 }
 0x1aa   : > { %1531 = vmatpush1.bf16.msra.mxu0 %v1530_v13  ;;  %v670_v35 = vld [vmem:[#allocation11 + $0x128] sm:$0xff]  ;;  %v656_v38 = vld [vmem:[#allocation11 + $0xb8] sm:$0xff]  ;;  %v655_v40 = vld [vmem:[#allocation11 + $0xb0] sm:$0xff] }
 0x1ab   : > { %1533 = vmatprep.subr.bf16.mxu0 %v1532_v16  ;;  %v665_v42 = vld [vmem:[#allocation11 + $0x100] sm:$0xff]  ;;  %v1596_v44 = vpack.c.bf16 %v656_v38, %v652_v37  ;;  %v1540_v45 = vpack.c.bf16 %v670_v35, %v666_v34  ;;  %1595 = vmatpush1.bf16.msra.mxu1 %v1594_v36  ;;  %v674_v46 = vld [vmem:[#allocation11 + $0x148] sm:$0xff]  ;;  %v1598_v47 = vpack.c.bf16 %v655_v40, %v651_v39  ;;  %v660_v7 = vld [vmem:[#allocation11 + $0xd8] sm:$0xff] }
 0x1ac   : > { %v669_v43 = vld [vmem:[#allocation11 + $0x120] sm:$0xff]  ;;  %v664_v48 = vld [vmem:[#allocation11 + $0xf8] sm:$0xff]  ;;  %v678_v49 = vld [vmem:[#allocation11 + $0x168] sm:$0xff] }
 0x1ad   : > { %1597 = vmatprep.subr.bf16.mxu1 %v1596_v44  ;;  %v1600_v50 = vpack.c.bf16 %v664_v48, %v660_v7  ;;  %v659_v51 = vld [vmem:[#allocation11 + $0xd0] sm:$0xff]  ;;  %v1542_v53 = vpack.c.bf16 %v669_v43, %v665_v42  ;;  %v668_v54 = vld [vmem:[#allocation11 + $0x118] sm:$0xff]  ;;  %v1544_v56 = vpack.c.bf16 %v678_v49, %v674_v46  ;;  %v673_v57 = vld [vmem:[#allocation11 + $0x140] sm:$0xff] }
 0x1ae   : > { %1535 = vmatpush1.bf16.msra.mxu0 %v1534_v25  ;;  %v663_v52 = vld [vmem:[#allocation11 + $0xf0] sm:$0xff]  ;;  %v672_v55 = vld [vmem:[#allocation11 + $0x138] sm:$0xff]  ;;  %v677_v58 = vld [vmem:[#allocation11 + $0x160] sm:$0xff] }
 0x1af   : > { %1537 = vmatprep.subr.bf16.mxu0 %v1536_v29  ;;  %1599 = vmatpush1.bf16.msra.mxu1 %v1598_v47  ;;  %v682_v59 = vld [vmem:[#allocation11 + $0x188] sm:$0xff]  ;;  %v1602_v60 = vpack.c.bf16 %v663_v52, %v659_v51  ;;  %v1604_v62 = vpack.c.bf16 %v672_v55, %v668_v54  ;;  %v667_v63 = vld [vmem:[#allocation11 + $0x110] sm:$0xff]  ;;  %v676_v1 = vld [vmem:[#allocation11 + $0x158] sm:$0xff]  ;;  %v1546_v3 = vpack.c.bf16 %v677_v58, %v673_v57 }
 0x1b0   : > { %v686_v61 = vld [vmem:[#allocation11 + $0x1a8] sm:$0xff]  ;;  %1601 = vmatprep.subr.bf16.mxu1 %v1600_v50  ;;  %v671_v0 = vld [vmem:[#allocation11 + $0x130] sm:$0xff]  ;;  %v680_v2 = vld [vmem:[#allocation11 + $0x178] sm:$0xff] }
 0x1b1   : > { %v1548_v4 = vpack.c.bf16 %v686_v61, %v682_v59  ;;  %v681_v5 = vld [vmem:[#allocation11 + $0x180] sm:$0xff]  ;;  %v690_v8 = vld [vmem:[#allocation11 + $0x1c8] sm:$0xff]  ;;  %v1606_v9 = vpack.c.bf16 %v671_v0, %v667_v63  ;;  %v1608_v11 = vpack.c.bf16 %v680_v2, %v676_v1  ;;  %v675_v12 = vld [vmem:[#allocation11 + $0x150] sm:$0xff] }
 0x1b2   : > { %1539 = vmatpush1.bf16.msra.mxu0 %v1538_v41  ;;  %v685_v6 = vld [vmem:[#allocation11 + $0x1a0] sm:$0xff]  ;;  %v694_v10 = vld [vmem:[#allocation11 + $0x1e8] sm:$0xff]  ;;  %v679_v13 = vld [vmem:[#allocation11 + $0x170] sm:$0xff] }
 0x1b3   : > { %1541 = vmatprep.subr.bf16.mxu0 %v1540_v45  ;;  %1603 = vmatpush1.bf16.msra.mxu1 %v1602_v60  ;;  %v684_v14 = vld [vmem:[#allocation11 + $0x198] sm:$0xff]  ;;  %v1550_v16 = vpack.c.bf16 %v685_v6, %v681_v5  ;;  %v1552_v17 = vpack.c.bf16 %v694_v10, %v690_v8  ;;  %v689_v18 = vld [vmem:[#allocation11 + $0x1c0] sm:$0xff]  ;;  %v698_v20 = vld [vmem:[#allocation11 + $0x208] sm:$0xff]  ;;  %v1610_v21 = vpack.c.bf16 %v679_v13, %v675_v12 }
 0x1b4   : > { %1605 = vmatprep.subr.bf16.mxu1 %v1604_v62  ;;  %v688_v15 = vld [vmem:[#allocation11 + $0x1b8] sm:$0xff]  ;;  %v693_v19 = vld [vmem:[#allocation11 + $0x1e0] sm:$0xff]  ;;  %v702_v22 = vld [vmem:[#allocation11 + $0x228] sm:$0xff] }
 0x1b5   : > { %v1612_v23 = vpack.c.bf16 %v688_v15, %v684_v14  ;;  %v683_v24 = vld [vmem:[#allocation11 + $0x190] sm:$0xff]  ;;  %v692_v26 = vld [vmem:[#allocation11 + $0x1d8] sm:$0xff]  ;;  %v1554_v28 = vpack.c.bf16 %v693_v19, %v689_v18  ;;  %v1556_v29 = vpack.c.bf16 %v702_v22, %v698_v20  ;;  %v697_v30 = vld [vmem:[#allocation11 + $0x200] sm:$0xff] }
 0x1b6   : > { %1543 = vmatpush1.bf16.msra.mxu0 %v1542_v53  ;;  %v687_v25 = vld [vmem:[#allocation11 + $0x1b0] sm:$0xff]  ;;  %v696_v27 = vld [vmem:[#allocation11 + $0x1f8] sm:$0xff]  ;;  %v701_v31 = vld [vmem:[#allocation11 + $0x220] sm:$0xff] }
 0x1b7   : > { %1545 = vmatprep.subr.bf16.mxu0 %v1544_v56  ;;  %1607 = vmatpush1.bf16.msra.mxu1 %v1606_v9  ;;  %v706_v32 = vld [vmem:[#allocation11 + $0x248] sm:$0xff]  ;;  %v1614_v33 = vpack.c.bf16 %v687_v25, %v683_v24  ;;  %v1616_v35 = vpack.c.bf16 %v696_v27, %v692_v26  ;;  %v691_v36 = vld [vmem:[#allocation11 + $0x1d0] sm:$0xff]  ;;  %v700_v38 = vld [vmem:[#allocation11 + $0x218] sm:$0xff]  ;;  %v1558_v40 = vpack.c.bf16 %v701_v31, %v697_v30 }
 0x1b8   : > { %1609 = vmatprep.subr.bf16.mxu1 %v1608_v11  ;;  %v710_v34 = vld [vmem:[#allocation11 + $0x268] sm:$0xff]  ;;  %v695_v37 = vld [vmem:[#allocation11 + $0x1f0] sm:$0xff]  ;;  %v704_v39 = vld [vmem:[#allocation11 + $0x238] sm:$0xff] }
 0x1b9   : > { %v1560_v41 = vpack.c.bf16 %v710_v34, %v706_v32  ;;  %v705_v42 = vld [vmem:[#allocation11 + $0x240] sm:$0xff]  ;;  %v714_v44 = vld [vmem:[#allocation11 + $0x288] sm:$0xff]  ;;  %v1618_v45 = vpack.c.bf16 %v695_v37, %v691_v36  ;;  %v1620_v47 = vpack.c.bf16 %v704_v39, %v700_v38  ;;  %v699_v7 = vld [vmem:[#allocation11 + $0x210] sm:$0xff] }
 0x1ba   : > { %1547 = vmatpush1.bf16.msra.mxu0 %v1546_v3  ;;  %v709_v43 = vld [vmem:[#allocation11 + $0x260] sm:$0xff]  ;;  %v718_v46 = vld [vmem:[#allocation11 + $0x2a8] sm:$0xff]  ;;  %v703_v48 = vld [vmem:[#allocation11 + $0x230] sm:$0xff] }
 0x1bb   : > { %1549 = vmatprep.subr.bf16.mxu0 %v1548_v4  ;;  %1611 = vmatpush1.bf16.msra.mxu1 %v1610_v21  ;;  %v708_v49 = vld [vmem:[#allocation11 + $0x258] sm:$0xff]  ;;  %v1562_v51 = vpack.c.bf16 %v709_v43, %v705_v42  ;;  %v713_v52 = vld [vmem:[#allocation11 + $0x280] sm:$0xff]  ;;  %v1564_v53 = vpack.c.bf16 %v718_v46, %v714_v44  ;;  %v722_v55 = vld [vmem:[#allocation11 + $0x2c8] sm:$0xff]  ;;  %v1622_v57 = vpack.c.bf16 %v703_v48, %v699_v7 }
 0x1bc   : > { %1613 = vmatprep.subr.bf16.mxu1 %v1612_v23  ;;  %v712_v50 = vld [vmem:[#allocation11 + $0x278] sm:$0xff]  ;;  %v717_v54 = vld [vmem:[#allocation11 + $0x2a0] sm:$0xff]  ;;  %v726_v56 = vld [vmem:[#allocation11 + $0x2e8] sm:$0xff] }
 0x1bd   : > { %v1624_v58 = vpack.c.bf16 %v712_v50, %v708_v49  ;;  %v707_v59 = vld [vmem:[#allocation11 + $0x250] sm:$0xff]  ;;  %v619_v61 = vld [vmem:[#allocation3] sm:$0xff]  ;;  %v716_v62 = vld [vmem:[#allocation11 + $0x298] sm:$0xff]  ;;  %v1566_v0 = vpack.c.bf16 %v717_v54, %v713_v52  ;;  %v1568_v1 = vpack.c.bf16 %v726_v56, %v722_v55 }
 0x1be   : > { %1551 = vmatpush1.bf16.msra.mxu0 %v1550_v16  ;;  %v711_v60 = vld [vmem:[#allocation11 + $0x270] sm:$0xff]  ;;  %v720_v63 = vld [vmem:[#allocation11 + $0x2b8] sm:$0xff]  ;;  %825 = vmatprep.mubr.f32.mxu0 %v619_v61  ;;  %v721_v2 = vld [vmem:[#allocation11 + $0x2c0] sm:$0xff] }
 0x1bf   : > { %1553 = vmatprep.subr.bf16.mxu0 %v1552_v17  ;;  %1615 = vmatpush1.bf16.msra.mxu1 %v1614_v33  ;;  %v725_v3 = vld [vmem:[#allocation11 + $0x2e0] sm:$0xff]  ;;  %v730_v4 = vld [vmem:[#allocation11 + $0x308] sm:$0xff]  ;;  %v1626_v5 = vpack.c.bf16 %v711_v60, %v707_v59  ;;  %v1628_v8 = vpack.c.bf16 %v720_v63, %v716_v62  ;;  %v715_v9 = vld [vmem:[#allocation11 + $0x290] sm:$0xff] }
 0x1c0   : > { %1617 = vmatprep.subr.bf16.mxu1 %v1616_v35  ;;  %902 = vmatprep.mubr.f32.mxu1 %v619_v61  ;;  %v734_v6 = vld [vmem:[#allocation11 + $0x328] sm:$0xff]  ;;  %v719_v10 = vld [vmem:[#allocation11 + $0x2b0] sm:$0xff]  ;;  %v724_v11 = vld [vmem:[#allocation11 + $0x2d8] sm:$0xff]  ;;  %v1570_v13 = vpack.c.bf16 %v725_v3, %v721_v2 }
 0x1c1   : > { %v728_v12 = vld [vmem:[#allocation11 + $0x2f8] sm:$0xff]  ;;  %v1572_v14 = vpack.c.bf16 %v734_v6, %v730_v4  ;;  %v729_v15 = vld [vmem:[#allocation11 + $0x300] sm:$0xff]  ;;  %v738_v17 = vld [vmem:[#allocation11 + $0x348] sm:$0xff]  ;;  %v1630_v18 = vpack.c.bf16 %v719_v10, %v715_v9 }
 0x1c2   : > { %1555 = vmatpush1.bf16.msra.mxu0 %v1554_v28  ;;  %v733_v16 = vld [vmem:[#allocation11 + $0x320] sm:$0xff]  ;;  %v742_v19 = vld [vmem:[#allocation11 + $0x368] sm:$0xff]  ;;  %v1632_v20 = vpack.c.bf16 %v728_v12, %v724_v11  ;;  %v723_v21 = vld [vmem:[#allocation11 + $0x2d0] sm:$0xff] }
 0x1c3   : > { %1557 = vmatprep.subr.bf16.mxu0 %v1556_v29  ;;  %1619 = vmatpush1.bf16.msra.mxu1 %v1618_v45  ;;  %v727_v22 = vld [vmem:[#allocation11 + $0x2f0] sm:$0xff]  ;;  %v732_v23 = vld [vmem:[#allocation11 + $0x318] sm:$0xff]  ;;  %v1574_v25 = vpack.c.bf16 %v733_v16, %v729_v15  ;;  %v1576_v26 = vpack.c.bf16 %v742_v19, %v738_v17  ;;  %v737_v27 = vld [vmem:[#allocation11 + $0x340] sm:$0xff] }
 0x1c4   : > { %1621 = vmatprep.subr.bf16.mxu1 %v1620_v47  ;;  %v736_v24 = vld [vmem:[#allocation11 + $0x338] sm:$0xff]  ;;  %v741_v28 = vld [vmem:[#allocation11 + $0x360] sm:$0xff]  ;;  %v746_v29 = vld [vmem:[#allocation11 + $0x388] sm:$0xff]  ;;  %v1634_v30 = vpack.c.bf16 %v727_v22, %v723_v21 }
 0x1c5   : > { %v750_v31 = vld [vmem:[#allocation11 + $0x3a8] sm:$0xff]  ;;  %v1636_v32 = vpack.c.bf16 %v736_v24, %v732_v23  ;;  %v731_v33 = vld [vmem:[#allocation11 + $0x310] sm:$0xff]  ;;  %v740_v35 = vld [vmem:[#allocation11 + $0x358] sm:$0xff]  ;;  %v1578_v37 = vpack.c.bf16 %v741_v28, %v737_v27 }
 0x1c6   : > { %1559 = vmatpush1.bf16.msra.mxu0 %v1558_v40  ;;  %v735_v34 = vld [vmem:[#allocation11 + $0x330] sm:$0xff]  ;;  %v744_v36 = vld [vmem:[#allocation11 + $0x378] sm:$0xff]  ;;  %v1580_v38 = vpack.c.bf16 %v750_v31, %v746_v29  ;;  %v745_v39 = vld [vmem:[#allocation11 + $0x380] sm:$0xff] }
 0x1c7   : > { %1561 = vmatprep.subr.bf16.mxu0 %v1560_v41  ;;  %1623 = vmatpush1.bf16.msra.mxu1 %v1622_v57  ;;  %v749_v40 = vld [vmem:[#allocation11 + $0x3a0] sm:$0xff]  ;;  %v754_v41 = vld [vmem:[#allocation11 + $0x3c8] sm:$0xff]  ;;  %v1638_v42 = vpack.c.bf16 %v735_v34, %v731_v33  ;;  %v1640_v44 = vpack.c.bf16 %v744_v36, %v740_v35  ;;  %v739_v45 = vld [vmem:[#allocation11 + $0x350] sm:$0xff] }
 0x1c8   : > { %1625 = vmatprep.subr.bf16.mxu1 %v1624_v58  ;;  %v758_v43 = vld [vmem:[#allocation11 + $0x3e8] sm:$0xff]  ;;  %v743_v46 = vld [vmem:[#allocation11 + $0x370] sm:$0xff]  ;;  %v748_v47 = vld [vmem:[#allocation11 + $0x398] sm:$0xff]  ;;  %v1582_v48 = vpack.c.bf16 %v749_v40, %v745_v39 }
 0x1c9   : > { %v752_v7 = vld [vmem:[#allocation11 + $0x3b8] sm:$0xff]  ;;  %v1584_v49 = vpack.c.bf16 %v758_v43, %v754_v41  ;;  %v753_v50 = vld [vmem:[#allocation11 + $0x3c0] sm:$0xff]  ;;  %v1642_v52 = vpack.c.bf16 %v743_v46, %v739_v45  ;;  %v747_v54 = vld [vmem:[#allocation11 + $0x390] sm:$0xff] }
 0x1ca   : > { %1563 = vmatpush1.bf16.msra.mxu0 %v1562_v51  ;;  %v757_v51 = vld [vmem:[#allocation11 + $0x3e0] sm:$0xff]  ;;  %v751_v55 = vld [vmem:[#allocation11 + $0x3b0] sm:$0xff]  ;;  %v756_v56 = vld [vmem:[#allocation11 + $0x3d8] sm:$0xff] }
 0x1cb   : > { %1565 = vmatprep.subr.bf16.mxu0 %v1564_v53  ;;  %1627 = vmatpush1.bf16.msra.mxu1 %v1626_v5  ;;  %v1644_v53 = vpack.c.bf16 %v752_v7, %v748_v47  ;;  %v760_v57 = vld [vmem:[#allocation11 + $0x3f8] sm:$0xff]  ;;  %v1586_v58 = vpack.c.bf16 %v757_v51, %v753_v50  ;;  %v1646_v59 = vpack.c.bf16 %v751_v55, %v747_v54  ;;  %v755_v61 = vld [vmem:[#allocation11 + $0x3d0] sm:$0xff]  ;;  %v623_v63 = vld [vmem:[#allocation5] sm:$0xff] }
 0x1cc   : > { %1629 = vmatprep.subr.bf16.mxu1 %v1628_v8  ;;  %v1648_v60 = vpack.c.bf16 %v760_v57, %v756_v56  ;;  %v759_v62 = vld [vmem:[#allocation11 + $0x3f0] sm:$0xff]  ;;  %v624_v2 = vld [vmem:[#allocation5 + $0x8] sm:$0xff]  ;;  %v975_v3 = vld [vmem:[#allocation12] sm:$0xff] }
 0x1cd   : > { %v976_v4 = vld [vmem:[#allocation12 + $0x8] sm:$0xff]  ;;  %v977_v6 = vld [vmem:[#allocation12 + $0x10] sm:$0xff]  ;;  %v978_v8 = vld [vmem:[#allocation12 + $0x18] sm:$0xff] }
 0x1ce   : > { %1567 = vmatpush1.bf16.msra.mxu0 %v1566_v0  ;;  %v620_v0 = vld [vmem:[#allocation3 + $0x8] sm:$0xff]  ;;  %v1652_v5 = vpack.c.bf16 %v976_v4, %v975_v3  ;;  %v1656_v9 = vpack.c.bf16 %v978_v8, %v977_v6  ;;  %v979_v10 = vld [vmem:[#allocation12 + $0x20] sm:$0xff]  ;;  %v985_v19 = vld [vmem:[#allocation12 + $0x50] sm:$0xff] }
 0x1cf   : > { %1569 = vmatprep.subr.bf16.mxu0 %v1568_v1  ;;  %1631 = vmatpush1.bf16.msra.mxu1 %v1630_v18  ;;  %v1650_v1 = vpack.c.bf16 %v759_v62, %v755_v61  ;;  %v980_v11 = vld [vmem:[#allocation12 + $0x28] sm:$0xff]  ;;  %v983_v16 = vld [vmem:[#allocation12 + $0x40] sm:$0xff]  ;;  %v989_v24 = vld [vmem:[#allocation12 + $0x70] sm:$0xff] }
 0x1d0   : > { %1633 = vmatprep.subr.bf16.mxu1 %v1632_v20  ;;  %v1660_v12 = vpack.c.bf16 %v980_v11, %v979_v10  ;;  %v984_v17 = vld [vmem:[#allocation12 + $0x48] sm:$0xff]  ;;  %v986_v20 = vld [vmem:[#allocation12 + $0x58] sm:$0xff]  ;;  %v987_v22 = vld [vmem:[#allocation12 + $0x60] sm:$0xff] }
 0x1d1   : > { %v1668_v18 = vpack.c.bf16 %v984_v17, %v983_v16  ;;  %v1672_v21 = vpack.c.bf16 %v986_v20, %v985_v19  ;;  %v988_v23 = vld [vmem:[#allocation12 + $0x68] sm:$0xff]  ;;  %v625_v28 = vld [vmem:[#allocation2] sm:$0xff]  ;;  %v628_v39 = vld [vmem:[#allocation2 + $0x18] sm:$0xff] }
 0x1d2   : > { %1571 = vmatpush1.bf16.msra.mxu0 %v1570_v13  ;;  %v981_v13 = vld [vmem:[#allocation12 + $0x30] sm:$0xff]  ;;  %v626_v29 = vld [vmem:[#allocation2 + $0x8] sm:$0xff]  ;;  %v629_v34 = vld [vmem:[#allocation2 + $0x20] sm:$0xff] }
 0x1d3   : > { %1573 = vmatprep.subr.bf16.mxu0 %v1572_v14  ;;  %1635 = vmatpush1.bf16.msra.mxu1 %v1634_v30  ;;  %v982_v14 = vld [vmem:[#allocation12 + $0x38] sm:$0xff]  ;;  %v630_v36 = vld [vmem:[#allocation2 + $0x28] sm:$0xff]  ;;  %v631_v54 = vld [vmem:[#allocation2 + $0x30] sm:$0xff] }
 0x1d4   : > { %1637 = vmatprep.subr.bf16.mxu1 %v1636_v32  ;;  %v1664_v15 = vpack.c.bf16 %v982_v14, %v981_v13  ;;  %v632_v7 = vld [vmem:[#allocation2 + $0x38] sm:$0xff]  ;;  %v621_v4 = vld [vmem:[#allocation4] sm:$0xff] }
 0x1d6   : > { %1575 = vmatpush1.bf16.msra.mxu0 %v1574_v25  ;;  %v1676_v25 = vpack.c.bf16 %v988_v23, %v987_v22 }
 0x1d7   : > { %1577 = vmatprep.subr.bf16.mxu0 %v1576_v26  ;;  %1639 = vmatpush1.bf16.msra.mxu1 %v1638_v42  ;;  %v990_v26 = vld [vmem:[#allocation12 + $0x78] sm:$0xff] }
 0x1d8   : > { %1641 = vmatprep.subr.bf16.mxu1 %v1640_v44  ;;  %v1680_v27 = vpack.c.bf16 %v990_v26, %v989_v24  ;;  %v1348_v26 = vld [vmem:[%s2441_s5] ss:$0 sm:$0xff] }
 0x1da   : > { %1579 = vmatpush1.bf16.msra.mxu0 %v1578_v37 }
 0x1db   : > { %1581 = vmatprep.subr.bf16.mxu0 %v1580_v38  ;;  %1643 = vmatpush1.bf16.msra.mxu1 %v1642_v52 }
 0x1dc   : > { %1645 = vmatprep.subr.bf16.mxu1 %v1644_v53 }
 0x1de   : > { %1583 = vmatpush1.bf16.msra.mxu0 %v1582_v48  ;;  %v627_v48 = vld [vmem:[#allocation2 + $0x10] sm:$0xff] }
 0x1df   : > { %1585 = vmatprep.subr.bf16.mxu0 %v1584_v49  ;;  %1647 = vmatpush1.bf16.msra.mxu1 %v1646_v59 }
 0x1e0   : > { %1649 = vmatprep.subr.bf16.mxu1 %v1648_v60 }
 0x1e2   : > { %1587 = vmatpush1.bf16.msra.mxu0 %v1586_v58 }
 0x1e3   : > { %1651 = vmatpush1.bf16.msra.mxu1 %v1650_v1  ;;  %1653 = vmatprep.subr.bf16.mxu0 %v1652_v5 }
 0x1e5   : > { %826 = vmatmul.mubr.f32.vlgmr.msra.gmra.mrb[0].mxu0 %v623_v63 }
 0x1e6   : > { %831 = vmatprep.mubr.f32.mxu0 %v620_v0  ;;  %903 = vmatmul.mubr.f32.vlgmr.msra.gmra.mrb[0].mxu1 %v623_v63 }
 0x1e7   : > { %908 = vmatprep.mubr.f32.mxu1 %v620_v0  ;;  %1655 = vmatpush3.bf16.msra.mxu0 %v1652_v5 }
 0x1e8   : > { %1657 = vmatprep.subr.bf16.mxu0 %v1656_v9 }
 0x1e9   : > { %832 = vmatmul.mubr.f32.gmra.mrb[2].mxu0 %v624_v2 }
 0x1ea   : > { %909 = vmatmul.mubr.f32.gmra.mrb[2].mxu1 %v624_v2 }
 0x1eb   : > { %1659 = vmatpush3.bf16.msra.mxu0 %v1656_v9 }
 0x1ec   : > { %1661 = vmatprep.subr.bf16.mxu0 %v1660_v12 }
 0x1ef   : > { %1663 = vmatpush3.bf16.msra.mxu0 %v1660_v12  ;;  %v622_v12 = vld [vmem:[#allocation4 + $0x8] sm:$0xff] }
 0x1f0   : > { %1665 = vmatprep.subr.bf16.mxu0 %v1664_v15 }
 0x1f3   : > { %1667 = vmatpush3.bf16.msra.mxu0 %v1664_v15 }
 0x1f4   : > { %1669 = vmatprep.subr.bf16.mxu0 %v1668_v18 }
 0x1f7   : > { %1671 = vmatpush3.bf16.msra.mxu0 %v1668_v18 }
 0x1f8   : > { %1673 = vmatprep.subr.bf16.mxu0 %v1672_v21 }
 0x1fb   : > { %1675 = vmatpush3.bf16.msra.mxu0 %v1672_v21 }
 0x1fc   : > { %1677 = vmatprep.subr.bf16.mxu0 %v1676_v25 }
 0x1ff   : > { %1679 = vmatpush3.bf16.msra.mxu0 %v1676_v25 }
 0x200   : > { %1681 = vmatprep.subr.bf16.mxu0 %v1680_v27 }
 0x203   : > { %1683 = vmatpush3.bf16.msra.mxu0 %v1680_v27 }
 0x2b8   : > { %v827_v30 = vpop.f32.mrb[0].mxu0 }
 0x2b9   : > { %v915_v31 = vadd.f32 %v827_v30, %v625_v28  ;;  %v829_v32 = vpop.f32.mrb[1].mxu0  ;;  %v904_v42 = vpop.f32.mrb[0].mxu1 }
 0x2ba   : > { %v916_v33 = vadd.f32 %v829_v32, %v626_v29  ;;  %v906_v44 = vpop.f32.mrb[1].mxu1  ;;  %v917_v53 = vadd.f32 %v904_v42, %v627_v48  ;;  %v1106_v48 = vld [vmem:[#allocation14 + $0x10] sm:$0xff] (!%p1349_p8) }
 0x2bb   : > { %v1342_v35 = vmul.f32 -1.442695, %v915_v31  ;;  %v918_v46 = vadd.f32 %v906_v44, %v628_v39 }
 0x2bc   : > { %v1344_v37 = vmul.f32 -1.442695, %v916_v33  ;;  %v833_v38 = vpop.f32.mrb[2].mxu0 }
 0x2bd   : > { %1830 = vpow2.f32 %v1342_v35  ;;  %v919_v40 = vadd.f32 %v833_v38, %v629_v34  ;;  %v835_v41 = vpop.f32.mrb[3].mxu0  ;;  %v910_v49 = vpop.f32.mrb[2].mxu1  ;;  %v1346_v51 = vmul.f32 -1.442695, %v918_v46 }
 0x2be   : > { %1832 = vpow2.f32 %v1344_v37  ;;  %v920_v43 = vadd.f32 %v835_v41, %v630_v36  ;;  %v912_v50 = vpop.f32.mrb[3].mxu1  ;;  %v921_v59 = vadd.f32 %v910_v49, %v631_v54 }
 0x2bf   : > { %v1343_v45 = vmul.f32 -1.442695, %v919_v40  ;;  %v922_v52 = vadd.f32 %v912_v50, %v632_v7  ;;  %v1105_v7 = vld [vmem:[#allocation14 + $0x8] sm:$0xff] (!%p1349_p8)  ;;  %v1107_v50 = vld [vmem:[#allocation14 + $0x18] sm:$0xff] (!%p1349_p8) }
 0x2c0   : > { %v1345_v47 = vmul.f32 -1.442695, %v920_v43 }
 0x2c1   : > { %1834 = vpow2.f32 %v1343_v45  ;;  %v1347_v55 = vmul.f32 -1.442695, %v922_v52  ;;  %v1108_v52 = vld [vmem:[#allocation14 + $0x20] sm:$0xff] (!%p1349_p8) }
 0x2c2   : > { %1836 = vpow2.f32 %v1345_v47  ;;  %v1104_v47 = vld [vmem:[#allocation14] sm:$0xff] (!%p1349_p8) }
 0x2c3   : > { %1838 = vpow2.f32 %v1346_v51  ;;  %v1684_v49 = vpack.c.bf16 (!%p1349_p8), %v1105_v7, %v1104_v47  ;;  %v1688_v51 = vpack.c.bf16 (!%p1349_p8), %v1107_v50, %v1106_v48 }
 0x2c4   : > { %1840 = vtanh.f32 %v917_v53  ;;  %v1109_v53 = vld [vmem:[#allocation14 + $0x28] sm:$0xff] (!%p1349_p8) }
 0x2c5   : > { %1842 = vpow2.f32 %v1347_v55  ;;  %1685 = vmatprep.subr.bf16.mxu0 (!%p1349_p8), %v1684_v49  ;;  %v1692_v54 = vpack.c.bf16 (!%p1349_p8), %v1109_v53, %v1108_v52  ;;  %v1110_v55 = vld [vmem:[#allocation14 + $0x30] sm:$0xff] (!%p1349_p8) }
 0x2c7   : > { %v1831_v56 = vpop.eup %1830 }
 0x2c8   : > { %v1833_v57 = vpop.eup %1832  ;;  %v929_v58 = vadd.f32 1.0, %v1831_v56  ;;  %v1111_v56 = vld [vmem:[#allocation14 + $0x38] sm:$0xff] (!%p1349_p8) }
 0x2c9   : > { %v941_v60 = vadd.f32 1.0, %v1833_v57  ;;  %v1696_v57 = vpack.c.bf16 (!%p1349_p8), %v1111_v56, %v1110_v55 }
 0x2ca   : > { %1844 = vrcp.f32 %v929_v58 }
 0x2cb   : > { %v1835_v61 = vpop.eup %1834  ;;  %1846 = vrcp.f32 %v941_v60  ;;  %v1113_v60 = vld [vmem:[#allocation14 + $0x48] sm:$0xff] (!%p1349_p8) }
 0x2cc   : > { %v1837_v62 = vpop.eup %1836  ;;  %v930_v63 = vadd.f32 1.0, %v1835_v61  ;;  %1848 = vtanh.f32 %v921_v59  ;;  %v1112_v59 = vld [vmem:[#allocation14 + $0x40] sm:$0xff] (!%p1349_p8) }
 0x2cd   : > { %v942_v0 = vadd.f32 1.0, %v1837_v62  ;;  %v1839_v1 = vpop.eup %1838  ;;  %v1700_v62 = vpack.c.bf16 (!%p1349_p8), %v1113_v60, %v1112_v59 }
 0x2ce   : > { %1850 = vrcp.f32 %v930_v63  ;;  %v1841_v2 = vpop.eup %1840  ;;  %v955_v6 = vadd.f32 1.0, %v1839_v1  ;;  %v1114_v63 = vld [vmem:[#allocation14 + $0x50] sm:$0xff] (!%p1349_p8) }
 0x2cf   : > { %1852 = vrcp.f32 %v942_v0  ;;  %v1843_v3 = vpop.eup %1842  ;;  %v1115_v0 = vld [vmem:[#allocation14 + $0x58] sm:$0xff] (!%p1349_p8) }
 0x2d0   : > { %1854 = vrcp.f32 %v955_v6  ;;  %v956_v15 = vadd.f32 1.0, %v1843_v3  ;;  %v1704_v1 = vpack.c.bf16 (!%p1349_p8), %v1115_v0, %v1114_v63  ;;  %v1117_v3 = vld [vmem:[#allocation14 + $0x68] sm:$0xff] (!%p1349_p8)  ;;  %v1119_v6 = vld [vmem:[#allocation14 + $0x78] sm:$0xff] (!%p1349_p8) }
 0x2d4   : > { %v1845_v5 = vpop.eup %1844 }
 0x2d5   : > { %v1847_v8 = vpop.eup %1846  ;;  %v963_v9 = vmul.f32 %v1845_v5, %v1841_v2  ;;  %v1116_v2 = vld [vmem:[#allocation14 + $0x60] sm:$0xff] (!%p1349_p8)  ;;  %v1118_v5 = vld [vmem:[#allocation14 + $0x70] sm:$0xff] (!%p1349_p8) }
 0x2d6   : > { %v1849_v10 = vpop.eup %1848  ;;  %v961_v11 = vmul.f32 %v1847_v8, %v621_v4  ;;  %v1708_v4 = vpack.c.bf16 (!%p1349_p8), %v1117_v3, %v1116_v2  ;;  %v1712_v8 = vpack.c.bf16 (!%p1349_p8), %v1119_v6, %v1118_v5 }
 0x2d8   : > { %v1851_v13 = vpop.eup %1850  ;;  %v965_v14 = vadd.f32 %v963_v9, %v961_v11 }
 0x2d9   : > { %v1853_v16 = vpop.eup %1852  ;;  %v964_v17 = vmul.f32 %v1851_v13, %v1849_v10 }
 0x2da   : > { %v962_v18 = vmul.f32 %v1853_v16, %v622_v12  ;;  %973 = vst [vmem:[#allocation4] sm:$0xff] %v965_v14  ;;  %1856 = vtanh.f32 %v965_v14  ;;  %v1855_v20 = vpop.eup %1854 }
 0x2db   : > { %1858 = vrcp.f32 %v956_v15 }
 0x2dc   : > { %v966_v19 = vadd.f32 %v964_v17, %v962_v18 }
 0x2de   : > { %1860 = vtanh.f32 %v966_v19  ;;  %974 = vst [vmem:[#allocation4 + $0x8] sm:$0xff] %v966_v19 }
 0x2e4   : > { %v1857_v21 = vpop.eup %1856 }
 0x2e5   : > { %v969_v22 = vmul.f32 %v1857_v21, %v1855_v20  ;;  %v1859_v23 = vpop.eup %1858 }
 0x2e7   : > { %971 = vst [vmem:[#allocation3] sm:$0xff] %v969_v22  ;;  %1422 = vmatprep.mubr.f32.mxu0 %v969_v22 }
 0x2e8   : > { %v1861_v24 = vpop.eup %1860 }
 0x2e9   : > { %v970_v25 = vmul.f32 %v1861_v24, %v1859_v23 }
 0x2eb   : > { %972 = vst [vmem:[#allocation3 + $0x8] sm:$0xff] %v970_v25  ;;  %1423 = vmatmul.mubr.f32.vlgmr.msra.gmra.mrb[4].mxu0 %v970_v25 }
 0x2ec   : > { %1687 = vmatpush3.bf16.msra.mxu0 (!%p1349_p8), %v1684_v49 }
 0x2ed   : > { %1689 = vmatprep.subr.bf16.mxu0 (!%p1349_p8), %v1688_v51 }
 0x2f0   : > { %1691 = vmatpush3.bf16.msra.mxu0 (!%p1349_p8), %v1688_v51 }
 0x2f1   : > { %1693 = vmatprep.subr.bf16.mxu0 (!%p1349_p8), %v1692_v54 }
 0x2f4   : > { %1695 = vmatpush3.bf16.msra.mxu0 (!%p1349_p8), %v1692_v54 }
 0x2f5   : > { %1697 = vmatprep.subr.bf16.mxu0 (!%p1349_p8), %v1696_v57 }
 0x2f8   : > { %1699 = vmatpush3.bf16.msra.mxu0 (!%p1349_p8), %v1696_v57 }
 0x2f9   : > { %1701 = vmatprep.subr.bf16.mxu0 (!%p1349_p8), %v1700_v62 }
 0x2fc   : > { %1703 = vmatpush3.bf16.msra.mxu0 (!%p1349_p8), %v1700_v62 }
 0x2fd   : > { %1705 = vmatprep.subr.bf16.mxu0 (!%p1349_p8), %v1704_v1 }
 0x300   : > { %1707 = vmatpush3.bf16.msra.mxu0 (!%p1349_p8), %v1704_v1 }
 0x301   : > { %1709 = vmatprep.subr.bf16.mxu0 (!%p1349_p8), %v1708_v4 }
 0x304   : > { %1711 = vmatpush3.bf16.msra.mxu0 (!%p1349_p8), %v1708_v4 }
 0x305   : > { %1713 = vmatprep.subr.bf16.mxu0 (!%p1349_p8), %v1712_v8 }
 0x308   : > { %1715 = vmatpush3.bf16.msra.mxu0 (!%p1349_p8), %v1712_v8 }
 0x3be   : > { %v1424_v27 = vpop.f32.mrb[4].mxu0 }
 0x3bf   : > { %v1064_v28 = vpop.f32.mrb[5].mxu0  ;;  %v1070_v30 = vadd.f32 %v1424_v27, %v1348_v26 }
 0x3c0   : > { %v1065_v29 = vadd.f32 %v1348_v26, %v1064_v28 }
 0x3c2   : > { %1073 = vmax.xlane.f32.xlu0 %v1065_v29 }
 0x3c6   : > { %1075 = vmax.xlane.f32.xlu0 %v1070_v30 }
 0x44f   : > { %v1074_v31 = vpop.xlane.xlu0 %1073 }
 0x450   : > { %v1077_v32 = vsub.f32 %v1065_v29, %v1074_v31 }
 0x452   : > { %v1079_v33 = vmul.f32 1.442695, %v1077_v32 }
 0x453   : > { %v1076_v34 = vpop.xlane.xlu0 %1075 }
 0x454   : > { %v1078_v35 = vsub.f32 %v1070_v30, %v1076_v34  ;;  %1862 = vpow2.f32 %v1079_v33 }
 0x456   : > { %v1081_v36 = vmul.f32 1.442695, %v1078_v35 }
 0x458   : > { %1864 = vpow2.f32 %v1081_v36 }
 0x45e   : > { %v1863_v37 = vpop.eup %1862 }
 0x45f   : > { %1083 = vadd.xlane.f32.xlu1 %v1863_v37 }
 0x462   : > { %v1865_v38 = vpop.eup %1864 }
 0x463   : > { %1085 = vadd.xlane.f32.xlu1 %v1865_v38 }
 0x4ec   : > { %v1084_v39 = vpop.xlane.xlu1 %1083 }
 0x4ed   : > { %1866 = vlog2.f32 %v1084_v39 }
 0x4f0   : > { %v1086_v40 = vpop.xlane.xlu1 %1085 }
 0x4f1   : > { %1868 = vlog2.f32 %v1086_v40 }
 0x4f2   : > { %1870 = vrcp.f32 (!%p1349_p8), %v1084_v39 }
 0x4f3   : > { %1872 = vrcp.f32 (!%p1349_p8), %v1086_v40 }
 0x4f7   : > { %v1867_v41 = vpop.eup %1866 }
 0x4f8   : > { %v1088_v42 = vmul.f32 0.6931472, %v1867_v41 }
 0x4fa   : > { %v1091_v43 = vsub.f32 %v1077_v32, %v1088_v42  ;;  %1099 = sbr.rel (%p1349_p8) target bundleno = 1494 (0x5d6), region = 76 }
 0x4fb   : > { %v1869_v44 = vpop.eup %1868 }
 0x4fc   : > { %1093 = vst [vmem:[%s2359_s12] sm:$0xff] %v1091_v43  ;;  %v1090_v45 = vmul.f32 0.6931472, %v1869_v44  ;;  %v1871_v58 = vpop.eup (!%p1349_p8), %1870 }
 0x4fd   : > { %v1102_v61 = vmul.f32 (!%p1349_p8), %v1871_v58, %v1863_v37  ;;  %v1873_v9 = vpop.eup (!%p1349_p8), %1872 }
 0x4fe   : > { %v1092_v46 = vsub.f32 %v1078_v35, %v1090_v45  ;;  %v1103_v10 = vmul.f32 (!%p1349_p8), %v1873_v9, %v1865_v38 }
 0x4ff   : > { %1457 = vmatprep.mubr.f32.mxu0 (!%p1349_p8), %v1102_v61 }
 0x500   : > { %1094 = vst [vmem:[%s2359_s12 + $0x8] sm:$0xff] %v1092_v46  ;;  %1458 = vmatmul.mubr.f32.vlgmr.msra.gmra.mrb[0].mxu0 (!%p1349_p8), %v1103_v10 }
 0x5d3   : > { %v1459_v11 = vpop.f32.mrb[0].mxu0 }
 0x5d4   : > { %1196 = vst [vmem:[#allocation5 + $0x8] sm:$0xff] %v1459_v11  ;;  %v1186_v12 = vpop.f32.mrb[1].mxu0 }
 0x5d5   : > { %1195 = vst [vmem:[#allocation5] sm:$0xff] %v1186_v12 }
 0x5d6 PF: > { %s1351_s24 = sshll.u32 %s2096_s27, 7  ;;  %s1213_s26 = sshll.u32 %s2359_s12, 4  ;;  %s2386_s26 = int_to_ptr.vmem [resolvable:$true] %s1213_s26 }
 0x5d7   : > { %s2383_s23 = scalar_lea.hbm %s2443_s7, %s1351_s24  ;;  %s2390_s14 = scalar_lea.sflag [#allocation8], %s349_s15 }
 0x5d8   : > { %s2014_s30 = scalar_lea.vmem %s2386_s26, 256  ;;  %p2473_p11 = scmp.ne.s32.totalorder %s2460_s11, 0 }
 0x5d9   : > { %p2015_p10 = scmp.ne.s32.totalorder %s2386_s26, %s2014_s30  ;;  %s2116_s27 = smov [#allocation15]  }
 0x5da   : > { %s2018_s10 = sshll.u32 %s2116_s27, 4  ;;  %s2019_s10 = int_to_ptr.vmem [resolvable:$false] %s2018_s10 }
 0x5db   : > { %p2016_p0 = pnand %p2015_p10, %p2473_p11  ;;  %s2020_s20 = scalar_lea.vmem %s2019_s10, 512 }
 0x5dc   : > { %p2021_p3 = scmp.lt.s32.totalorder %s2386_s26, %s2019_s10  ;;  %p2022_p5 = scmp.lt.s32.totalorder %s2020_s20, %s2014_s30 }
 0x5dd   : > { %p2017_p2 = pneg %p2016_p0 }
 0x5de   : > { %p2023_p6 = por %p2022_p5, %p2021_p3 }
 0x5e0   : > { %p2024_p7 = pnand %p2023_p6, %p2017_p2 }
 0x5e2   : > { %2027 = shalt.err (!%p2024_p7)
}
 0x5e3   : > { %s2028_s17 = scalar_lea.hbm %s2383_s23, 256  ;;  %s2032_s15 = scalar_lea.hbm %s2443_s7, 1024 }
 0x5e4   : > { %p2029_p9 = scmp.ne.s32.totalorder %s2383_s23, %s2028_s17  ;;  %p2033_p1 = scmp.lt.u32.totalorder %s2383_s23, %s2443_s7 }
 0x5e5   : > { %p2034_p13 = scmp.lt.u32.totalorder %s2032_s15, %s2028_s17  ;;  %p2036_p10 = scmp.lt.u32.totalorder %s2028_s17, %s2383_s23 }
 0x5e6   : > { %p2030_p12 = pnand %p2029_p9, %p2473_p11 }
 0x5e7   : > { %p2035_p8 = por %p2034_p13, %p2033_p1 }
 0x5e8   : > { %p2031_p4 = pneg %p2030_p12 }
 0x5e9   : > { %p2037_p0 = por %p2036_p10, %p2035_p8 }
 0x5eb   : > { %p2038_p2 = pnand %p2037_p0, %p2031_p4 }
 0x5ed   : > { %2041 = shalt.err (!%p2038_p2)
}
 0x5ee   : > { %s2117_s16 = smov 128   ;;  %s2118_s28 = smov 512  }
 0x5ef   : > { %s2119_s18 = smov 8  }
 0x5f0   : > { %1736 = dma.vmem_to_hbm [thread:$0]  (%p2473_p11), %s2386_s26, 256, %s2383_s23, %s2390_s14, %s2117_s16, %s2118_s28, %s2119_s18  }
 0x5f1 PF: > { %s2474_s21 = sld [smem:[#allocation20_spill]]  ;;  %s2475_s1 = sld [smem:[#allocation24_spill]] }
 0x5f2   : > { %p1768_p3 = scmp.ge.s32.totalorder %s2104_s29, 2 }
 0x5f7   : > { %s1228_s24 = sand.u32 1, %s2474_s21   ;;  %p2476_p5 = scmp.ne.s32.totalorder %s2475_s1, 0 }
 0x5f8   : > { %s1229_s13 = scalar_lea.sflag [#allocation8], %s1228_s24 }
 0x5f9   : > { %p1755_p6 = pnand %p1768_p3, %p2476_p5 }
 0x5fb   : > { %2079 = dma.done.wait (!%p1755_p6), %s1229_s13, 256  }
 0x5fc   : > { %2081 = vsyncadd (!%p1755_p6), %s1229_s13, 4294967040  ;;  %s23_s29 = sadd.s32 1, %s2104_s29   ;;  %s2477_s22 = sld [smem:[#allocation21_spill]] }
 0x5fd   : > { %p20_p7 = scmp.ge.s32.totalorder %s23_s29, 6   ;;  %s2478_s26 = sld [smem:[#allocation25_spill]] }
 0x5fe   : > { %s2479_s27 = sld [smem:[#allocation22_spill]]  ;;  %s2480_s28 = sld [smem:[#allocation23_spill]] }
 0x5ff   : > { %s2481_s24 = smov %s2088_s25  ;;  %22 = sbr.rel (!%p20_p7) target bundleno = 9 (0x9), region = 110 }
 0x602   : > { %s2482_s25 = smov %s2477_s22 }
 0x606   :  { %1234 = vsyncpa [#allocation7], 1 }
 0x607   :  { %1236 = vsyncpa [#allocation7 + $0x1], 1 }
 0x608   :  { %1237 = vsyncpa [#allocation10], 1 }
 0x609   :  { %1238 = vsyncpa [#allocation13], 1 }
 0x60a   :  { %1239 = vsyncpa [#allocation8], 1 }
 0x60b   :  { %1241 = vsyncpa [#allocation8 + $0x1], 1 }

// kernel: tpu_custom_call.1
= control target key start
LH: loop header
LB: loop body
LE: loop exit
PB: predicated region body
PF: predicated region fallthrough
CT: control target
= control target key end

     0   :  { %s2436_s0 = inlined_call_operand.hbm [shape: f32[16,128], index: 0, kind: input, shape index: {}]   ;;  %s2437_s1 = inlined_call_operand.hbm [shape: f32[128,512], index: 1, kind: input, shape index: {}]   ;;  %s2438_s2 = inlined_call_operand.hbm [shape: f32[256,512], index: 2, kind: input, shape index: {}]   ;;  %s2439_s3 = inlined_call_operand.vmem [shape: f32[1,512], index: 3, kind: input, shape index: {}]   ;;  %s2440_s4 = inlined_call_operand.hbm [shape: f32[128,128], index: 4, kind: input, shape index: {}]   ;;  %s2441_s5 = inlined_call_operand.vmem [shape: f32[1,128], index: 5, kind: input, shape index: {}]   ;;  %s2442_s6 = inlined_call_operand.hbm [shape: f32[128,128], index: 6, kind: input, shape index: {}]   ;;  %s2443_s7 = inlined_call_operand.hbm [shape: f32[16,512], index: 7, kind: output, shape index: {}]  }
   0x1   :  { %2455 = sst [smem:[#allocation26_spill]] %s2437_s1 }
   0x2   :  { %12 = vsyncpa [#allocation7], 0 }
   0x3   :  { %13 = vsyncpa [#allocation10], 0 }
   0x4   :  { %14 = vsyncpa [#allocation13], 0 }
   0x5   :  { %15 = vsyncpa [#allocation8], 0 }
   0x6   :  { %17 = vsyncpa [#allocation8 + $0x1], 0  ;;  %s2160_s24 = smov 0   ;;  %s2162_s25 = smov 0  }
   0x7   :  { %s2164_s26 = smov 0   ;;  %s2166_s27 = smov 0  }
   0x8   :  { %s2168_s28 = smov 0   ;;  %s2170_s29 = smov 0  }
   0x9 LB: > { %2456 = sst [smem:[#allocation20_spill]] %s2084_s24  ;;  %s1325_s30 = sadd.s32 4294967295, %s2104_s29   ;;  %s2104_s29 = sphi %s2170_s29, %s23_s29   ;;  %s2100_s28 = sphi %s2168_s28, %s2480_s28   ;;  %s2096_s27 = sphi %s2166_s27, %s2479_s27   ;;  %s2092_s26 = sphi %s2164_s26, %s2478_s26   ;;  %s2088_s25 = sphi %s2162_s25, %s2482_s25   ;;  %s2084_s24 = sphi %s2160_s24, %s2481_s24  }
   0xa   : > { %2457 = sst [smem:[#allocation21_spill]] %s2092_s26  ;;  %s1326_s8 = sadd.s32 4294967294, %s2104_s29  }
   0xb   : > { %2458 = sst [smem:[#allocation22_spill]] %s2100_s28  ;;  %s32_s9 = sadd.s32 1, %s2100_s28 }
   0xc   : > { %s196_s10 = sadd.s32 1, %s2092_s26  ;;  %p33_p0 = scmp.ge.s32.totalorder %s32_s9, 4 }
   0xd   : > { %p206_p1 = scmp.ne.s32.totalorder %s2092_s26, %s2088_s25  ;;  %p207_p2 = scmp.eq.s32.totalorder %s1325_s30, 3 }
   0xe   : > { %p212_p3 = scmp.ne.s32.totalorder %s2088_s25, %s2084_s24  ;;  %s2484_s9 = smov (%p33_p0, %s32_s9), 0 }
   0xf   : > { %2459 = sst [smem:[#allocation23_spill]] %s2484_s9  ;;  %p2200_p4 = por %p207_p2, %p206_p1 }
  0x10   : > { %p213_p5 = scmp.eq.s32.totalorder %s1326_s8, 3  ;;  %s192_s12 = ssub.s32 %s2100_s28, %s2484_s9 }
  0x11   : > { %s2460_s11 = scalar_select %p2200_p4, 1, 0 }
  0x12   : > { %p1327_p6 = scmp.ge.s32.totalorder %s2104_s29, 1  ;;  %p194_p7 = scmp.eq.s32.totalorder %s192_s12, 0 }
  0x13   : > { %p2207_p8 = por %p213_p5, %p212_p3  ;;  %p220_p9 = scmp.lt.s32.totalorder %s2104_s29, 5 }
  0x14   : > { %s2213_s14 = scalar_select %p194_p7, %s2092_s26, %s196_s10  }
  0x15   : > { %s2461_s13 = scalar_select %p2207_p8, 1, 0 }
  0x16   : > { %2463 = sst [smem:[#allocation25_spill]] %s2213_s14  ;;  %p2215_p10 = pnand %p1327_p6, %p220_p9 }
  0x17   : > { %2462 = sst [smem:[#allocation24_spill]] %s2461_s13  ;;  %p2219_p11 = scmp.eq.s32.totalorder %s1325_s30, 0 }
  0x18   : > { %s2464_s15 = scalar_select %p2215_p10, 1, 0 }
  0x19   : > { %s2465_s16 = scalar_select %p2219_p11, 1, 0 }
  0x1a   : > { %p1738_p12 = pneg %p2215_p10  ;;  %s2106_s17 = smov [#allocation9]  }
  0x1b   : > { %s248_s18 = sshll.u32 %s2106_s17, 4  ;;  %s2107_s20 = smov [#allocation12]   ;;  %s249_s18 = int_to_ptr.vmem [resolvable:$true] %s248_s18 }
  0x1c   : > { %p2227_p13 = pnand %p2219_p11, %p1738_p12  ;;  %s277_s21 = sshll.u32 %s2107_s20, 4  ;;  %s278_s21 = int_to_ptr.vmem [resolvable:$true] %s277_s21 }
  0x1d   : > { %s2467_s1 = sld [smem:[#allocation26_spill]] }
  0x1e   : > { %p2239_p1 = pneg %p2227_p13 }
  0x23   : > { %s1874_s30 = scalar_lea.hbm %s2467_s1, 8192 }
  0x24   : > { %p1875_p0 = scmp.ne.s32.totalorder %s2467_s1, %s1874_s30  ;;  %p1881_p5 = scmp.lt.u32.totalorder %s1874_s30, %s2467_s1 }
  0x26   : > { %p1877_p2 = pnand %p2239_p1, %p1875_p0 }
  0x28   : > { %p1878_p3 = pneg %p1877_p2 }
  0x2a   : > { %p1883_p6 = pnand %p1881_p5, %p1878_p3 }
  0x2c   : > { %1886 = shalt.err (!%p1883_p6)
}
  0x2d   : > { %s1887_s20 = scalar_lea.vmem %s249_s18, 8192  ;;  %p1895_p8 = scmp.lt.s32.totalorder %s249_s18, %s249_s18 }
  0x2e   : > { %p1888_p7 = scmp.ne.s32.totalorder %s249_s18, %s1887_s20  ;;  %p1896_p4 = scmp.lt.s32.totalorder %s1887_s20, %s1887_s20 }
  0x30   : > { %p1890_p9 = pnand %p1888_p7, %p2239_p1  ;;  %p1897_p11 = por %p1896_p4, %p1895_p8 }
  0x32   : > { %p1891_p12 = pneg %p1890_p9 }
  0x34   : > { %p1898_p10 = pnand %p1897_p11, %p1891_p12 }
  0x36   : > { %1901 = shalt.err (!%p1898_p10)
}
  0x37   : > { %s2451_s22 = smov 512   ;;  %s2452_s23 = smov 32  }
  0x38   : > { %1744 = dma.hbm_to_vmem [thread:$0]  (!%p2227_p13), %s2467_s1, 8192, %s249_s18, [#allocation10], %s2451_s22, %s2451_s22, %s2452_s23  }
  0x39   : > { %s1902_s17 = scalar_lea.hbm %s2440_s4, 2048 }
  0x3a   : > { %p1903_p4 = scmp.ne.s32.totalorder %s2440_s4, %s1902_s17  ;;  %p1909_p11 = scmp.lt.u32.totalorder %s1902_s17, %s2440_s4 }
  0x3c   : > { %p1905_p8 = pnand %p1903_p4, %p2239_p1 }
  0x3e   : > { %p1906_p10 = pneg %p1905_p8 }
  0x40   : > { %p1911_p0 = pnand %p1909_p11, %p1906_p10 }
  0x42   : > { %1914 = shalt.err (!%p1911_p0)
}
  0x43   : > { %s1915_s9 = scalar_lea.vmem %s278_s21, 2048  ;;  %p1923_p6 = scmp.lt.s32.totalorder %s278_s21, %s278_s21 }
  0x44   : > { %p1916_p2 = scmp.ne.s32.totalorder %s278_s21, %s1915_s9  ;;  %p1924_p7 = scmp.lt.s32.totalorder %s1915_s9, %s1915_s9 }
  0x46   : > { %p1918_p3 = pnand %p1916_p2, %p2239_p1  ;;  %p1925_p9 = por %p1924_p7, %p1923_p6 }
  0x48   : > { %p1919_p5 = pneg %p1918_p3 }
  0x4a   : > { %p1926_p12 = pnand %p1925_p9, %p1919_p5 }
  0x4c   : > { %1929 = shalt.err (!%p1926_p12)
}
  0x4d   : > { %s2110_s28 = smov 128   ;;  %s2111_s18 = smov 8  }
  0x4e   : > { %1750 = dma.hbm_to_vmem [thread:$0]  (!%p2227_p13), %s2440_s4, 2048, %s278_s21, [#allocation13], %s2110_s28, %s2110_s28, %s2111_s18  }
  0x4f   : > { %s2112_s30 = smov [#allocation6]   ;;  %s2113_s10 = smov [#allocation11]  }
  0x50   : > { %s235_s8 = sshll.u32 %s2112_s30, 4  ;;  %s261_s17 = sshll.u32 %s2113_s10, 4  ;;  %s236_s8 = int_to_ptr.vmem [resolvable:$true] %s235_s8  ;;  %s262_s17 = int_to_ptr.vmem [resolvable:$true] %s261_s17 }
  0x51   : > { %s1930_s22 = scalar_lea.hbm %s2436_s0, 256 }
  0x52   : > { %p1931_p4 = scmp.ne.s32.totalorder %s2436_s0, %s1930_s22  ;;  %p1937_p11 = scmp.lt.u32.totalorder %s1930_s22, %s2436_s0 }
  0x54   : > { %p1933_p8 = pnand %p1931_p4, %p2239_p1 }
  0x56   : > { %p1934_p10 = pneg %p1933_p8 }
  0x58   : > { %p1939_p0 = pnand %p1937_p11, %p1934_p10 }
  0x5a   : > { %1942 = shalt.err (!%p1939_p0)
}
  0x5b   : > { %s1943_s21 = scalar_lea.vmem %s236_s8, 256  ;;  %p1951_p6 = scmp.lt.s32.totalorder %s236_s8, %s236_s8 }
  0x5c   : > { %p1944_p2 = scmp.ne.s32.totalorder %s236_s8, %s1943_s21  ;;  %p1952_p7 = scmp.lt.s32.totalorder %s1943_s21, %s1943_s21 }
  0x5e   : > { %p1946_p3 = pnand %p1944_p2, %p2239_p1  ;;  %p1953_p9 = por %p1952_p7, %p1951_p6 }
  0x60   : > { %p1947_p5 = pneg %p1946_p3 }
  0x62   : > { %p1954_p12 = pnand %p1953_p9, %p1947_p5 }
  0x64   : > { %1957 = shalt.err (!%p1954_p12)
}
  0x65   : > { %1741 = dma.hbm_to_vmem [thread:$0]  (!%p2227_p13), %s2436_s0, 256, %s236_s8, [#allocation7], %s2110_s28, %s2110_s28, %s2111_s18  }
  0x66   : > { %s1958_s23 = scalar_lea.hbm %s2438_s2, 16384 }
  0x67   : > { %p1959_p4 = scmp.ne.s32.totalorder %s2438_s2, %s1958_s23  ;;  %p1965_p11 = scmp.lt.u32.totalorder %s1958_s23, %s2438_s2 }
  0x69   : > { %p1961_p8 = pnand %p1959_p4, %p2239_p1 }
  0x6b   : > { %p1962_p10 = pneg %p1961_p8 }
  0x6d   : > { %p1967_p0 = pnand %p1965_p11, %p1962_p10 }
  0x6f   : > { %1970 = shalt.err (!%p1967_p0)
}
  0x70   : > { %s1971_s20 = scalar_lea.vmem %s262_s17, 16384  ;;  %p1979_p6 = scmp.lt.s32.totalorder %s262_s17, %s262_s17 }
  0x71   : > { %p1972_p2 = scmp.ne.s32.totalorder %s262_s17, %s1971_s20  ;;  %p1980_p7 = scmp.lt.s32.totalorder %s1971_s20, %s1971_s20 }
  0x73   : > { %p1974_p3 = pnand %p1972_p2, %p2239_p1  ;;  %p1981_p9 = por %p1980_p7, %p1979_p6 }
  0x75   : > { %p1975_p5 = pneg %p1974_p3 }
  0x77   : > { %p1982_p12 = pnand %p1981_p9, %p1975_p5 }
  0x79   : > { %1985 = shalt.err (!%p1982_p12)
}
  0x7a   : > { %s2469_s8 = smov 32   ;;  %s2470_s9 = smov 512  }
  0x7b   : > { %1747 = dma.hbm_to_vmem [thread:$0]  (!%p2227_p13), %s2438_s2, 16384, %s262_s17, [#allocation10], %s2470_s9, %s2470_s9, %s2469_s8  }
  0x7c   : > { %s2114_s24 = smov [#allocation14]   ;;  %s1986_s26 = scalar_lea.hbm %s2442_s6, 2048 }
  0x7d   : > { %s293_s13 = sshll.u32 %s2114_s24, 4  ;;  %p1987_p4 = scmp.ne.s32.totalorder %s2442_s6, %s1986_s26  ;;  %s294_s13 = int_to_ptr.vmem [resolvable:$true] %s293_s13 }
  0x7e   : > { %p1993_p11 = scmp.lt.u32.totalorder %s1986_s26, %s2442_s6 }
  0x7f   : > { %p1989_p8 = pnand %p1987_p4, %p2239_p1 }
  0x81   : > { %p1990_p10 = pneg %p1989_p8 }
  0x83   : > { %p1995_p0 = pnand %p1993_p11, %p1990_p10 }
  0x85   : > { %1998 = shalt.err (!%p1995_p0)
}
  0x86   : > { %s1999_s17 = scalar_lea.vmem %s294_s13, 2048  ;;  %p2007_p6 = scmp.lt.s32.totalorder %s294_s13, %s294_s13 }
  0x87   : > { %p2000_p2 = scmp.ne.s32.totalorder %s294_s13, %s1999_s17  ;;  %p2008_p7 = scmp.lt.s32.totalorder %s1999_s17, %s1999_s17 }
  0x89   : > { %p2002_p3 = pnand %p2000_p2, %p2239_p1  ;;  %p2009_p9 = por %p2008_p7, %p2007_p6 }
  0x8b   : > { %p2003_p5 = pneg %p2002_p3 }
  0x8d   : > { %p2010_p12 = pnand %p2009_p9, %p2003_p5 }
  0x8f   : > { %2013 = shalt.err (!%p2010_p12)
}
  0x90   : > { %1753 = dma.hbm_to_vmem [thread:$0]  (!%p2227_p13), %s2442_s6, 2048, %s294_s13, [#allocation13], %s2110_s28, %s2110_s28, %s2111_s18  }
  0x91   : > { %p2471_p4 = scmp.ne.s32.totalorder %s2464_s15, 0 }
  0x92   : > { %p2472_p1 = scmp.ne.s32.totalorder (!%p2471_p4), %s2465_s16, 0 }
  0x93   : > { %309 = sbr.rel (%p2471_p4) target bundleno = 1521 (0x5f1), region = 48 }
  0x9a   : > { %2067 = dma.done.wait (%p2472_p1), [#allocation7], 256  }
  0x9b   : > { %2069 = vsyncadd (%p2472_p1), [#allocation7], 4294967040 }
  0x9c   : > { %2071 = dma.done.wait (%p2472_p1), [#allocation10], 24576  }
  0x9d   : > { %2073 = vsyncadd (%p2472_p1), [#allocation10], 4294942720 }
  0x9e   : > { %2075 = dma.done.wait (%p2472_p1), [#allocation13], 4096  }
  0x9f   : > { %2077 = vsyncadd (%p2472_p1), [#allocation13], 4294963200  ;;  %s349_s15 = sand.u32 1, %s2088_s25   ;;  %p1340_p13 = scmp.ne.s32.totalorder %s2096_s27, 0 }
  0xa0   : > { %s1339_s19 = sshll.u32 %s349_s15, 4  ;;  %v361_v0 = vld [vmem:[#allocation9 + $0x8] sm:$0xff] (!%p1340_p13)  ;;  %v363_v2 = vld [vmem:[#allocation9 + $0x18] sm:$0xff] (!%p1340_p13)  ;;  %v360_v5 = vld [vmem:[#allocation9] sm:$0xff] (!%p1340_p13)  ;;  %v2115_v7 = vmov (!%p1340_p13), 0.0  }
  0xa1   : > { %s2359_s12 = scalar_lea.vmem [#allocation15], %s1339_s19  ;;  %357 = sbr.rel (%p1340_p13) target bundleno = 417 (0x1a1), region = 72  ;;  %v365_v1 = vld [vmem:[#allocation9 + $0x28] sm:$0xff] (!%p1340_p13)  ;;  %v367_v4 = vld [vmem:[#allocation9 + $0x38] sm:$0xff] (!%p1340_p13)  ;;  %v364_v6 = vld [vmem:[#allocation9 + $0x20] sm:$0xff] (!%p1340_p13)  ;;  %510 = vmatprep.mubr.f32.mxu0 (!%p1340_p13), %v2115_v7  ;;  %608 = vst [vmem:[#allocation3] sm:$0xff] (!%p1340_p13), %v2115_v7  ;;  %587 = vmatprep.mubr.f32.mxu1 (!%p1340_p13), %v2115_v7 }
  0xa2   : > { %v1460_v3 = vpack.c.bf16 (!%p1340_p13), %v365_v1, %v361_v0  ;;  %609 = vst [vmem:[#allocation3 + $0x8] sm:$0xff] (!%p1340_p13), %v2115_v7  ;;  %610 = vst [vmem:[#allocation4] sm:$0xff] (!%p1340_p13), %v2115_v7  ;;  %v1492_v8 = vpack.c.bf16 (!%p1340_p13), %v367_v4, %v363_v2  ;;  %v1462_v9 = vpack.c.bf16 (!%p1340_p13), %v364_v6, %v360_v5  ;;  %v362_v10 = vld [vmem:[#allocation9 + $0x10] sm:$0xff] (!%p1340_p13)  ;;  %v369_v12 = vld [vmem:[#allocation9 + $0x48] sm:$0xff] (!%p1340_p13) }
  0xa3   : > { %611 = vst [vmem:[#allocation4 + $0x8] sm:$0xff] (!%p1340_p13), %v2115_v7  ;;  %v366_v11 = vld [vmem:[#allocation9 + $0x30] sm:$0xff] (!%p1340_p13)  ;;  %v373_v14 = vld [vmem:[#allocation9 + $0x68] sm:$0xff] (!%p1340_p13)  ;;  %v371_v15 = vld [vmem:[#allocation9 + $0x58] sm:$0xff] (!%p1340_p13) }
  0xa4   : > { %1461 = vmatprep.subr.bf16.mxu0 (!%p1340_p13), %v1460_v3  ;;  %v1494_v13 = vpack.c.bf16 (!%p1340_p13), %v366_v11, %v362_v10  ;;  %v375_v16 = vld [vmem:[#allocation9 + $0x78] sm:$0xff] (!%p1340_p13)  ;;  %1493 = vmatprep.subr.bf16.mxu1 (!%p1340_p13), %v1492_v8  ;;  %v1464_v17 = vpack.c.bf16 (!%p1340_p13), %v373_v14, %v369_v12  ;;  %v368_v19 = vld [vmem:[#allocation9 + $0x40] sm:$0xff] (!%p1340_p13)  ;;  %v370_v21 = vld [vmem:[#allocation9 + $0x50] sm:$0xff] (!%p1340_p13) }
  0xa5   : > { %1463 = vmatpush1.bf16.msra.mxu0 (!%p1340_p13), %v1462_v9  ;;  %v1496_v18 = vpack.c.bf16 (!%p1340_p13), %v375_v16, %v371_v15  ;;  %v372_v20 = vld [vmem:[#allocation9 + $0x60] sm:$0xff] (!%p1340_p13)  ;;  %v374_v23 = vld [vmem:[#allocation9 + $0x70] sm:$0xff] (!%p1340_p13)  ;;  %v377_v24 = vld [vmem:[#allocation9 + $0x88] sm:$0xff] (!%p1340_p13) }
  0xa6   : > { %1495 = vmatpush1.bf16.msra.mxu1 (!%p1340_p13), %v1494_v13  ;;  %v1466_v22 = vpack.c.bf16 (!%p1340_p13), %v372_v20, %v368_v19  ;;  %v381_v25 = vld [vmem:[#allocation9 + $0xa8] sm:$0xff] (!%p1340_p13)  ;;  %1465 = vmatprep.subr.bf16.mxu0 (!%p1340_p13), %v1464_v17  ;;  %v1498_v26 = vpack.c.bf16 (!%p1340_p13), %v374_v23, %v370_v21  ;;  %v379_v28 = vld [vmem:[#allocation9 + $0x98] sm:$0xff] (!%p1340_p13)  ;;  %v376_v30 = vld [vmem:[#allocation9 + $0x80] sm:$0xff] (!%p1340_p13) }
  0xa7   : > { %1497 = vmatprep.subr.bf16.mxu1 (!%p1340_p13), %v1496_v18  ;;  %v1468_v27 = vpack.c.bf16 (!%p1340_p13), %v381_v25, %v377_v24  ;;  %v383_v29 = vld [vmem:[#allocation9 + $0xb8] sm:$0xff] (!%p1340_p13)  ;;  %v380_v32 = vld [vmem:[#allocation9 + $0xa0] sm:$0xff] (!%p1340_p13)  ;;  %v378_v33 = vld [vmem:[#allocation9 + $0x90] sm:$0xff] (!%p1340_p13) }
  0xa8   : > { %v1500_v31 = vpack.c.bf16 %v383_v29, %v379_v28  ;;  %v382_v34 = vld [vmem:[#allocation9 + $0xb0] sm:$0xff]  ;;  %v1470_v35 = vpack.c.bf16 %v380_v32, %v376_v30  ;;  %v385_v36 = vld [vmem:[#allocation9 + $0xc8] sm:$0xff]  ;;  %v387_v38 = vld [vmem:[#allocation9 + $0xd8] sm:$0xff] }
  0xa9   : > { %1467 = vmatpush1.bf16.msra.mxu0 %v1466_v22  ;;  %v389_v37 = vld [vmem:[#allocation9 + $0xe8] sm:$0xff]  ;;  %v1502_v39 = vpack.c.bf16 %v382_v34, %v378_v33  ;;  %v391_v41 = vld [vmem:[#allocation9 + $0xf8] sm:$0xff]  ;;  %v384_v42 = vld [vmem:[#allocation9 + $0xc0] sm:$0xff] }
  0xaa   : > { %1499 = vmatpush1.bf16.msra.mxu1 %v1498_v26  ;;  %1469 = vmatprep.subr.bf16.mxu0 %v1468_v27  ;;  %v1472_v40 = vpack.c.bf16 %v389_v37, %v385_v36  ;;  %v388_v43 = vld [vmem:[#allocation9 + $0xe0] sm:$0xff]  ;;  %v1504_v44 = vpack.c.bf16 %v391_v41, %v387_v38  ;;  %v386_v45 = vld [vmem:[#allocation9 + $0xd0] sm:$0xff]  ;;  %v393_v47 = vld [vmem:[#allocation9 + $0x108] sm:$0xff]  ;;  %v426_v37 = vlaneseq }
  0xab   : > { %1501 = vmatprep.subr.bf16.mxu1 %v1500_v31  ;;  %v390_v46 = vld [vmem:[#allocation9 + $0xf0] sm:$0xff]  ;;  %v397_v48 = vld [vmem:[#allocation9 + $0x128] sm:$0xff]  ;;  %v395_v49 = vld [vmem:[#allocation9 + $0x118] sm:$0xff]  ;;  %v1474_v51 = vpack.c.bf16 %v388_v43, %v384_v42 }
  0xac   : > { %v399_v50 = vld [vmem:[#allocation9 + $0x138] sm:$0xff]  ;;  %v1506_v52 = vpack.c.bf16 %v390_v46, %v386_v45  ;;  %v1476_v53 = vpack.c.bf16 %v397_v48, %v393_v47  ;;  %v392_v54 = vld [vmem:[#allocation9 + $0x100] sm:$0xff]  ;;  %v394_v56 = vld [vmem:[#allocation9 + $0x110] sm:$0xff]  ;;  %v427_v38 = vshrl.u32 %v426_v37, 7 }
  0xad   : > { %1471 = vmatpush1.bf16.msra.mxu0 %v1470_v35  ;;  %v396_v55 = vld [vmem:[#allocation9 + $0x120] sm:$0xff]  ;;  %v1508_v57 = vpack.c.bf16 %v399_v50, %v395_v49  ;;  %v398_v58 = vld [vmem:[#allocation9 + $0x130] sm:$0xff]  ;;  %v401_v59 = vld [vmem:[#allocation9 + $0x148] sm:$0xff] }
  0xae   : > { %1503 = vmatpush1.bf16.msra.mxu1 %v1502_v39  ;;  %1473 = vmatprep.subr.bf16.mxu0 %v1472_v40  ;;  %v405_v60 = vld [vmem:[#allocation9 + $0x168] sm:$0xff]  ;;  %v403_v61 = vld [vmem:[#allocation9 + $0x158] sm:$0xff]  ;;  %v1478_v63 = vpack.c.bf16 %v396_v55, %v392_v54  ;;  %v1510_v0 = vpack.c.bf16 %v398_v58, %v394_v56  ;;  %v400_v2 = vld [vmem:[#allocation9 + $0x140] sm:$0xff]  ;;  %v428_v39 = vsub.s32 0, %v427_v38  ;;  %v436_v41 = vsub.s32 2, %v427_v38 }
  0xaf   : > { %1505 = vmatprep.subr.bf16.mxu1 %v1504_v44  ;;  %v407_v62 = vld [vmem:[#allocation9 + $0x178] sm:$0xff]  ;;  %v1480_v1 = vpack.c.bf16 %v405_v60, %v401_v59  ;;  %v404_v3 = vld [vmem:[#allocation9 + $0x160] sm:$0xff]  ;;  %v402_v4 = vld [vmem:[#allocation9 + $0x150] sm:$0xff]  ;;  %v432_v42 = vsub.s32 1, %v427_v38  ;;  %v440_v43 = vsub.s32 3, %v427_v38 }
  0xb0   : > { %v1512_v5 = vpack.c.bf16 %v407_v62, %v403_v61  ;;  %v406_v6 = vld [vmem:[#allocation9 + $0x170] sm:$0xff]  ;;  %v409_v8 = vld [vmem:[#allocation9 + $0x188] sm:$0xff]  ;;  %v411_v10 = vld [vmem:[#allocation9 + $0x198] sm:$0xff]  ;;  %v1482_v12 = vpack.c.bf16 %v404_v3, %v400_v2 }
  0xb1   : > { %1475 = vmatpush1.bf16.msra.mxu0 %v1474_v51  ;;  %v413_v9 = vld [vmem:[#allocation9 + $0x1a8] sm:$0xff]  ;;  %v415_v11 = vld [vmem:[#allocation9 + $0x1b8] sm:$0xff]  ;;  %v1514_v13 = vpack.c.bf16 %v406_v6, %v402_v4  ;;  %v408_v15 = vld [vmem:[#allocation9 + $0x180] sm:$0xff] }
  0xb2   : > { %1507 = vmatpush1.bf16.msra.mxu1 %v1506_v52  ;;  %1477 = vmatprep.subr.bf16.mxu0 %v1476_v53  ;;  %v1484_v14 = vpack.c.bf16 %v413_v9, %v409_v8  ;;  %v412_v16 = vld [vmem:[#allocation9 + $0x1a0] sm:$0xff]  ;;  %v410_v17 = vld [vmem:[#allocation9 + $0x190] sm:$0xff]  ;;  %v1516_v18 = vpack.c.bf16 %v415_v11, %v411_v10  ;;  %v417_v20 = vld [vmem:[#allocation9 + $0x1c8] sm:$0xff] }
  0xb3   : > { %1509 = vmatprep.subr.bf16.mxu1 %v1508_v57  ;;  %v414_v19 = vld [vmem:[#allocation9 + $0x1b0] sm:$0xff]  ;;  %v421_v21 = vld [vmem:[#allocation9 + $0x1e8] sm:$0xff]  ;;  %v419_v22 = vld [vmem:[#allocation9 + $0x1d8] sm:$0xff]  ;;  %v1486_v24 = vpack.c.bf16 %v412_v16, %v408_v15 }
  0xb4   : > { %v423_v23 = vld [vmem:[#allocation9 + $0x1f8] sm:$0xff]  ;;  %v1518_v25 = vpack.c.bf16 %v414_v19, %v410_v17  ;;  %v1488_v26 = vpack.c.bf16 %v421_v21, %v417_v20  ;;  %v416_v27 = vld [vmem:[#allocation9 + $0x1c0] sm:$0xff]  ;;  %v418_v30 = vld [vmem:[#allocation9 + $0x1d0] sm:$0xff] }
  0xb5   : > { %1479 = vmatpush1.bf16.msra.mxu0 %v1478_v63  ;;  %v420_v28 = vld [vmem:[#allocation9 + $0x1e0] sm:$0xff]  ;;  %v1520_v29 = vpack.c.bf16 %v423_v23, %v419_v22  ;;  %v422_v31 = vld [vmem:[#allocation9 + $0x1f0] sm:$0xff]  ;;  %v359_v35 = vld [vmem:[#allocation6 + $0x8] sm:$0xff] }
  0xb6   : > { %1511 = vmatpush1.bf16.msra.mxu1 %v1510_v0  ;;  %1481 = vmatprep.subr.bf16.mxu0 %v1480_v1  ;;  %v1490_v32 = vpack.c.bf16 %v420_v28, %v416_v27  ;;  %v1522_v33 = vpack.c.bf16 %v422_v31, %v418_v30  ;;  %v358_v34 = vld [vmem:[#allocation6] sm:$0xff]  ;;  %v1341_v36 = vld [vmem:[#allocation14 + $0x1] ss:$0 sm:$0xff] }
  0xb7   : > { %1513 = vmatprep.subr.bf16.mxu1 %v1512_v5  ;;  %617 = vst [vmem:[#allocation5] sm:$0xff] %v1341_v36  ;;  %618 = vst [vmem:[#allocation5 + $0x8] sm:$0xff] %v1341_v36  ;;  %v424_v40 = vld [vmem:[%s2439_s3] sm:$0xf] }
  0xb8   : > { %v429_v44 = vrot.slane %v424_v40, %v428_v39  ;;  %v437_v45 = vrot.slane %v424_v40, %v436_v41  ;;  %v433_v46 = vrot.slane %v424_v40, %v432_v42  ;;  %v441_v47 = vrot.slane %v424_v40, %v440_v43 }
  0xb9   : > { %1483 = vmatpush1.bf16.msra.mxu0 %v1482_v12 }
  0xba   : > { %1515 = vmatpush1.bf16.msra.mxu1 %v1514_v13  ;;  %1485 = vmatprep.subr.bf16.mxu0 %v1484_v14 }
  0xbb   : > { %1517 = vmatprep.subr.bf16.mxu1 %v1516_v18 }
  0xbd   : > { %1487 = vmatpush1.bf16.msra.mxu0 %v1486_v24 }
  0xbe   : > { %1519 = vmatpush1.bf16.msra.mxu1 %v1518_v25  ;;  %1489 = vmatprep.subr.bf16.mxu0 %v1488_v26 }
  0xbf   : > { %1521 = vmatprep.subr.bf16.mxu1 %v1520_v29 }
  0xc1   : > { %1491 = vmatpush1.bf16.msra.mxu0 %v1490_v32 }
  0xc2   : > { %1523 = vmatpush1.bf16.msra.mxu1 %v1522_v33 }
  0xc4   : > { %511 = vmatmul.mubr.f32.vlgmr.msra.gmra.mrb[0].mxu0 %v358_v34 }
  0xc5   : > { %588 = vmatmul.mubr.f32.vlgmr.msra.gmra.mrb[0].mxu1 %v358_v34  ;;  %516 = vmatprep.mubr.f32.mxu0 %v2115_v7 }
  0xc6   : > { %593 = vmatprep.mubr.f32.mxu1 %v2115_v7 }
  0xc8   : > { %517 = vmatmul.mubr.f32.gmra.mrb[2].mxu0 %v359_v35 }
  0xc9   : > { %594 = vmatmul.mubr.f32.gmra.mrb[2].mxu1 %v359_v35 }
 0x197   : > { %v512_v7 = vpop.f32.mrb[0].mxu0 }
 0x198   : > { %v513_v48 = vadd.f32 %v512_v7, %v429_v44  ;;  %v589_v49 = vpop.f32.mrb[0].mxu1  ;;  %v514_v50 = vpop.f32.mrb[1].mxu0 }
 0x199   : > { %v590_v51 = vadd.f32 %v589_v49, %v437_v45  ;;  %v515_v52 = vadd.f32 %v514_v50, %v433_v46  ;;  %v591_v53 = vpop.f32.mrb[1].mxu1 }
 0x19a   : > { %600 = vst [vmem:[#allocation2] sm:$0xff] %v513_v48  ;;  %v592_v54 = vadd.f32 %v591_v53, %v441_v47 }
 0x19b   : > { %602 = vst [vmem:[#allocation2 + $0x10] sm:$0xff] %v590_v51  ;;  %601 = vst [vmem:[#allocation2 + $0x8] sm:$0xff] %v515_v52  ;;  %v518_v55 = vpop.f32.mrb[2].mxu0 }
 0x19c   : > { %603 = vst [vmem:[#allocation2 + $0x18] sm:$0xff] %v592_v54  ;;  %v519_v56 = vadd.f32 %v518_v55, %v429_v44  ;;  %v595_v57 = vpop.f32.mrb[2].mxu1  ;;  %v520_v58 = vpop.f32.mrb[3].mxu0 }
 0x19d   : > { %v596_v59 = vadd.f32 %v595_v57, %v437_v45  ;;  %v521_v60 = vadd.f32 %v520_v58, %v433_v46  ;;  %v597_v61 = vpop.f32.mrb[3].mxu1 }
 0x19e   : > { %604 = vst [vmem:[#allocation2 + $0x20] sm:$0xff] %v519_v56  ;;  %v598_v62 = vadd.f32 %v597_v61, %v441_v47 }
 0x19f   : > { %606 = vst [vmem:[#allocation2 + $0x30] sm:$0xff] %v596_v59  ;;  %605 = vst [vmem:[#allocation2 + $0x28] sm:$0xff] %v521_v60 }
 0x1a0   : > { %607 = vst [vmem:[#allocation2 + $0x38] sm:$0xff] %v598_v62 }
 0x1a1 PF: > { %v634_v63 = vld [vmem:[#allocation11 + $0x8] sm:$0xff]  ;;  %v633_v1 = vld [vmem:[#allocation11] sm:$0xff]  ;;  %v636_v18 = vld [vmem:[#allocation11 + $0x18] sm:$0xff]  ;;  %s1095_s1 = sadd.s32 1, %s2096_s27 }
 0x1a2   : > { %v638_v0 = vld [vmem:[#allocation11 + $0x28] sm:$0xff]  ;;  %v637_v3 = vld [vmem:[#allocation11 + $0x20] sm:$0xff]  ;;  %v640_v19 = vld [vmem:[#allocation11 + $0x38] sm:$0xff]  ;;  %p1349_p8 = scmp.ge.s32.totalorder %s1095_s1, 4 }
 0x1a3   : > { %v1524_v2 = vpack.c.bf16 %v638_v0, %v634_v63  ;;  %v642_v4 = vld [vmem:[#allocation11 + $0x48] sm:$0xff]  ;;  %v1526_v6 = vpack.c.bf16 %v637_v3, %v633_v1  ;;  %v641_v9 = vld [vmem:[#allocation11 + $0x40] sm:$0xff]  ;;  %v1588_v21 = vpack.c.bf16 %v640_v19, %v636_v18  ;;  %v635_v22 = vld [vmem:[#allocation11 + $0x10] sm:$0xff] }
 0x1a4   : > { %v646_v5 = vld [vmem:[#allocation11 + $0x68] sm:$0xff]  ;;  %v645_v10 = vld [vmem:[#allocation11 + $0x60] sm:$0xff]  ;;  %v639_v23 = vld [vmem:[#allocation11 + $0x30] sm:$0xff] }
 0x1a5   : > { %v1528_v8 = vpack.c.bf16 %v646_v5, %v642_v4  ;;  %v650_v11 = vld [vmem:[#allocation11 + $0x88] sm:$0xff]  ;;  %1525 = vmatprep.subr.bf16.mxu0 %v1524_v2  ;;  %v1530_v13 = vpack.c.bf16 %v645_v10, %v641_v9  ;;  %v649_v14 = vld [vmem:[#allocation11 + $0x80] sm:$0xff]  ;;  %v1590_v24 = vpack.c.bf16 %v639_v23, %v635_v22  ;;  %1589 = vmatprep.subr.bf16.mxu1 %v1588_v21  ;;  %v644_v26 = vld [vmem:[#allocation11 + $0x58] sm:$0xff] }
 0x1a6   : > { %v654_v12 = vld [vmem:[#allocation11 + $0xa8] sm:$0xff]  ;;  %1527 = vmatpush1.bf16.msra.mxu0 %v1526_v6  ;;  %v653_v15 = vld [vmem:[#allocation11 + $0xa0] sm:$0xff]  ;;  %v648_v27 = vld [vmem:[#allocation11 + $0x78] sm:$0xff] }
 0x1a7   : > { %1529 = vmatprep.subr.bf16.mxu0 %v1528_v8  ;;  %v1532_v16 = vpack.c.bf16 %v654_v12, %v650_v11  ;;  %v658_v17 = vld [vmem:[#allocation11 + $0xc8] sm:$0xff]  ;;  %v1534_v25 = vpack.c.bf16 %v653_v15, %v649_v14  ;;  %v643_v28 = vld [vmem:[#allocation11 + $0x50] sm:$0xff]  ;;  %v657_v30 = vld [vmem:[#allocation11 + $0xc0] sm:$0xff]  ;;  %1591 = vmatpush1.bf16.msra.mxu1 %v1590_v24  ;;  %v1592_v32 = vpack.c.bf16 %v648_v27, %v644_v26 }
 0x1a8   : > { %v662_v20 = vld [vmem:[#allocation11 + $0xe8] sm:$0xff]  ;;  %v661_v31 = vld [vmem:[#allocation11 + $0xe0] sm:$0xff]  ;;  %v647_v33 = vld [vmem:[#allocation11 + $0x70] sm:$0xff] }
 0x1a9   : > { %v1536_v29 = vpack.c.bf16 %v662_v20, %v658_v17  ;;  %v666_v34 = vld [vmem:[#allocation11 + $0x108] sm:$0xff]  ;;  %v1594_v36 = vpack.c.bf16 %v647_v33, %v643_v28  ;;  %v652_v37 = vld [vmem:[#allocation11 + $0x98] sm:$0xff]  ;;  %1593 = vmatprep.subr.bf16.mxu1 %v1592_v32  ;;  %v651_v39 = vld [vmem:[#allocation11 + $0x90] sm:$0xff]  ;;  %v1538_v41 = vpack.c.bf16 %v661_v31, %v657_v30 }
 0x1aa   : > { %1531 = vmatpush1.bf16.msra.mxu0 %v1530_v13  ;;  %v670_v35 = vld [vmem:[#allocation11 + $0x128] sm:$0xff]  ;;  %v656_v38 = vld [vmem:[#allocation11 + $0xb8] sm:$0xff]  ;;  %v655_v40 = vld [vmem:[#allocation11 + $0xb0] sm:$0xff] }
 0x1ab   : > { %1533 = vmatprep.subr.bf16.mxu0 %v1532_v16  ;;  %v665_v42 = vld [vmem:[#allocation11 + $0x100] sm:$0xff]  ;;  %v1596_v44 = vpack.c.bf16 %v656_v38, %v652_v37  ;;  %v1540_v45 = vpack.c.bf16 %v670_v35, %v666_v34  ;;  %1595 = vmatpush1.bf16.msra.mxu1 %v1594_v36  ;;  %v674_v46 = vld [vmem:[#allocation11 + $0x148] sm:$0xff]  ;;  %v1598_v47 = vpack.c.bf16 %v655_v40, %v651_v39  ;;  %v660_v7 = vld [vmem:[#allocation11 + $0xd8] sm:$0xff] }
 0x1ac   : > { %v669_v43 = vld [vmem:[#allocation11 + $0x120] sm:$0xff]  ;;  %v664_v48 = vld [vmem:[#allocation11 + $0xf8] sm:$0xff]  ;;  %v678_v49 = vld [vmem:[#allocation11 + $0x168] sm:$0xff] }
 0x1ad   : > { %1597 = vmatprep.subr.bf16.mxu1 %v1596_v44  ;;  %v1600_v50 = vpack.c.bf16 %v664_v48, %v660_v7  ;;  %v659_v51 = vld [vmem:[#allocation11 + $0xd0] sm:$0xff]  ;;  %v1542_v53 = vpack.c.bf16 %v669_v43, %v665_v42  ;;  %v668_v54 = vld [vmem:[#allocation11 + $0x118] sm:$0xff]  ;;  %v1544_v56 = vpack.c.bf16 %v678_v49, %v674_v46  ;;  %v673_v57 = vld [vmem:[#allocation11 + $0x140] sm:$0xff] }
 0x1ae   : > { %1535 = vmatpush1.bf16.msra.mxu0 %v1534_v25  ;;  %v663_v52 = vld [vmem:[#allocation11 + $0xf0] sm:$0xff]  ;;  %v672_v55 = vld [vmem:[#allocation11 + $0x138] sm:$0xff]  ;;  %v677_v58 = vld [vmem:[#allocation11 + $0x160] sm:$0xff] }
 0x1af   : > { %1537 = vmatprep.subr.bf16.mxu0 %v1536_v29  ;;  %1599 = vmatpush1.bf16.msra.mxu1 %v1598_v47  ;;  %v682_v59 = vld [vmem:[#allocation11 + $0x188] sm:$0xff]  ;;  %v1602_v60 = vpack.c.bf16 %v663_v52, %v659_v51  ;;  %v1604_v62 = vpack.c.bf16 %v672_v55, %v668_v54  ;;  %v667_v63 = vld [vmem:[#allocation11 + $0x110] sm:$0xff]  ;;  %v676_v1 = vld [vmem:[#allocation11 + $0x158] sm:$0xff]  ;;  %v1546_v3 = vpack.c.bf16 %v677_v58, %v673_v57 }
 0x1b0   : > { %v686_v61 = vld [vmem:[#allocation11 + $0x1a8] sm:$0xff]  ;;  %1601 = vmatprep.subr.bf16.mxu1 %v1600_v50  ;;  %v671_v0 = vld [vmem:[#allocation11 + $0x130] sm:$0xff]  ;;  %v680_v2 = vld [vmem:[#allocation11 + $0x178] sm:$0xff] }
 0x1b1   : > { %v1548_v4 = vpack.c.bf16 %v686_v61, %v682_v59  ;;  %v681_v5 = vld [vmem:[#allocation11 + $0x180] sm:$0xff]  ;;  %v690_v8 = vld [vmem:[#allocation11 + $0x1c8] sm:$0xff]  ;;  %v1606_v9 = vpack.c.bf16 %v671_v0, %v667_v63  ;;  %v1608_v11 = vpack.c.bf16 %v680_v2, %v676_v1  ;;  %v675_v12 = vld [vmem:[#allocation11 + $0x150] sm:$0xff] }
 0x1b2   : > { %1539 = vmatpush1.bf16.msra.mxu0 %v1538_v41  ;;  %v685_v6 = vld [vmem:[#allocation11 + $0x1a0] sm:$0xff]  ;;  %v694_v10 = vld [vmem:[#allocation11 + $0x1e8] sm:$0xff]  ;;  %v679_v13 = vld [vmem:[#allocation11 + $0x170] sm:$0xff] }
 0x1b3   : > { %1541 = vmatprep.subr.bf16.mxu0 %v1540_v45  ;;  %1603 = vmatpush1.bf16.msra.mxu1 %v1602_v60  ;;  %v684_v14 = vld [vmem:[#allocation11 + $0x198] sm:$0xff]  ;;  %v1550_v16 = vpack.c.bf16 %v685_v6, %v681_v5  ;;  %v1552_v17 = vpack.c.bf16 %v694_v10, %v690_v8  ;;  %v689_v18 = vld [vmem:[#allocation11 + $0x1c0] sm:$0xff]  ;;  %v698_v20 = vld [vmem:[#allocation11 + $0x208] sm:$0xff]  ;;  %v1610_v21 = vpack.c.bf16 %v679_v13, %v675_v12 }
 0x1b4   : > { %1605 = vmatprep.subr.bf16.mxu1 %v1604_v62  ;;  %v688_v15 = vld [vmem:[#allocation11 + $0x1b8] sm:$0xff]  ;;  %v693_v19 = vld [vmem:[#allocation11 + $0x1e0] sm:$0xff]  ;;  %v702_v22 = vld [vmem:[#allocation11 + $0x228] sm:$0xff] }
 0x1b5   : > { %v1612_v23 = vpack.c.bf16 %v688_v15, %v684_v14  ;;  %v683_v24 = vld [vmem:[#allocation11 + $0x190] sm:$0xff]  ;;  %v692_v26 = vld [vmem:[#allocation11 + $0x1d8] sm:$0xff]  ;;  %v1554_v28 = vpack.c.bf16 %v693_v19, %v689_v18  ;;  %v1556_v29 = vpack.c.bf16 %v702_v22, %v698_v20  ;;  %v697_v30 = vld [vmem:[#allocation11 + $0x200] sm:$0xff] }
 0x1b6   : > { %1543 = vmatpush1.bf16.msra.mxu0 %v1542_v53  ;;  %v687_v25 = vld [vmem:[#allocation11 + $0x1b0] sm:$0xff]  ;;  %v696_v27 = vld [vmem:[#allocation11 + $0x1f8] sm:$0xff]  ;;  %v701_v31 = vld [vmem:[#allocation11 + $0x220] sm:$0xff] }
 0x1b7   : > { %1545 = vmatprep.subr.bf16.mxu0 %v1544_v56  ;;  %1607 = vmatpush1.bf16.msra.mxu1 %v1606_v9  ;;  %v706_v32 = vld [vmem:[#allocation11 + $0x248] sm:$0xff]  ;;  %v1614_v33 = vpack.c.bf16 %v687_v25, %v683_v24  ;;  %v1616_v35 = vpack.c.bf16 %v696_v27, %v692_v26  ;;  %v691_v36 = vld [vmem:[#allocation11 + $0x1d0] sm:$0xff]  ;;  %v700_v38 = vld [vmem:[#allocation11 + $0x218] sm:$0xff]  ;;  %v1558_v40 = vpack.c.bf16 %v701_v31, %v697_v30 }
 0x1b8   : > { %1609 = vmatprep.subr.bf16.mxu1 %v1608_v11  ;;  %v710_v34 = vld [vmem:[#allocation11 + $0x268] sm:$0xff]  ;;  %v695_v37 = vld [vmem:[#allocation11 + $0x1f0] sm:$0xff]  ;;  %v704_v39 = vld [vmem:[#allocation11 + $0x238] sm:$0xff] }
 0x1b9   : > { %v1560_v41 = vpack.c.bf16 %v710_v34, %v706_v32  ;;  %v705_v42 = vld [vmem:[#allocation11 + $0x240] sm:$0xff]  ;;  %v714_v44 = vld [vmem:[#allocation11 + $0x288] sm:$0xff]  ;;  %v1618_v45 = vpack.c.bf16 %v695_v37, %v691_v36  ;;  %v1620_v47 = vpack.c.bf16 %v704_v39, %v700_v38  ;;  %v699_v7 = vld [vmem:[#allocation11 + $0x210] sm:$0xff] }
 0x1ba   : > { %1547 = vmatpush1.bf16.msra.mxu0 %v1546_v3  ;;  %v709_v43 = vld [vmem:[#allocation11 + $0x260] sm:$0xff]  ;;  %v718_v46 = vld [vmem:[#allocation11 + $0x2a8] sm:$0xff]  ;;  %v703_v48 = vld [vmem:[#allocation11 + $0x230] sm:$0xff] }
 0x1bb   : > { %1549 = vmatprep.subr.bf16.mxu0 %v1548_v4  ;;  %1611 = vmatpush1.bf16.msra.mxu1 %v1610_v21  ;;  %v708_v49 = vld [vmem:[#allocation11 + $0x258] sm:$0xff]  ;;  %v1562_v51 = vpack.c.bf16 %v709_v43, %v705_v42  ;;  %v713_v52 = vld [vmem:[#allocation11 + $0x280] sm:$0xff]  ;;  %v1564_v53 = vpack.c.bf16 %v718_v46, %v714_v44  ;;  %v722_v55 = vld [vmem:[#allocation11 + $0x2c8] sm:$0xff]  ;;  %v1622_v57 = vpack.c.bf16 %v703_v48, %v699_v7 }
 0x1bc   : > { %1613 = vmatprep.subr.bf16.mxu1 %v1612_v23  ;;  %v712_v50 = vld [vmem:[#allocation11 + $0x278] sm:$0xff]  ;;  %v717_v54 = vld [vmem:[#allocation11 + $0x2a0] sm:$0xff]  ;;  %v726_v56 = vld [vmem:[#allocation11 + $0x2e8] sm:$0xff] }
 0x1bd   : > { %v1624_v58 = vpack.c.bf16 %v712_v50, %v708_v49  ;;  %v707_v59 = vld [vmem:[#allocation11 + $0x250] sm:$0xff]  ;;  %v619_v61 = vld [vmem:[#allocation3] sm:$0xff]  ;;  %v716_v62 = vld [vmem:[#allocation11 + $0x298] sm:$0xff]  ;;  %v1566_v0 = vpack.c.bf16 %v717_v54, %v713_v52  ;;  %v1568_v1 = vpack.c.bf16 %v726_v56, %v722_v55 }
 0x1be   : > { %1551 = vmatpush1.bf16.msra.mxu0 %v1550_v16  ;;  %v711_v60 = vld [vmem:[#allocation11 + $0x270] sm:$0xff]  ;;  %v720_v63 = vld [vmem:[#allocation11 + $0x2b8] sm:$0xff]  ;;  %825 = vmatprep.mubr.f32.mxu0 %v619_v61  ;;  %v721_v2 = vld [vmem:[#allocation11 + $0x2c0] sm:$0xff] }
 0x1bf   : > { %1553 = vmatprep.subr.bf16.mxu0 %v1552_v17  ;;  %1615 = vmatpush1.bf16.msra.mxu1 %v1614_v33  ;;  %v725_v3 = vld [vmem:[#allocation11 + $0x2e0] sm:$0xff]  ;;  %v730_v4 = vld [vmem:[#allocation11 + $0x308] sm:$0xff]  ;;  %v1626_v5 = vpack.c.bf16 %v711_v60, %v707_v59  ;;  %v1628_v8 = vpack.c.bf16 %v720_v63, %v716_v62  ;;  %v715_v9 = vld [vmem:[#allocation11 + $0x290] sm:$0xff] }
 0x1c0   : > { %1617 = vmatprep.subr.bf16.mxu1 %v1616_v35  ;;  %902 = vmatprep.mubr.f32.mxu1 %v619_v61  ;;  %v734_v6 = vld [vmem:[#allocation11 + $0x328] sm:$0xff]  ;;  %v719_v10 = vld [vmem:[#allocation11 + $0x2b0] sm:$0xff]  ;;  %v724_v11 = vld [vmem:[#allocation11 + $0x2d8] sm:$0xff]  ;;  %v1570_v13 = vpack.c.bf16 %v725_v3, %v721_v2 }
 0x1c1   : > { %v728_v12 = vld [vmem:[#allocation11 + $0x2f8] sm:$0xff]  ;;  %v1572_v14 = vpack.c.bf16 %v734_v6, %v730_v4  ;;  %v729_v15 = vld [vmem:[#allocation11 + $0x300] sm:$0xff]  ;;  %v738_v17 = vld [vmem:[#allocation11 + $0x348] sm:$0xff]  ;;  %v1630_v18 = vpack.c.bf16 %v719_v10, %v715_v9 }
 0x1c2   : > { %1555 = vmatpush1.bf16.msra.mxu0 %v1554_v28  ;;  %v733_v16 = vld [vmem:[#allocation11 + $0x320] sm:$0xff]  ;;  %v742_v19 = vld [vmem:[#allocation11 + $0x368] sm:$0xff]  ;;  %v1632_v20 = vpack.c.bf16 %v728_v12, %v724_v11  ;;  %v723_v21 = vld [vmem:[#allocation11 + $0x2d0] sm:$0xff] }
 0x1c3   : > { %1557 = vmatprep.subr.bf16.mxu0 %v1556_v29  ;;  %1619 = vmatpush1.bf16.msra.mxu1 %v1618_v45  ;;  %v727_v22 = vld [vmem:[#allocation11 + $0x2f0] sm:$0xff]  ;;  %v732_v23 = vld [vmem:[#allocation11 + $0x318] sm:$0xff]  ;;  %v1574_v25 = vpack.c.bf16 %v733_v16, %v729_v15  ;;  %v1576_v26 = vpack.c.bf16 %v742_v19, %v738_v17  ;;  %v737_v27 = vld [vmem:[#allocation11 + $0x340] sm:$0xff] }
 0x1c4   : > { %1621 = vmatprep.subr.bf16.mxu1 %v1620_v47  ;;  %v736_v24 = vld [vmem:[#allocation11 + $0x338] sm:$0xff]  ;;  %v741_v28 = vld [vmem:[#allocation11 + $0x360] sm:$0xff]  ;;  %v746_v29 = vld [vmem:[#allocation11 + $0x388] sm:$0xff]  ;;  %v1634_v30 = vpack.c.bf16 %v727_v22, %v723_v21 }
 0x1c5   : > { %v750_v31 = vld [vmem:[#allocation11 + $0x3a8] sm:$0xff]  ;;  %v1636_v32 = vpack.c.bf16 %v736_v24, %v732_v23  ;;  %v731_v33 = vld [vmem:[#allocation11 + $0x310] sm:$0xff]  ;;  %v740_v35 = vld [vmem:[#allocation11 + $0x358] sm:$0xff]  ;;  %v1578_v37 = vpack.c.bf16 %v741_v28, %v737_v27 }
 0x1c6   : > { %1559 = vmatpush1.bf16.msra.mxu0 %v1558_v40  ;;  %v735_v34 = vld [vmem:[#allocation11 + $0x330] sm:$0xff]  ;;  %v744_v36 = vld [vmem:[#allocation11 + $0x378] sm:$0xff]  ;;  %v1580_v38 = vpack.c.bf16 %v750_v31, %v746_v29  ;;  %v745_v39 = vld [vmem:[#allocation11 + $0x380] sm:$0xff] }
 0x1c7   : > { %1561 = vmatprep.subr.bf16.mxu0 %v1560_v41  ;;  %1623 = vmatpush1.bf16.msra.mxu1 %v1622_v57  ;;  %v749_v40 = vld [vmem:[#allocation11 + $0x3a0] sm:$0xff]  ;;  %v754_v41 = vld [vmem:[#allocation11 + $0x3c8] sm:$0xff]  ;;  %v1638_v42 = vpack.c.bf16 %v735_v34, %v731_v33  ;;  %v1640_v44 = vpack.c.bf16 %v744_v36, %v740_v35  ;;  %v739_v45 = vld [vmem:[#allocation11 + $0x350] sm:$0xff] }
 0x1c8   : > { %1625 = vmatprep.subr.bf16.mxu1 %v1624_v58  ;;  %v758_v43 = vld [vmem:[#allocation11 + $0x3e8] sm:$0xff]  ;;  %v743_v46 = vld [vmem:[#allocation11 + $0x370] sm:$0xff]  ;;  %v748_v47 = vld [vmem:[#allocation11 + $0x398] sm:$0xff]  ;;  %v1582_v48 = vpack.c.bf16 %v749_v40, %v745_v39 }
 0x1c9   : > { %v752_v7 = vld [vmem:[#allocation11 + $0x3b8] sm:$0xff]  ;;  %v1584_v49 = vpack.c.bf16 %v758_v43, %v754_v41  ;;  %v753_v50 = vld [vmem:[#allocation11 + $0x3c0] sm:$0xff]  ;;  %v1642_v52 = vpack.c.bf16 %v743_v46, %v739_v45  ;;  %v747_v54 = vld [vmem:[#allocation11 + $0x390] sm:$0xff] }
 0x1ca   : > { %1563 = vmatpush1.bf16.msra.mxu0 %v1562_v51  ;;  %v757_v51 = vld [vmem:[#allocation11 + $0x3e0] sm:$0xff]  ;;  %v751_v55 = vld [vmem:[#allocation11 + $0x3b0] sm:$0xff]  ;;  %v756_v56 = vld [vmem:[#allocation11 + $0x3d8] sm:$0xff] }
 0x1cb   : > { %1565 = vmatprep.subr.bf16.mxu0 %v1564_v53  ;;  %1627 = vmatpush1.bf16.msra.mxu1 %v1626_v5  ;;  %v1644_v53 = vpack.c.bf16 %v752_v7, %v748_v47  ;;  %v760_v57 = vld [vmem:[#allocation11 + $0x3f8] sm:$0xff]  ;;  %v1586_v58 = vpack.c.bf16 %v757_v51, %v753_v50  ;;  %v1646_v59 = vpack.c.bf16 %v751_v55, %v747_v54  ;;  %v755_v61 = vld [vmem:[#allocation11 + $0x3d0] sm:$0xff]  ;;  %v623_v63 = vld [vmem:[#allocation5] sm:$0xff] }
 0x1cc   : > { %1629 = vmatprep.subr.bf16.mxu1 %v1628_v8  ;;  %v1648_v60 = vpack.c.bf16 %v760_v57, %v756_v56  ;;  %v759_v62 = vld [vmem:[#allocation11 + $0x3f0] sm:$0xff]  ;;  %v624_v2 = vld [vmem:[#allocation5 + $0x8] sm:$0xff]  ;;  %v975_v3 = vld [vmem:[#allocation12] sm:$0xff] }
 0x1cd   : > { %v976_v4 = vld [vmem:[#allocation12 + $0x8] sm:$0xff]  ;;  %v977_v6 = vld [vmem:[#allocation12 + $0x10] sm:$0xff]  ;;  %v978_v8 = vld [vmem:[#allocation12 + $0x18] sm:$0xff] }
 0x1ce   : > { %1567 = vmatpush1.bf16.msra.mxu0 %v1566_v0  ;;  %v620_v0 = vld [vmem:[#allocation3 + $0x8] sm:$0xff]  ;;  %v1652_v5 = vpack.c.bf16 %v976_v4, %v975_v3  ;;  %v1656_v9 = vpack.c.bf16 %v978_v8, %v977_v6  ;;  %v979_v10 = vld [vmem:[#allocation12 + $0x20] sm:$0xff]  ;;  %v985_v19 = vld [vmem:[#allocation12 + $0x50] sm:$0xff] }
 0x1cf   : > { %1569 = vmatprep.subr.bf16.mxu0 %v1568_v1  ;;  %1631 = vmatpush1.bf16.msra.mxu1 %v1630_v18  ;;  %v1650_v1 = vpack.c.bf16 %v759_v62, %v755_v61  ;;  %v980_v11 = vld [vmem:[#allocation12 + $0x28] sm:$0xff]  ;;  %v983_v16 = vld [vmem:[#allocation12 + $0x40] sm:$0xff]  ;;  %v989_v24 = vld [vmem:[#allocation12 + $0x70] sm:$0xff] }
 0x1d0   : > { %1633 = vmatprep.subr.bf16.mxu1 %v1632_v20  ;;  %v1660_v12 = vpack.c.bf16 %v980_v11, %v979_v10  ;;  %v984_v17 = vld [vmem:[#allocation12 + $0x48] sm:$0xff]  ;;  %v986_v20 = vld [vmem:[#allocation12 + $0x58] sm:$0xff]  ;;  %v987_v22 = vld [vmem:[#allocation12 + $0x60] sm:$0xff] }
 0x1d1   : > { %v1668_v18 = vpack.c.bf16 %v984_v17, %v983_v16  ;;  %v1672_v21 = vpack.c.bf16 %v986_v20, %v985_v19  ;;  %v988_v23 = vld [vmem:[#allocation12 + $0x68] sm:$0xff]  ;;  %v625_v28 = vld [vmem:[#allocation2] sm:$0xff]  ;;  %v628_v39 = vld [vmem:[#allocation2 + $0x18] sm:$0xff] }
 0x1d2   : > { %1571 = vmatpush1.bf16.msra.mxu0 %v1570_v13  ;;  %v981_v13 = vld [vmem:[#allocation12 + $0x30] sm:$0xff]  ;;  %v626_v29 = vld [vmem:[#allocation2 + $0x8] sm:$0xff]  ;;  %v629_v34 = vld [vmem:[#allocation2 + $0x20] sm:$0xff] }
 0x1d3   : > { %1573 = vmatprep.subr.bf16.mxu0 %v1572_v14  ;;  %1635 = vmatpush1.bf16.msra.mxu1 %v1634_v30  ;;  %v982_v14 = vld [vmem:[#allocation12 + $0x38] sm:$0xff]  ;;  %v630_v36 = vld [vmem:[#allocation2 + $0x28] sm:$0xff]  ;;  %v631_v54 = vld [vmem:[#allocation2 + $0x30] sm:$0xff] }
 0x1d4   : > { %1637 = vmatprep.subr.bf16.mxu1 %v1636_v32  ;;  %v1664_v15 = vpack.c.bf16 %v982_v14, %v981_v13  ;;  %v632_v7 = vld [vmem:[#allocation2 + $0x38] sm:$0xff]  ;;  %v621_v4 = vld [vmem:[#allocation4] sm:$0xff] }
 0x1d6   : > { %1575 = vmatpush1.bf16.msra.mxu0 %v1574_v25  ;;  %v1676_v25 = vpack.c.bf16 %v988_v23, %v987_v22 }
 0x1d7   : > { %1577 = vmatprep.subr.bf16.mxu0 %v1576_v26  ;;  %1639 = vmatpush1.bf16.msra.mxu1 %v1638_v42  ;;  %v990_v26 = vld [vmem:[#allocation12 + $0x78] sm:$0xff] }
 0x1d8   : > { %1641 = vmatprep.subr.bf16.mxu1 %v1640_v44  ;;  %v1680_v27 = vpack.c.bf16 %v990_v26, %v989_v24  ;;  %v1348_v26 = vld [vmem:[%s2441_s5] ss:$0 sm:$0xff] }
 0x1da   : > { %1579 = vmatpush1.bf16.msra.mxu0 %v1578_v37 }
 0x1db   : > { %1581 = vmatprep.subr.bf16.mxu0 %v1580_v38  ;;  %1643 = vmatpush1.bf16.msra.mxu1 %v1642_v52 }
 0x1dc   : > { %1645 = vmatprep.subr.bf16.mxu1 %v1644_v53 }
 0x1de   : > { %1583 = vmatpush1.bf16.msra.mxu0 %v1582_v48  ;;  %v627_v48 = vld [vmem:[#allocation2 + $0x10] sm:$0xff] }
 0x1df   : > { %1585 = vmatprep.subr.bf16.mxu0 %v1584_v49  ;;  %1647 = vmatpush1.bf16.msra.mxu1 %v1646_v59 }
 0x1e0   : > { %1649 = vmatprep.subr.bf16.mxu1 %v1648_v60 }
 0x1e2   : > { %1587 = vmatpush1.bf16.msra.mxu0 %v1586_v58 }
 0x1e3   : > { %1651 = vmatpush1.bf16.msra.mxu1 %v1650_v1  ;;  %1653 = vmatprep.subr.bf16.mxu0 %v1652_v5 }
 0x1e5   : > { %826 = vmatmul.mubr.f32.vlgmr.msra.gmra.mrb[0].mxu0 %v623_v63 }
 0x1e6   : > { %831 = vmatprep.mubr.f32.mxu0 %v620_v0  ;;  %903 = vmatmul.mubr.f32.vlgmr.msra.gmra.mrb[0].mxu1 %v623_v63 }
 0x1e7   : > { %908 = vmatprep.mubr.f32.mxu1 %v620_v0  ;;  %1655 = vmatpush3.bf16.msra.mxu0 %v1652_v5 }
 0x1e8   : > { %1657 = vmatprep.subr.bf16.mxu0 %v1656_v9 }
 0x1e9   : > { %832 = vmatmul.mubr.f32.gmra.mrb[2].mxu0 %v624_v2 }
 0x1ea   : > { %909 = vmatmul.mubr.f32.gmra.mrb[2].mxu1 %v624_v2 }
 0x1eb   : > { %1659 = vmatpush3.bf16.msra.mxu0 %v1656_v9 }
 0x1ec   : > { %1661 = vmatprep.subr.bf16.mxu0 %v1660_v12 }
 0x1ef   : > { %1663 = vmatpush3.bf16.msra.mxu0 %v1660_v12  ;;  %v622_v12 = vld [vmem:[#allocation4 + $0x8] sm:$0xff] }
 0x1f0   : > { %1665 = vmatprep.subr.bf16.mxu0 %v1664_v15 }
 0x1f3   : > { %1667 = vmatpush3.bf16.msra.mxu0 %v1664_v15 }
 0x1f4   : > { %1669 = vmatprep.subr.bf16.mxu0 %v1668_v18 }
 0x1f7   : > { %1671 = vmatpush3.bf16.msra.mxu0 %v1668_v18 }
 0x1f8   : > { %1673 = vmatprep.subr.bf16.mxu0 %v1672_v21 }
 0x1fb   : > { %1675 = vmatpush3.bf16.msra.mxu0 %v1672_v21 }
 0x1fc   : > { %1677 = vmatprep.subr.bf16.mxu0 %v1676_v25 }
 0x1ff   : > { %1679 = vmatpush3.bf16.msra.mxu0 %v1676_v25 }
 0x200   : > { %1681 = vmatprep.subr.bf16.mxu0 %v1680_v27 }
 0x203   : > { %1683 = vmatpush3.bf16.msra.mxu0 %v1680_v27 }
 0x2b8   : > { %v827_v30 = vpop.f32.mrb[0].mxu0 }
 0x2b9   : > { %v915_v31 = vadd.f32 %v827_v30, %v625_v28  ;;  %v829_v32 = vpop.f32.mrb[1].mxu0  ;;  %v904_v42 = vpop.f32.mrb[0].mxu1 }
 0x2ba   : > { %v916_v33 = vadd.f32 %v829_v32, %v626_v29  ;;  %v906_v44 = vpop.f32.mrb[1].mxu1  ;;  %v917_v53 = vadd.f32 %v904_v42, %v627_v48  ;;  %v1106_v48 = vld [vmem:[#allocation14 + $0x10] sm:$0xff] (!%p1349_p8) }
 0x2bb   : > { %v1342_v35 = vmul.f32 -1.442695, %v915_v31  ;;  %v918_v46 = vadd.f32 %v906_v44, %v628_v39 }
 0x2bc   : > { %v1344_v37 = vmul.f32 -1.442695, %v916_v33  ;;  %v833_v38 = vpop.f32.mrb[2].mxu0 }
 0x2bd   : > { %1830 = vpow2.f32 %v1342_v35  ;;  %v919_v40 = vadd.f32 %v833_v38, %v629_v34  ;;  %v835_v41 = vpop.f32.mrb[3].mxu0  ;;  %v910_v49 = vpop.f32.mrb[2].mxu1  ;;  %v1346_v51 = vmul.f32 -1.442695, %v918_v46 }
 0x2be   : > { %1832 = vpow2.f32 %v1344_v37  ;;  %v920_v43 = vadd.f32 %v835_v41, %v630_v36  ;;  %v912_v50 = vpop.f32.mrb[3].mxu1  ;;  %v921_v59 = vadd.f32 %v910_v49, %v631_v54 }
 0x2bf   : > { %v1343_v45 = vmul.f32 -1.442695, %v919_v40  ;;  %v922_v52 = vadd.f32 %v912_v50, %v632_v7  ;;  %v1105_v7 = vld [vmem:[#allocation14 + $0x8] sm:$0xff] (!%p1349_p8)  ;;  %v1107_v50 = vld [vmem:[#allocation14 + $0x18] sm:$0xff] (!%p1349_p8) }
 0x2c0   : > { %v1345_v47 = vmul.f32 -1.442695, %v920_v43 }
 0x2c1   : > { %1834 = vpow2.f32 %v1343_v45  ;;  %v1347_v55 = vmul.f32 -1.442695, %v922_v52  ;;  %v1108_v52 = vld [vmem:[#allocation14 + $0x20] sm:$0xff] (!%p1349_p8) }
 0x2c2   : > { %1836 = vpow2.f32 %v1345_v47  ;;  %v1104_v47 = vld [vmem:[#allocation14] sm:$0xff] (!%p1349_p8) }
 0x2c3   : > { %1838 = vpow2.f32 %v1346_v51  ;;  %v1684_v49 = vpack.c.bf16 (!%p1349_p8), %v1105_v7, %v1104_v47  ;;  %v1688_v51 = vpack.c.bf16 (!%p1349_p8), %v1107_v50, %v1106_v48 }
 0x2c4   : > { %1840 = vtanh.f32 %v917_v53  ;;  %v1109_v53 = vld [vmem:[#allocation14 + $0x28] sm:$0xff] (!%p1349_p8) }
 0x2c5   : > { %1842 = vpow2.f32 %v1347_v55  ;;  %1685 = vmatprep.subr.bf16.mxu0 (!%p1349_p8), %v1684_v49  ;;  %v1692_v54 = vpack.c.bf16 (!%p1349_p8), %v1109_v53, %v1108_v52  ;;  %v1110_v55 = vld [vmem:[#allocation14 + $0x30] sm:$0xff] (!%p1349_p8) }
 0x2c7   : > { %v1831_v56 = vpop.eup %1830 }
 0x2c8   : > { %v1833_v57 = vpop.eup %1832  ;;  %v929_v58 = vadd.f32 1.0, %v1831_v56  ;;  %v1111_v56 = vld [vmem:[#allocation14 + $0x38] sm:$0xff] (!%p1349_p8) }
 0x2c9   : > { %v941_v60 = vadd.f32 1.0, %v1833_v57  ;;  %v1696_v57 = vpack.c.bf16 (!%p1349_p8), %v1111_v56, %v1110_v55 }
 0x2ca   : > { %1844 = vrcp.f32 %v929_v58 }
 0x2cb   : > { %v1835_v61 = vpop.eup %1834  ;;  %1846 = vrcp.f32 %v941_v60  ;;  %v1113_v60 = vld [vmem:[#allocation14 + $0x48] sm:$0xff] (!%p1349_p8) }
 0x2cc   : > { %v1837_v62 = vpop.eup %1836  ;;  %v930_v63 = vadd.f32 1.0, %v1835_v61  ;;  %1848 = vtanh.f32 %v921_v59  ;;  %v1112_v59 = vld [vmem:[#allocation14 + $0x40] sm:$0xff] (!%p1349_p8) }
 0x2cd   : > { %v942_v0 = vadd.f32 1.0, %v1837_v62  ;;  %v1839_v1 = vpop.eup %1838  ;;  %v1700_v62 = vpack.c.bf16 (!%p1349_p8), %v1113_v60, %v1112_v59 }
 0x2ce   : > { %1850 = vrcp.f32 %v930_v63  ;;  %v1841_v2 = vpop.eup %1840  ;;  %v955_v6 = vadd.f32 1.0, %v1839_v1  ;;  %v1114_v63 = vld [vmem:[#allocation14 + $0x50] sm:$0xff] (!%p1349_p8) }
 0x2cf   : > { %1852 = vrcp.f32 %v942_v0  ;;  %v1843_v3 = vpop.eup %1842  ;;  %v1115_v0 = vld [vmem:[#allocation14 + $0x58] sm:$0xff] (!%p1349_p8) }
 0x2d0   : > { %1854 = vrcp.f32 %v955_v6  ;;  %v956_v15 = vadd.f32 1.0, %v1843_v3  ;;  %v1704_v1 = vpack.c.bf16 (!%p1349_p8), %v1115_v0, %v1114_v63  ;;  %v1117_v3 = vld [vmem:[#allocation14 + $0x68] sm:$0xff] (!%p1349_p8)  ;;  %v1119_v6 = vld [vmem:[#allocation14 + $0x78] sm:$0xff] (!%p1349_p8) }
 0x2d4   : > { %v1845_v5 = vpop.eup %1844 }
 0x2d5   : > { %v1847_v8 = vpop.eup %1846  ;;  %v963_v9 = vmul.f32 %v1845_v5, %v1841_v2  ;;  %v1116_v2 = vld [vmem:[#allocation14 + $0x60] sm:$0xff] (!%p1349_p8)  ;;  %v1118_v5 = vld [vmem:[#allocation14 + $0x70] sm:$0xff] (!%p1349_p8) }
 0x2d6   : > { %v1849_v10 = vpop.eup %1848  ;;  %v961_v11 = vmul.f32 %v1847_v8, %v621_v4  ;;  %v1708_v4 = vpack.c.bf16 (!%p1349_p8), %v1117_v3, %v1116_v2  ;;  %v1712_v8 = vpack.c.bf16 (!%p1349_p8), %v1119_v6, %v1118_v5 }
 0x2d8   : > { %v1851_v13 = vpop.eup %1850  ;;  %v965_v14 = vadd.f32 %v963_v9, %v961_v11 }
 0x2d9   : > { %v1853_v16 = vpop.eup %1852  ;;  %v964_v17 = vmul.f32 %v1851_v13, %v1849_v10 }
 0x2da   : > { %v962_v18 = vmul.f32 %v1853_v16, %v622_v12  ;;  %973 = vst [vmem:[#allocation4] sm:$0xff] %v965_v14  ;;  %1856 = vtanh.f32 %v965_v14  ;;  %v1855_v20 = vpop.eup %1854 }
 0x2db   : > { %1858 = vrcp.f32 %v956_v15 }
 0x2dc   : > { %v966_v19 = vadd.f32 %v964_v17, %v962_v18 }
 0x2de   : > { %1860 = vtanh.f32 %v966_v19  ;;  %974 = vst [vmem:[#allocation4 + $0x8] sm:$0xff] %v966_v19 }
 0x2e4   : > { %v1857_v21 = vpop.eup %1856 }
 0x2e5   : > { %v969_v22 = vmul.f32 %v1857_v21, %v1855_v20  ;;  %v1859_v23 = vpop.eup %1858 }
 0x2e7   : > { %971 = vst [vmem:[#allocation3] sm:$0xff] %v969_v22  ;;  %1422 = vmatprep.mubr.f32.mxu0 %v969_v22 }
 0x2e8   : > { %v1861_v24 = vpop.eup %1860 }
 0x2e9   : > { %v970_v25 = vmul.f32 %v1861_v24, %v1859_v23 }
 0x2eb   : > { %972 = vst [vmem:[#allocation3 + $0x8] sm:$0xff] %v970_v25  ;;  %1423 = vmatmul.mubr.f32.vlgmr.msra.gmra.mrb[4].mxu0 %v970_v25 }
 0x2ec   : > { %1687 = vmatpush3.bf16.msra.mxu0 (!%p1349_p8), %v1684_v49 }
 0x2ed   : > { %1689 = vmatprep.subr.bf16.mxu0 (!%p1349_p8), %v1688_v51 }
 0x2f0   : > { %1691 = vmatpush3.bf16.msra.mxu0 (!%p1349_p8), %v1688_v51 }
 0x2f1   : > { %1693 = vmatprep.subr.bf16.mxu0 (!%p1349_p8), %v1692_v54 }
 0x2f4   : > { %1695 = vmatpush3.bf16.msra.mxu0 (!%p1349_p8), %v1692_v54 }
 0x2f5   : > { %1697 = vmatprep.subr.bf16.mxu0 (!%p1349_p8), %v1696_v57 }
 0x2f8   : > { %1699 = vmatpush3.bf16.msra.mxu0 (!%p1349_p8), %v1696_v57 }
 0x2f9   : > { %1701 = vmatprep.subr.bf16.mxu0 (!%p1349_p8), %v1700_v62 }
 0x2fc   : > { %1703 = vmatpush3.bf16.msra.mxu0 (!%p1349_p8), %v1700_v62 }
 0x2fd   : > { %1705 = vmatprep.subr.bf16.mxu0 (!%p1349_p8), %v1704_v1 }
 0x300   : > { %1707 = vmatpush3.bf16.msra.mxu0 (!%p1349_p8), %v1704_v1 }
 0x301   : > { %1709 = vmatprep.subr.bf16.mxu0 (!%p1349_p8), %v1708_v4 }
 0x304   : > { %1711 = vmatpush3.bf16.msra.mxu0 (!%p1349_p8), %v1708_v4 }
 0x305   : > { %1713 = vmatprep.subr.bf16.mxu0 (!%p1349_p8), %v1712_v8 }
 0x308   : > { %1715 = vmatpush3.bf16.msra.mxu0 (!%p1349_p8), %v1712_v8 }
 0x3be   : > { %v1424_v27 = vpop.f32.mrb[4].mxu0 }
 0x3bf   : > { %v1064_v28 = vpop.f32.mrb[5].mxu0  ;;  %v1070_v30 = vadd.f32 %v1424_v27, %v1348_v26 }
 0x3c0   : > { %v1065_v29 = vadd.f32 %v1348_v26, %v1064_v28 }
 0x3c2   : > { %1073 = vmax.xlane.f32.xlu0 %v1065_v29 }
 0x3c6   : > { %1075 = vmax.xlane.f32.xlu0 %v1070_v30 }
 0x44f   : > { %v1074_v31 = vpop.xlane.xlu0 %1073 }
 0x450   : > { %v1077_v32 = vsub.f32 %v1065_v29, %v1074_v31 }
 0x452   : > { %v1079_v33 = vmul.f32 1.442695, %v1077_v32 }
 0x453   : > { %v1076_v34 = vpop.xlane.xlu0 %1075 }
 0x454   : > { %v1078_v35 = vsub.f32 %v1070_v30, %v1076_v34  ;;  %1862 = vpow2.f32 %v1079_v33 }
 0x456   : > { %v1081_v36 = vmul.f32 1.442695, %v1078_v35 }
 0x458   : > { %1864 = vpow2.f32 %v1081_v36 }
 0x45e   : > { %v1863_v37 = vpop.eup %1862 }
 0x45f   : > { %1083 = vadd.xlane.f32.xlu1 %v1863_v37 }
 0x462   : > { %v1865_v38 = vpop.eup %1864 }
 0x463   : > { %1085 = vadd.xlane.f32.xlu1 %v1865_v38 }
 0x4ec   : > { %v1084_v39 = vpop.xlane.xlu1 %1083 }
 0x4ed   : > { %1866 = vlog2.f32 %v1084_v39 }
 0x4f0   : > { %v1086_v40 = vpop.xlane.xlu1 %1085 }
 0x4f1   : > { %1868 = vlog2.f32 %v1086_v40 }
 0x4f2   : > { %1870 = vrcp.f32 (!%p1349_p8), %v1084_v39 }
 0x4f3   : > { %1872 = vrcp.f32 (!%p1349_p8), %v1086_v40 }
 0x4f7   : > { %v1867_v41 = vpop.eup %1866 }
 0x4f8   : > { %v1088_v42 = vmul.f32 0.6931472, %v1867_v41 }
 0x4fa   : > { %v1091_v43 = vsub.f32 %v1077_v32, %v1088_v42  ;;  %1099 = sbr.rel (%p1349_p8) target bundleno = 1494 (0x5d6), region = 76 }
 0x4fb   : > { %v1869_v44 = vpop.eup %1868 }
 0x4fc   : > { %1093 = vst [vmem:[%s2359_s12] sm:$0xff] %v1091_v43  ;;  %v1090_v45 = vmul.f32 0.6931472, %v1869_v44  ;;  %v1871_v58 = vpop.eup (!%p1349_p8), %1870 }
 0x4fd   : > { %v1102_v61 = vmul.f32 (!%p1349_p8), %v1871_v58, %v1863_v37  ;;  %v1873_v9 = vpop.eup (!%p1349_p8), %1872 }
 0x4fe   : > { %v1092_v46 = vsub.f32 %v1078_v35, %v1090_v45  ;;  %v1103_v10 = vmul.f32 (!%p1349_p8), %v1873_v9, %v1865_v38 }
 0x4ff   : > { %1457 = vmatprep.mubr.f32.mxu0 (!%p1349_p8), %v1102_v61 }
 0x500   : > { %1094 = vst [vmem:[%s2359_s12 + $0x8] sm:$0xff] %v1092_v46  ;;  %1458 = vmatmul.mubr.f32.vlgmr.msra.gmra.mrb[0].mxu0 (!%p1349_p8), %v1103_v10 }
 0x5d3   : > { %v1459_v11 = vpop.f32.mrb[0].mxu0 }
 0x5d4   : > { %1196 = vst [vmem:[#allocation5 + $0x8] sm:$0xff] %v1459_v11  ;;  %v1186_v12 = vpop.f32.mrb[1].mxu0 }
 0x5d5   : > { %1195 = vst [vmem:[#allocation5] sm:$0xff] %v1186_v12 }
 0x5d6 PF: > { %s1351_s24 = sshll.u32 %s2096_s27, 7  ;;  %s1213_s26 = sshll.u32 %s2359_s12, 4  ;;  %s2386_s26 = int_to_ptr.vmem [resolvable:$true] %s1213_s26 }
 0x5d7   : > { %s2383_s23 = scalar_lea.hbm %s2443_s7, %s1351_s24  ;;  %s2390_s14 = scalar_lea.sflag [#allocation8], %s349_s15 }
 0x5d8   : > { %s2014_s30 = scalar_lea.vmem %s2386_s26, 256  ;;  %p2473_p11 = scmp.ne.s32.totalorder %s2460_s11, 0 }
 0x5d9   : > { %p2015_p10 = scmp.ne.s32.totalorder %s2386_s26, %s2014_s30  ;;  %s2116_s27 = smov [#allocation15]  }
 0x5da   : > { %s2018_s10 = sshll.u32 %s2116_s27, 4  ;;  %s2019_s10 = int_to_ptr.vmem [resolvable:$false] %s2018_s10 }
 0x5db   : > { %p2016_p0 = pnand %p2015_p10, %p2473_p11  ;;  %s2020_s20 = scalar_lea.vmem %s2019_s10, 512 }
 0x5dc   : > { %p2021_p3 = scmp.lt.s32.totalorder %s2386_s26, %s2019_s10  ;;  %p2022_p5 = scmp.lt.s32.totalorder %s2020_s20, %s2014_s30 }
 0x5dd   : > { %p2017_p2 = pneg %p2016_p0 }
 0x5de   : > { %p2023_p6 = por %p2022_p5, %p2021_p3 }
 0x5e0   : > { %p2024_p7 = pnand %p2023_p6, %p2017_p2 }
 0x5e2   : > { %2027 = shalt.err (!%p2024_p7)
}
 0x5e3   : > { %s2028_s17 = scalar_lea.hbm %s2383_s23, 256  ;;  %s2032_s15 = scalar_lea.hbm %s2443_s7, 1024 }
 0x5e4   : > { %p2029_p9 = scmp.ne.s32.totalorder %s2383_s23, %s2028_s17  ;;  %p2033_p1 = scmp.lt.u32.totalorder %s2383_s23, %s2443_s7 }
 0x5e5   : > { %p2034_p13 = scmp.lt.u32.totalorder %s2032_s15, %s2028_s17  ;;  %p2036_p10 = scmp.lt.u32.totalorder %s2028_s17, %s2383_s23 }
 0x5e6   : > { %p2030_p12 = pnand %p2029_p9, %p2473_p11 }
 0x5e7   : > { %p2035_p8 = por %p2034_p13, %p2033_p1 }
 0x5e8   : > { %p2031_p4 = pneg %p2030_p12 }
 0x5e9   : > { %p2037_p0 = por %p2036_p10, %p2035_p8 }
 0x5eb   : > { %p2038_p2 = pnand %p2037_p0, %p2031_p4 }
 0x5ed   : > { %2041 = shalt.err (!%p2038_p2)
}
 0x5ee   : > { %s2117_s16 = smov 128   ;;  %s2118_s28 = smov 512  }
 0x5ef   : > { %s2119_s18 = smov 8  }
 0x5f0   : > { %1736 = dma.vmem_to_hbm [thread:$0]  (%p2473_p11), %s2386_s26, 256, %s2383_s23, %s2390_s14, %s2117_s16, %s2118_s28, %s2119_s18  }
 0x5f1 PF: > { %s2474_s21 = sld [smem:[#allocation20_spill]]  ;;  %s2475_s1 = sld [smem:[#allocation24_spill]] }
 0x5f2   : > { %p1768_p3 = scmp.ge.s32.totalorder %s2104_s29, 2 }
 0x5f7   : > { %s1228_s24 = sand.u32 1, %s2474_s21   ;;  %p2476_p5 = scmp.ne.s32.totalorder %s2475_s1, 0 }
 0x5f8   : > { %s1229_s13 = scalar_lea.sflag [#allocation8], %s1228_s24 }
 0x5f9   : > { %p1755_p6 = pnand %p1768_p3, %p2476_p5 }
 0x5fb   : > { %2079 = dma.done.wait (!%p1755_p6), %s1229_s13, 256  }
 0x5fc   : > { %2081 = vsyncadd (!%p1755_p6), %s1229_s13, 4294967040  ;;  %s23_s29 = sadd.s32 1, %s2104_s29   ;;  %s2477_s22 = sld [smem:[#allocation21_spill]] }
 0x5fd   : > { %p20_p7 = scmp.ge.s32.totalorder %s23_s29, 6   ;;  %s2478_s26 = sld [smem:[#allocation25_spill]] }
 0x5fe   : > { %s2479_s27 = sld [smem:[#allocation22_spill]]  ;;  %s2480_s28 = sld [smem:[#allocation23_spill]] }
 0x5ff   : > { %s2481_s24 = smov %s2088_s25  ;;  %22 = sbr.rel (!%p20_p7) target bundleno = 9 (0x9), region = 110 }
 0x602   : > { %s2482_s25 = smov %s2477_s22 }
 0x606   :  { %1234 = vsyncpa [#allocation7], 1 }
 0x607   :  { %1236 = vsyncpa [#allocation7 + $0x1], 1 }
 0x608   :  { %1237 = vsyncpa [#allocation10], 1 }
 0x609   :  { %1238 = vsyncpa [#allocation13], 1 }
 0x60a   :  { %1239 = vsyncpa [#allocation8], 1 }
 0x60b   :  { %1241 = vsyncpa [#allocation8 + $0x1], 1 }

</bundles_post_ra>
